<compile_context>
chip_gen: v7x
topology: tpu7x:2x2x1
jax: 0.10.0
libtpu: 0.0.40
codegen_flags: <defaults>
</compile_context>

<pallas_src>
import functools

import jax
import jax.numpy as jnp
from jax.experimental import pallas as pl
from jax.experimental.pallas import tpu as pltpu


@functools.lru_cache(maxsize=None)
def _vmem_limit():
    """Scoped-VMEM budget: ~3/4 of physical, capped at 64 MiB (=> 48 MiB on v7x)."""
    try:
        cap = pltpu.get_tpu_info().vmem_capacity_bytes
    except Exception:
        cap = 128 * 1024 * 1024
    return int(min(64 * 1024 * 1024, (cap * 3) // 4))


def _pick_row_tile(h, target):
    th = max(1, min(target, h))
    while h % th:
        th -= 1
    return th


# --------------------------------------------------------------------------
# Kernels 1/2: (optional BN-affine + ReLU prologue) -> 3x3 conv (pad=1) ->
# raw conv output + per-(image, row-tile) BN partial stats.
# Grid = (batch, H-row-tiles); one step = one row tile of one image.
# --------------------------------------------------------------------------
def _conv3x3_bn_stats_kernel(x_ref, scale_ref, shift_ref, w_ref,
                             out_ref, stats_ref, pad_ref, *col_refs,
                             TH, W, Cin, Cout, pre_affine_relu, matmul_dtype,
                             use_im2col):
    r = pl.program_id(1)
    nrow = pl.num_programs(1)
    row0 = pl.multiple_of(r * TH, TH)

    if pre_affine_relu:
        scale = scale_ref[...].reshape(1, 1, Cin)
        shift = shift_ref[...].reshape(1, 1, Cin)

    def prologue(v):
        # f32 VPU math for BN1 affine + ReLU; only the MXU input is narrowed.
        if pre_affine_relu:
            v = jnp.maximum(v * scale + shift, 0.0)
        return v.astype(matmul_dtype)

    # Padded (TH+2, W+2, Cin) row tile in VMEM (stored in matmul_dtype).
    # Zero the halo: full top/bottom rows (incl. corners), interior-only side
    # columns.  Interior is fully overwritten below.
    pad_ref[0:1, :, :] = jnp.zeros((1, W + 2, Cin), matmul_dtype)
    pad_ref[TH + 1:TH + 2, :, :] = jnp.zeros((1, W + 2, Cin), matmul_dtype)
    pad_ref[1:TH + 1, 0:1, :] = jnp.zeros((TH, 1, Cin), matmul_dtype)
    pad_ref[1:TH + 1, W + 1:W + 2, :] = jnp.zeros((TH, 1, Cin), matmul_dtype)

    # Center rows of this row tile.
    xc = x_ref[:, pl.ds(row0, TH), :, :].reshape(TH, W, Cin)
    pad_ref[1:TH + 1, 1:W + 1, :] = prologue(xc)

    # Top / bottom halo rows come from neighbouring row tiles of the SAME image
    # (read from the resident full-image input block); zero at batch-image edge.
    @pl.when(r > 0)
    def _():
        xt = x_ref[:, pl.ds(row0 - 1, 1), :, :].reshape(1, W, Cin)
        pad_ref[0:1, 1:W + 1, :] = prologue(xt)

    @pl.when(r < nrow - 1)
    def _():
        xb = x_ref[:, pl.ds(row0 + TH, 1), :, :].reshape(1, W, Cin)
        pad_ref[TH + 1:TH + 2, 1:W + 1, :] = prologue(xb)

    if use_im2col:
        # Small Cin: build one (TH*W, 9*Cin) patch matrix (already in
        # matmul_dtype) and issue a single wide-K MXU matmul.
        col_ref = col_refs[0]
        for ky in range(3):
            for kx in range(3):
                t = ky * 3 + kx
                col_ref[:, t * Cin:(t + 1) * Cin] = (
                    pad_ref[ky:ky + TH, kx:kx + W, :].reshape(TH * W, Cin))
        acc = jnp.dot(col_ref[...], w_ref[...],
                      preferred_element_type=jnp.float32)       # (TH*W, Cout) f32
    else:
        # Cin >= 128: each tap already fills the MXU K dim -- skip im2col and
        # accumulate 9 matmuls straight from the padded tile (no 10x copy traffic).
        acc = jnp.zeros((TH * W, Cout), jnp.float32)
        for ky in range(3):
            for kx in range(3):
                t = ky * 3 + kx
                tap = pad_ref[ky:ky + TH, kx:kx + W, :].reshape(TH * W, Cin)
                acc = acc + jnp.dot(tap, w_ref[t * Cin:(t + 1) * Cin, :],
                                    preferred_element_type=jnp.float32)

    out_ref[...] = acc.reshape(1, TH, W, Cout)

    # Per-(image, row-tile) BN partials: [sum, sum of squares] per channel.
    # (One-pass E[x^2]-E[x]^2; partials are per row tile which keeps the f32
    # sums better conditioned than a whole-batch one-pass sum.)
    s = jnp.sum(acc, axis=0, keepdims=True)                      # (1, Cout)
    sq = jnp.sum(acc * acc, axis=0, keepdims=True)               # (1, Cout)
    stats_ref[:, :, 0:1, :] = s.reshape(1, 1, 1, Cout)
    stats_ref[:, :, 1:2, :] = sq.reshape(1, 1, 1, Cout)


def _conv3x3_bn_stats(x_nhwc, scale, shift, w_flat, *, pre_affine_relu,
                      matmul_dtype, row_tile=8):
    N, H, W, Cin = x_nhwc.shape
    Cout = w_flat.shape[1]
    TH = _pick_row_tile(H, row_tile)
    nrow = H // TH
    use_im2col = Cin < 128

    kernel = functools.partial(
        _conv3x3_bn_stats_kernel, TH=TH, W=W, Cin=Cin, Cout=Cout,
        pre_affine_relu=pre_affine_relu, matmul_dtype=matmul_dtype,
        use_im2col=use_im2col)

    scratch = [pltpu.VMEM((TH + 2, W + 2, Cin), matmul_dtype)]   # padded row tile
    if use_im2col:
        scratch.append(pltpu.VMEM((TH * W, 9 * Cin), matmul_dtype))  # im2col patches

    def build(single_buffer_consts):
        if single_buffer_consts:
            # Constant-index blocks: single-buffer them (no second VMEM copy).
            const_spec = lambda shp, imap: pl.BlockSpec(
                shp, imap, pipeline_mode=pl.Buffered(1))
        else:
            const_spec = pl.BlockSpec
        return pl.pallas_call(
            kernel,
            grid=(N, nrow),
            in_specs=[
                # Full image resident per batch index (constant across row axis).
                pl.BlockSpec((1, H, W, Cin), lambda n, r: (n, 0, 0, 0)),
                const_spec((1, Cin), lambda n, r: (0, 0)),
                const_spec((1, Cin), lambda n, r: (0, 0)),
                const_spec((9 * Cin, Cout), lambda n, r: (0, 0)),
            ],
            out_specs=(
                pl.BlockSpec((1, TH, W, Cout), lambda n, r: (n, r, 0, 0)),
                pl.BlockSpec((1, 1, 2, Cout), lambda n, r: (n, r, 0, 0)),
            ),
            out_shape=(
                jax.ShapeDtypeStruct((N, H, W, Cout), jnp.float32),
                jax.ShapeDtypeStruct((N, nrow, 2, Cout), jnp.float32),
            ),
            scratch_shapes=scratch,
            compiler_params=pltpu.CompilerParams(
                dimension_semantics=("parallel", "parallel"),
                vmem_limit_bytes=_vmem_limit()),
        )

    try:
        return build(True)(x_nhwc, scale, shift, w_flat)
    except Exception:
        # pl.Buffered(1) (single-buffered constant blocks) unsupported on this
        # JAX build -- fall back to default double buffering.
        return build(False)(x_nhwc, scale, shift, w_flat)


# --------------------------------------------------------------------------
# Kernel 3: BN2 affine + residual add + ReLU (memory-bound epilogue).
# Blocks are presented lane-dense ((N, L/128, 128) when possible) so the HBM
# stores are wide and unmasked; conv2 output is aliased into the result.
# --------------------------------------------------------------------------
def _bn_residual_relu_kernel(y_ref, x_ref, scale_ref, shift_ref, out_ref):
    out_ref[...] = jnp.maximum(
        y_ref[...] * scale_ref[...] + shift_ref[...] + x_ref[...], 0.0)


def _bn_residual_relu(y_raw, identity, scale_c, shift_c):
    N, H, W, C = y_raw.shape
    L = H * W * C
    # Per-channel affine expanded to match the NHWC flattening (channel-minor).
    scale_flat = jnp.tile(scale_c.reshape(1, C), (1, H * W))     # (1, L)
    shift_flat = jnp.tile(shift_c.reshape(1, C), (1, H * W))
    if L % 128 == 0:
        rows, lanes = L // 128, 128          # lane-dense, unmasked stores
    else:
        rows, lanes = H * W, C               # fallback layout

    y2 = y_raw.reshape(N, rows, lanes)
    x2 = identity.reshape(N, rows, lanes)
    sc = scale_flat.reshape(1, rows, lanes)
    sh = shift_flat.reshape(1, rows, lanes)

    out = pl.pallas_call(
        _bn_residual_relu_kernel,
        grid=(N,),
        in_specs=[
            pl.BlockSpec((1, rows, lanes), lambda n: (n, 0, 0)),
            pl.BlockSpec((1, rows, lanes), lambda n: (n, 0, 0)),
            pl.BlockSpec((1, rows, lanes), lambda n: (0, 0, 0)),
            pl.BlockSpec((1, rows, lanes), lambda n: (0, 0, 0)),
        ],
        out_specs=pl.BlockSpec((1, rows, lanes), lambda n: (n, 0, 0)),
        out_shape=jax.ShapeDtypeStruct((N, rows, lanes), jnp.float32),
        input_output_aliases={0: 0},         # reuse conv2's HBM buffer
        compiler_params=pltpu.CompilerParams(
            dimension_semantics=("parallel",),
            vmem_limit_bytes=_vmem_limit()),
    )(y2, x2, sc, sh)
    return out.reshape(N, H, W, C)


# --------------------------------------------------------------------------
# JAX glue: fold per-(image, row-tile) partial sums into global training-mode
# BN (biased variance) and precompute the per-channel affine (scale, shift).
# --------------------------------------------------------------------------
def _finalize_bn(stats, gamma, beta, count, eps):
    s = jnp.sum(stats.astype(jnp.float32), axis=(0, 1))          # (2, C)
    mean = s[0] / count
    var = jnp.maximum(s[1] / count - mean * mean, 0.0)           # E[x^2]-E[x]^2
    scale = gamma.astype(jnp.float32) * jax.lax.rsqrt(var + eps)
    shift = beta.astype(jnp.float32) - mean * scale
    return scale.reshape(1, -1), shift.reshape(1, -1)


def basic_block_forward_nhwc(x_nhwc, w1, w2, g1, b1, g2, b2, eps=1e-5,
                             matmul_dtype=jnp.bfloat16, row_tile=8):
    """NHWC BasicBlock forward. w1/w2 in PyTorch layout (Cout, Cin, 3, 3).

    matmul_dtype=bf16 (default) feeds the MXU at native bf16 rate on every
    generation (v5e/v6e/v7x); accumulation and all elementwise math stay f32.
    """
    N, H, W, C = x_nhwc.shape
    Cout = w1.shape[0]
    assert Cout == C, "downsample is None => in_channels must equal out_channels"

    x = x_nhwc.astype(jnp.float32)
    # (Cout, Cin, 3, 3) -> (3, 3, Cin, Cout) -> (9*Cin, Cout), tap-major rows.
    w1k = jnp.transpose(w1, (2, 3, 1, 0)).reshape(9 * C, Cout).astype(matmul_dtype)
    w2k = jnp.transpose(w2, (2, 3, 1, 0)).reshape(9 * Cout, Cout).astype(matmul_dtype)
    ones = jnp.ones((1, C), jnp.float32)
    zeros = jnp.zeros((1, C), jnp.float32)
    count = N * H * W

    # conv1 (+ BN1 partial stats)
    y1_raw, st1 = _conv3x3_bn_stats(x, ones, zeros, w1k, pre_affine_relu=False,
                                    matmul_dtype=matmul_dtype, row_tile=row_tile)
    scale1, shift1 = _finalize_bn(st1, g1, b1, count, eps)

    # BN1 + ReLU fused into conv2's prologue; conv2 (+ BN2 partial stats)
    y2_raw, st2 = _conv3x3_bn_stats(y1_raw, scale1, shift1, w2k, pre_affine_relu=True,
                                    matmul_dtype=matmul_dtype, row_tile=row_tile)
    scale2, shift2 = _finalize_bn(st2, g2, b2, count, eps)

    # BN2 + residual + ReLU (identity read from the single HBM activation copy)
    return _bn_residual_relu(y2_raw, x, scale2, shift2)


def basic_block_forward(x_nchw, w1, w2, g1, b1, g2, b2, eps=1e-5,
                        matmul_dtype=jnp.bfloat16, row_tile=8):
    """NCHW (PyTorch-layout) wrapper. Prefer basic_block_forward_nhwc to avoid
    the two layout-transpose HBM round-trips."""
    x = jnp.transpose(x_nchw, (0, 2, 3, 1))
    out = basic_block_forward_nhwc(x, w1, w2, g1, b1, g2, b2, eps=eps,
                                   matmul_dtype=matmul_dtype, row_tile=row_tile)
    return jnp.transpose(out, (0, 3, 1, 2))


def _reference_forward(x_nchw, w1, w2, g1, b1, g2, b2, eps=1e-5):
    """Pure-JAX reference (same semantics) for verification."""
    def conv(x, w):
        return jax.lax.conv_general_dilated(
            x, w, window_strides=(1, 1), padding=((1, 1), (1, 1)),
            dimension_numbers=('NCHW', 'OIHW', 'NCHW'))

    def bn(x, g, b):
        mean = jnp.mean(x, axis=(0, 2, 3), keepdims=True)
        var = jnp.mean((x - mean) ** 2, axis=(0, 2, 3), keepdims=True)
        return (x - mean) * jax.lax.rsqrt(var + eps) * g.reshape(1, -1, 1, 1) \
            + b.reshape(1, -1, 1, 1)

    out = jnp.maximum(bn(conv(x_nchw, w1), g1, b1), 0.0)
    out = bn(conv(out, w2), g2, b2)
    return jnp.maximum(out + x_nchw, 0.0)


if __name__ == "__main__":
    key = jax.random.PRNGKey(0)
    k_x, k_w1, k_w2, k_g1, k_b1, k_g2, k_b2 = jax.random.split(key, 7)

    N, C, H, W = 2, 4, 16, 16
    x = jax.random.normal(k_x, (N, C, H, W), jnp.float32)

    # Deterministic synthetic parameters (shapes per BasicBlock(4, 4)).
    w1 = 0.1 * jax.random.normal(k_w1, (C, C, 3, 3), jnp.float32)
    w2 = 0.1 * jax.random.normal(k_w2, (C, C, 3, 3), jnp.float32)
    g1 = 1.0 + 0.1 * jax.random.normal(k_g1, (C,), jnp.float32)
    b1 = 0.1 * jax.random.normal(k_b1, (C,), jnp.float32)
    g2 = 1.0 + 0.1 * jax.random.normal(k_g2, (C,), jnp.float32)
    b2 = 0.1 * jax.random.normal(k_b2, (C,), jnp.float32)

    ref = _reference_forward(x, w1, w2, g1, b1, g2, b2)

    # Default path: bf16 MXU inputs (all generations), f32 accumulation/elementwise.
    out_bf16 = jax.block_until_ready(basic_block_forward(x, w1, w2, g1, b1, g2, b2))
    assert out_bf16.shape == (N, C, H, W)
    err_bf16 = jnp.max(jnp.abs(out_bf16 - ref))
    assert jnp.allclose(out_bf16, ref, rtol=5e-2, atol=5e-2), \
        f"bf16 path max abs err {err_bf16}"

    # f32 MXU path: tight tolerance sanity check of the conv/BN math.
    out_f32 = jax.block_until_ready(
        basic_block_forward(x, w1, w2, g1, b1, g2, b2, matmul_dtype=jnp.float32))
    err_f32 = jnp.max(jnp.abs(out_f32 - ref))
    assert jnp.allclose(out_f32, ref, rtol=1e-3, atol=1e-3), \
        f"f32 path max abs err {err_f32}"

    print("KERNEL_OK")
</pallas_src>

<mosaic_0001>
module attributes {stable_mosaic.version = 11 : i64} {
  func.func @_conv3x3_bn_stats_kernel(%arg0: i32, %arg1: i32, %arg2: memref<1x16x16x4xf32, #tpu.memory_space<vmem>>, %arg3: memref<1x4xf32, #tpu.memory_space<vmem>>, %arg4: memref<1x4xf32, #tpu.memory_space<vmem>>, %arg5: memref<36x4xbf16, #tpu.memory_space<vmem>>, %arg6: memref<1x8x16x4xf32, #tpu.memory_space<vmem>>, %arg7: memref<1x1x2x4xf32, #tpu.memory_space<vmem>>, %arg8: memref<10x18x4xbf16, #tpu.memory_space<vmem>>, %arg9: memref<128x36xbf16, #tpu.memory_space<vmem>>) attributes {dimension_semantics = [#tpu.dimension_semantics<parallel>, #tpu.dimension_semantics<parallel>], iteration_bounds = array<i64: 2, 2>, scalar_prefetch = 0 : i64, scratch_operands = 2 : i64, tpu.core_type = #tpu.core_type<tc>, window_params = [{transform_indices = @transform_0, window_bounds = array<i64: 1, 16, 16, 4>}, {pipeline_mode = #tpu.pipeline_mode<synchronous>, transform_indices = @transform_1, window_bounds = array<i64: 1, 4>}, {pipeline_mode = #tpu.pipeline_mode<synchronous>, transform_indices = @transform_2, window_bounds = array<i64: 1, 4>}, {pipeline_mode = #tpu.pipeline_mode<synchronous>, transform_indices = @transform_3, window_bounds = array<i64: 36, 4>}, {transform_indices = @transform_4, window_bounds = array<i64: 1, 8, 16, 4>}, {transform_indices = @transform_5, window_bounds = array<i64: 1, 1, 2, 4>}]} {
    %c8_i32 = arith.constant 8 : i32
    %0 = arith.muli %arg1, %c8_i32 : i32
    %1 = tpu.assume_multiple %0, 8 : i32
    %cst = arith.constant 0.000000e+00 : bf16
    %2 = vector.broadcast %cst : bf16 to vector<1x18x4xbf16>
    %c0 = arith.constant 0 : index
    %c0_0 = arith.constant 0 : index
    %c0_1 = arith.constant 0 : index
    %3 = vector.load %arg8[%c0, %c0_0, %c0_1] : memref<10x18x4xbf16, #tpu.memory_space<vmem>>, vector<1x18x4xbf16>
    tpu.vector_store %arg8[%c0, %c0_0, %c0_1], %2 {strides = array<i32>} : memref<10x18x4xbf16, #tpu.memory_space<vmem>>, vector<1x18x4xbf16>,
    %cst_2 = arith.constant 0.000000e+00 : bf16
    %4 = vector.broadcast %cst_2 : bf16 to vector<1x18x4xbf16>
    %c9 = arith.constant 9 : index
    %c0_3 = arith.constant 0 : index
    %c0_4 = arith.constant 0 : index
    %5 = vector.load %arg8[%c9, %c0_3, %c0_4] : memref<10x18x4xbf16, #tpu.memory_space<vmem>>, vector<1x18x4xbf16>
    tpu.vector_store %arg8[%c9, %c0_3, %c0_4], %4 {strides = array<i32>} : memref<10x18x4xbf16, #tpu.memory_space<vmem>>, vector<1x18x4xbf16>,
    %cst_5 = arith.constant 0.000000e+00 : bf16
    %6 = vector.broadcast %cst_5 : bf16 to vector<8x1x4xbf16>
    %c1 = arith.constant 1 : index
    %c0_6 = arith.constant 0 : index
    %c0_7 = arith.constant 0 : index
    %7 = vector.load %arg8[%c1, %c0_6, %c0_7] : memref<10x18x4xbf16, #tpu.memory_space<vmem>>, vector<8x1x4xbf16>
    tpu.vector_store %arg8[%c1, %c0_6, %c0_7], %6 {strides = array<i32>} : memref<10x18x4xbf16, #tpu.memory_space<vmem>>, vector<8x1x4xbf16>,
    %cst_8 = arith.constant 0.000000e+00 : bf16
    %8 = vector.broadcast %cst_8 : bf16 to vector<8x1x4xbf16>
    %c1_9 = arith.constant 1 : index
    %c17 = arith.constant 17 : index
    %c0_10 = arith.constant 0 : index
    %9 = vector.load %arg8[%c1_9, %c17, %c0_10] : memref<10x18x4xbf16, #tpu.memory_space<vmem>>, vector<8x1x4xbf16>
    tpu.vector_store %arg8[%c1_9, %c17, %c0_10], %8 {strides = array<i32>} : memref<10x18x4xbf16, #tpu.memory_space<vmem>>, vector<8x1x4xbf16>,
    %c0_11 = arith.constant 0 : index
    %10 = arith.index_cast %1 : i32 to index
    %c0_12 = arith.constant 0 : index
    %c0_13 = arith.constant 0 : index
    %11 = vector.load %arg2[%c0_11, %10, %c0_12, %c0_13] : memref<1x16x16x4xf32, #tpu.memory_space<vmem>>, vector<1x8x16x4xf32>
    %12 = vector.shape_cast %11 : vector<1x8x16x4xf32> to vector<8x16x4xf32>
    %13 = arith.truncf %12 : vector<8x16x4xf32> to vector<8x16x4xbf16>
    %c1_14 = arith.constant 1 : index
    %c1_15 = arith.constant 1 : index
    %c0_16 = arith.constant 0 : index
    %14 = vector.load %arg8[%c1_14, %c1_15, %c0_16] : memref<10x18x4xbf16, #tpu.memory_space<vmem>>, vector<8x16x4xbf16>
    tpu.vector_store %arg8[%c1_14, %c1_15, %c0_16], %13 {strides = array<i32>} : memref<10x18x4xbf16, #tpu.memory_space<vmem>>, vector<8x16x4xbf16>,
    %c0_i32 = arith.constant 0 : i32
    %15 = arith.cmpi sgt, %arg1, %c0_i32 : i32
    %16 = arith.extui %15 : i1 to i32
    %c0_i32_17 = arith.constant 0 : i32
    %17 = arith.cmpi ne, %16, %c0_i32_17 : i32
    scf.if %17 {
      %c1_i32_74 = arith.constant 1 : i32
      %62 = arith.subi %1, %c1_i32_74 : i32
      %c0_75 = arith.constant 0 : index
      %63 = arith.index_cast %62 : i32 to index
      %c0_76 = arith.constant 0 : index
      %c0_77 = arith.constant 0 : index
      %64 = vector.load %arg2[%c0_75, %63, %c0_76, %c0_77] : memref<1x16x16x4xf32, #tpu.memory_space<vmem>>, vector<1x1x16x4xf32>
      %65 = vector.shape_cast %64 : vector<1x1x16x4xf32> to vector<1x16x4xf32>
      %66 = arith.truncf %65 : vector<1x16x4xf32> to vector<1x16x4xbf16>
      %c0_78 = arith.constant 0 : index
      %c1_79 = arith.constant 1 : index
      %c0_80 = arith.constant 0 : index
      %67 = vector.load %arg8[%c0_78, %c1_79, %c0_80] : memref<10x18x4xbf16, #tpu.memory_space<vmem>>, vector<1x16x4xbf16>
      tpu.vector_store %arg8[%c0_78, %c1_79, %c0_80], %66 {strides = array<i32>} : memref<10x18x4xbf16, #tpu.memory_space<vmem>>, vector<1x16x4xbf16>,
    } else {
    }
    %c1_i32 = arith.constant 1 : i32
    %18 = arith.cmpi slt, %arg1, %c1_i32 : i32
    %19 = arith.extui %18 : i1 to i32
    %c0_i32_18 = arith.constant 0 : i32
    %20 = arith.cmpi ne, %19, %c0_i32_18 : i32
    scf.if %20 {
      %c8_i32_74 = arith.constant 8 : i32
      %62 = arith.addi %1, %c8_i32_74 : i32
      %c0_75 = arith.constant 0 : index
      %63 = arith.index_cast %62 : i32 to index
      %c0_76 = arith.constant 0 : index
      %c0_77 = arith.constant 0 : index
      %64 = vector.load %arg2[%c0_75, %63, %c0_76, %c0_77] : memref<1x16x16x4xf32, #tpu.memory_space<vmem>>, vector<1x1x16x4xf32>
      %65 = vector.shape_cast %64 : vector<1x1x16x4xf32> to vector<1x16x4xf32>
      %66 = arith.truncf %65 : vector<1x16x4xf32> to vector<1x16x4xbf16>
      %c9_78 = arith.constant 9 : index
      %c1_79 = arith.constant 1 : index
      %c0_80 = arith.constant 0 : index
      %67 = vector.load %arg8[%c9_78, %c1_79, %c0_80] : memref<10x18x4xbf16, #tpu.memory_space<vmem>>, vector<1x16x4xbf16>
      tpu.vector_store %arg8[%c9_78, %c1_79, %c0_80], %66 {strides = array<i32>} : memref<10x18x4xbf16, #tpu.memory_space<vmem>>, vector<1x16x4xbf16>,
    } else {
    }
    %c0_19 = arith.constant 0 : index
    %c0_20 = arith.constant 0 : index
    %c0_21 = arith.constant 0 : index
    %21 = vector.load %arg8[%c0_19, %c0_20, %c0_21] : memref<10x18x4xbf16, #tpu.memory_space<vmem>>, vector<8x16x4xbf16>
    %22 = vector.shape_cast %21 : vector<8x16x4xbf16> to vector<128x4xbf16>
    %c0_22 = arith.constant 0 : index
    %c0_23 = arith.constant 0 : index
    %23 = vector.load %arg9[%c0_22, %c0_23] : memref<128x36xbf16, #tpu.memory_space<vmem>>, vector<128x4xbf16>
    tpu.vector_store %arg9[%c0_22, %c0_23], %22 {strides = array<i32>} : memref<128x36xbf16, #tpu.memory_space<vmem>>, vector<128x4xbf16>,
    %c0_24 = arith.constant 0 : index
    %c1_25 = arith.constant 1 : index
    %c0_26 = arith.constant 0 : index
    %24 = vector.load %arg8[%c0_24, %c1_25, %c0_26] : memref<10x18x4xbf16, #tpu.memory_space<vmem>>, vector<8x16x4xbf16>
    %25 = vector.shape_cast %24 : vector<8x16x4xbf16> to vector<128x4xbf16>
    %c0_27 = arith.constant 0 : index
    %c4 = arith.constant 4 : index
    %26 = vector.load %arg9[%c0_27, %c4] : memref<128x36xbf16, #tpu.memory_space<vmem>>, vector<128x4xbf16>
    tpu.vector_store %arg9[%c0_27, %c4], %25 {strides = array<i32>} : memref<128x36xbf16, #tpu.memory_space<vmem>>, vector<128x4xbf16>,
    %c0_28 = arith.constant 0 : index
    %c2 = arith.constant 2 : index
    %c0_29 = arith.constant 0 : index
    %27 = vector.load %arg8[%c0_28, %c2, %c0_29] : memref<10x18x4xbf16, #tpu.memory_space<vmem>>, vector<8x16x4xbf16>
    %28 = vector.shape_cast %27 : vector<8x16x4xbf16> to vector<128x4xbf16>
    %c0_30 = arith.constant 0 : index
    %c8 = arith.constant 8 : index
    %29 = vector.load %arg9[%c0_30, %c8] : memref<128x36xbf16, #tpu.memory_space<vmem>>, vector<128x4xbf16>
    tpu.vector_store %arg9[%c0_30, %c8], %28 {strides = array<i32>} : memref<128x36xbf16, #tpu.memory_space<vmem>>, vector<128x4xbf16>,
    %c1_31 = arith.constant 1 : index
    %c0_32 = arith.constant 0 : index
    %c0_33 = arith.constant 0 : index
    %30 = vector.load %arg8[%c1_31, %c0_32, %c0_33] : memref<10x18x4xbf16, #tpu.memory_space<vmem>>, vector<8x16x4xbf16>
    %31 = vector.shape_cast %30 : vector<8x16x4xbf16> to vector<128x4xbf16>
    %c0_34 = arith.constant 0 : index
    %c12 = arith.constant 12 : index
    %32 = vector.load %arg9[%c0_34, %c12] : memref<128x36xbf16, #tpu.memory_space<vmem>>, vector<128x4xbf16>
    tpu.vector_store %arg9[%c0_34, %c12], %31 {strides = array<i32>} : memref<128x36xbf16, #tpu.memory_space<vmem>>, vector<128x4xbf16>,
    %c1_35 = arith.constant 1 : index
    %c1_36 = arith.constant 1 : index
    %c0_37 = arith.constant 0 : index
    %33 = vector.load %arg8[%c1_35, %c1_36, %c0_37] : memref<10x18x4xbf16, #tpu.memory_space<vmem>>, vector<8x16x4xbf16>
    %34 = vector.shape_cast %33 : vector<8x16x4xbf16> to vector<128x4xbf16>
    %c0_38 = arith.constant 0 : index
    %c16 = arith.constant 16 : index
    %35 = vector.load %arg9[%c0_38, %c16] : memref<128x36xbf16, #tpu.memory_space<vmem>>, vector<128x4xbf16>
    tpu.vector_store %arg9[%c0_38, %c16], %34 {strides = array<i32>} : memref<128x36xbf16, #tpu.memory_space<vmem>>, vector<128x4xbf16>,
    %c1_39 = arith.constant 1 : index
    %c2_40 = arith.constant 2 : index
    %c0_41 = arith.constant 0 : index
    %36 = vector.load %arg8[%c1_39, %c2_40, %c0_41] : memref<10x18x4xbf16, #tpu.memory_space<vmem>>, vector<8x16x4xbf16>
    %37 = vector.shape_cast %36 : vector<8x16x4xbf16> to vector<128x4xbf16>
    %c0_42 = arith.constant 0 : index
    %c20 = arith.constant 20 : index
    %38 = vector.load %arg9[%c0_42, %c20] : memref<128x36xbf16, #tpu.memory_space<vmem>>, vector<128x4xbf16>
    tpu.vector_store %arg9[%c0_42, %c20], %37 {strides = array<i32>} : memref<128x36xbf16, #tpu.memory_space<vmem>>, vector<128x4xbf16>,
    %c2_43 = arith.constant 2 : index
    %c0_44 = arith.constant 0 : index
    %c0_45 = arith.constant 0 : index
    %39 = vector.load %arg8[%c2_43, %c0_44, %c0_45] : memref<10x18x4xbf16, #tpu.memory_space<vmem>>, vector<8x16x4xbf16>
    %40 = vector.shape_cast %39 : vector<8x16x4xbf16> to vector<128x4xbf16>
    %c0_46 = arith.constant 0 : index
    %c24 = arith.constant 24 : index
    %41 = vector.load %arg9[%c0_46, %c24] : memref<128x36xbf16, #tpu.memory_space<vmem>>, vector<128x4xbf16>
    tpu.vector_store %arg9[%c0_46, %c24], %40 {strides = array<i32>} : memref<128x36xbf16, #tpu.memory_space<vmem>>, vector<128x4xbf16>,
    %c2_47 = arith.constant 2 : index
    %c1_48 = arith.constant 1 : index
    %c0_49 = arith.constant 0 : index
    %42 = vector.load %arg8[%c2_47, %c1_48, %c0_49] : memref<10x18x4xbf16, #tpu.memory_space<vmem>>, vector<8x16x4xbf16>
    %43 = vector.shape_cast %42 : vector<8x16x4xbf16> to vector<128x4xbf16>
    %c0_50 = arith.constant 0 : index
    %c28 = arith.constant 28 : index
    %44 = vector.load %arg9[%c0_50, %c28] : memref<128x36xbf16, #tpu.memory_space<vmem>>, vector<128x4xbf16>
    tpu.vector_store %arg9[%c0_50, %c28], %43 {strides = array<i32>} : memref<128x36xbf16, #tpu.memory_space<vmem>>, vector<128x4xbf16>,
    %c2_51 = arith.constant 2 : index
    %c2_52 = arith.constant 2 : index
    %c0_53 = arith.constant 0 : index
    %45 = vector.load %arg8[%c2_51, %c2_52, %c0_53] : memref<10x18x4xbf16, #tpu.memory_space<vmem>>, vector<8x16x4xbf16>
    %46 = vector.shape_cast %45 : vector<8x16x4xbf16> to vector<128x4xbf16>
    %c0_54 = arith.constant 0 : index
    %c32 = arith.constant 32 : index
    %47 = vector.load %arg9[%c0_54, %c32] : memref<128x36xbf16, #tpu.memory_space<vmem>>, vector<128x4xbf16>
    tpu.vector_store %arg9[%c0_54, %c32], %46 {strides = array<i32>} : memref<128x36xbf16, #tpu.memory_space<vmem>>, vector<128x4xbf16>,
    %c0_55 = arith.constant 0 : index
    %c0_56 = arith.constant 0 : index
    %48 = vector.load %arg9[%c0_55, %c0_56] : memref<128x36xbf16, #tpu.memory_space<vmem>>, vector<128x36xbf16>
    %c0_57 = arith.constant 0 : index
    %c0_58 = arith.constant 0 : index
    %49 = vector.load %arg5[%c0_57, %c0_58] : memref<36x4xbf16, #tpu.memory_space<vmem>>, vector<36x4xbf16>
    %cst_59 = arith.constant dense<0.000000e+00> : vector<128x4xf32>
    %50 = tpu.matmul %48, %49, %cst_59 {dimension_numbers = #tpu.dot_dimension_numbers<[1], [0], [0], [1], [0, 0, 1, 1], [], []>} : vector<128x36xbf16>, vector<36x4xbf16>, vector<128x4xf32> -> vector<128x4xf32>
    %51 = vector.shape_cast %50 : vector<128x4xf32> to vector<1x8x16x4xf32>
    %c0_60 = arith.constant 0 : index
    %c0_61 = arith.constant 0 : index
    %c0_62 = arith.constant 0 : index
    %c0_63 = arith.constant 0 : index
    %52 = vector.load %arg6[%c0_60, %c0_61, %c0_62, %c0_63] : memref<1x8x16x4xf32, #tpu.memory_space<vmem>>, vector<1x8x16x4xf32>
    tpu.vector_store %arg6[%c0_60, %c0_61, %c0_62, %c0_63], %51 {strides = array<i32>} : memref<1x8x16x4xf32, #tpu.memory_space<vmem>>, vector<1x8x16x4xf32>,
    %cst_64 = arith.constant dense<0.000000e+00> : vector<4xf32>
    %53 = vector.multi_reduction <add>, %50, %cst_64 [0] : vector<128x4xf32> to vector<4xf32>
    %54 = vector.shape_cast %53 : vector<4xf32> to vector<1x4xf32>
    %55 = arith.mulf %50, %50 : vector<128x4xf32>
    %cst_65 = arith.constant dense<0.000000e+00> : vector<4xf32>
    %56 = vector.multi_reduction <add>, %55, %cst_65 [0] : vector<128x4xf32> to vector<4xf32>
    %57 = vector.shape_cast %56 : vector<4xf32> to vector<1x4xf32>
    %58 = vector.shape_cast %54 : vector<1x4xf32> to vector<1x1x1x4xf32>
    %c0_66 = arith.constant 0 : index
    %c0_67 = arith.constant 0 : index
    %c0_68 = arith.constant 0 : index
    %c0_69 = arith.constant 0 : index
    %59 = vector.load %arg7[%c0_66, %c0_67, %c0_68, %c0_69] : memref<1x1x2x4xf32, #tpu.memory_space<vmem>>, vector<1x1x1x4xf32>
    tpu.vector_store %arg7[%c0_66, %c0_67, %c0_68, %c0_69], %58 {strides = array<i32>} : memref<1x1x2x4xf32, #tpu.memory_space<vmem>>, vector<1x1x1x4xf32>,
    %60 = vector.shape_cast %57 : vector<1x4xf32> to vector<1x1x1x4xf32>
    %c0_70 = arith.constant 0 : index
    %c0_71 = arith.constant 0 : index
    %c1_72 = arith.constant 1 : index
    %c0_73 = arith.constant 0 : index
    %61 = vector.load %arg7[%c0_70, %c0_71, %c1_72, %c0_73] : memref<1x1x2x4xf32, #tpu.memory_space<vmem>>, vector<1x1x1x4xf32>
    tpu.vector_store %arg7[%c0_70, %c0_71, %c1_72, %c0_73], %60 {strides = array<i32>} : memref<1x1x2x4xf32, #tpu.memory_space<vmem>>, vector<1x1x1x4xf32>,
    return
  }
  func.func @transform_0(%arg0: i32, %arg1: i32) -> (i32, i32, i32, i32) {
    %c0_i32 = arith.constant 0 : i32
    %c0_i32_0 = arith.constant 0 : i32
    %c0_i32_1 = arith.constant 0 : i32
    %c0_i32_2 = arith.constant 0 : i32
    return %arg0, %c0_i32, %c0_i32_0, %c0_i32_1 : i32, i32, i32, i32
  }
  func.func @transform_1(%arg0: i32, %arg1: i32) -> (i32, i32) {
    %c0_i32 = arith.constant 0 : i32
    %c0_i32_0 = arith.constant 0 : i32
    %c0_i32_1 = arith.constant 0 : i32
    return %c0_i32, %c0_i32_0 : i32, i32
  }
  func.func @transform_2(%arg0: i32, %arg1: i32) -> (i32, i32) {
    %c0_i32 = arith.constant 0 : i32
    %c0_i32_0 = arith.constant 0 : i32
    %c0_i32_1 = arith.constant 0 : i32
    return %c0_i32, %c0_i32_0 : i32, i32
  }
  func.func @transform_3(%arg0: i32, %arg1: i32) -> (i32, i32) {
    %c0_i32 = arith.constant 0 : i32
    %c0_i32_0 = arith.constant 0 : i32
    %c0_i32_1 = arith.constant 0 : i32
    return %c0_i32, %c0_i32_0 : i32, i32
  }
  func.func @transform_4(%arg0: i32, %arg1: i32) -> (i32, i32, i32, i32) {
    %c0_i32 = arith.constant 0 : i32
    %c0_i32_0 = arith.constant 0 : i32
    %c0_i32_1 = arith.constant 0 : i32
    return %arg0, %arg1, %c0_i32, %c0_i32_0 : i32, i32, i32, i32
  }
  func.func @transform_5(%arg0: i32, %arg1: i32) -> (i32, i32, i32, i32) {
    %c0_i32 = arith.constant 0 : i32
    %c0_i32_0 = arith.constant 0 : i32
    %c0_i32_1 = arith.constant 0 : i32
    return %arg0, %arg1, %c0_i32, %c0_i32_0 : i32, i32, i32, i32
  }
}

module attributes {stable_mosaic.version = 11 : i64} {
  func.func @_conv3x3_bn_stats_kernel(%arg0: i32, %arg1: i32, %arg2: memref<1x16x16x4xf32, #tpu.memory_space<vmem>>, %arg3: memref<1x4xf32, #tpu.memory_space<vmem>>, %arg4: memref<1x4xf32, #tpu.memory_space<vmem>>, %arg5: memref<36x4xbf16, #tpu.memory_space<vmem>>, %arg6: memref<1x8x16x4xf32, #tpu.memory_space<vmem>>, %arg7: memref<1x1x2x4xf32, #tpu.memory_space<vmem>>, %arg8: memref<10x18x4xbf16, #tpu.memory_space<vmem>>, %arg9: memref<128x36xbf16, #tpu.memory_space<vmem>>) attributes {dimension_semantics = [#tpu.dimension_semantics<parallel>, #tpu.dimension_semantics<parallel>], iteration_bounds = array<i64: 2, 2>, scalar_prefetch = 0 : i64, scratch_operands = 2 : i64, tpu.core_type = #tpu.core_type<tc>, window_params = [{transform_indices = @transform_0, window_bounds = array<i64: 1, 16, 16, 4>}, {pipeline_mode = #tpu.pipeline_mode<synchronous>, transform_indices = @transform_1, window_bounds = array<i64: 1, 4>}, {pipeline_mode = #tpu.pipeline_mode<synchronous>, transform_indices = @transform_2, window_bounds = array<i64: 1, 4>}, {pipeline_mode = #tpu.pipeline_mode<synchronous>, transform_indices = @transform_3, window_bounds = array<i64: 36, 4>}, {transform_indices = @transform_4, window_bounds = array<i64: 1, 8, 16, 4>}, {transform_indices = @transform_5, window_bounds = array<i64: 1, 1, 2, 4>}]} {
    %c8_i32 = arith.constant 8 : i32
    %0 = arith.muli %arg1, %c8_i32 : i32
    %1 = tpu.assume_multiple %0, 8 : i32
    %cst = arith.constant 0.000000e+00 : bf16
    %2 = vector.broadcast %cst : bf16 to vector<1x18x4xbf16>
    %c0 = arith.constant 0 : index
    %c0_0 = arith.constant 0 : index
    %c0_1 = arith.constant 0 : index
    %3 = vector.load %arg8[%c0, %c0_0, %c0_1] : memref<10x18x4xbf16, #tpu.memory_space<vmem>>, vector<1x18x4xbf16>
    tpu.vector_store %arg8[%c0, %c0_0, %c0_1], %2 {strides = array<i32>} : memref<10x18x4xbf16, #tpu.memory_space<vmem>>, vector<1x18x4xbf16>,
    %cst_2 = arith.constant 0.000000e+00 : bf16
    %4 = vector.broadcast %cst_2 : bf16 to vector<1x18x4xbf16>
    %c9 = arith.constant 9 : index
    %c0_3 = arith.constant 0 : index
    %c0_4 = arith.constant 0 : index
    %5 = vector.load %arg8[%c9, %c0_3, %c0_4] : memref<10x18x4xbf16, #tpu.memory_space<vmem>>, vector<1x18x4xbf16>
    tpu.vector_store %arg8[%c9, %c0_3, %c0_4], %4 {strides = array<i32>} : memref<10x18x4xbf16, #tpu.memory_space<vmem>>, vector<1x18x4xbf16>,
    %cst_5 = arith.constant 0.000000e+00 : bf16
    %6 = vector.broadcast %cst_5 : bf16 to vector<8x1x4xbf16>
    %c1 = arith.constant 1 : index
    %c0_6 = arith.constant 0 : index
    %c0_7 = arith.constant 0 : index
    %7 = vector.load %arg8[%c1, %c0_6, %c0_7] : memref<10x18x4xbf16, #tpu.memory_space<vmem>>, vector<8x1x4xbf16>
    tpu.vector_store %arg8[%c1, %c0_6, %c0_7], %6 {strides = array<i32>} : memref<10x18x4xbf16, #tpu.memory_space<vmem>>, vector<8x1x4xbf16>,
    %cst_8 = arith.constant 0.000000e+00 : bf16
    %8 = vector.broadcast %cst_8 : bf16 to vector<8x1x4xbf16>
    %c1_9 = arith.constant 1 : index
    %c17 = arith.constant 17 : index
    %c0_10 = arith.constant 0 : index
    %9 = vector.load %arg8[%c1_9, %c17, %c0_10] : memref<10x18x4xbf16, #tpu.memory_space<vmem>>, vector<8x1x4xbf16>
    tpu.vector_store %arg8[%c1_9, %c17, %c0_10], %8 {strides = array<i32>} : memref<10x18x4xbf16, #tpu.memory_space<vmem>>, vector<8x1x4xbf16>,
    %c0_11 = arith.constant 0 : index
    %10 = arith.index_cast %1 : i32 to index
    %c0_12 = arith.constant 0 : index
    %c0_13 = arith.constant 0 : index
    %11 = vector.load %arg2[%c0_11, %10, %c0_12, %c0_13] : memref<1x16x16x4xf32, #tpu.memory_space<vmem>>, vector<1x8x16x4xf32>
    %12 = vector.shape_cast %11 : vector<1x8x16x4xf32> to vector<8x16x4xf32>
    %13 = arith.truncf %12 : vector<8x16x4xf32> to vector<8x16x4xbf16>
    %c1_14 = arith.constant 1 : index
    %c1_15 = arith.constant 1 : index
    %c0_16 = arith.constant 0 : index
    %14 = vector.load %arg8[%c1_14, %c1_15, %c0_16] : memref<10x18x4xbf16, #tpu.memory_space<vmem>>, vector<8x16x4xbf16>
    tpu.vector_store %arg8[%c1_14, %c1_15, %c0_16], %13 {strides = array<i32>} : memref<10x18x4xbf16, #tpu.memory_space<vmem>>, vector<8x16x4xbf16>,
    %c0_i32 = arith.constant 0 : i32
    %15 = arith.cmpi sgt, %arg1, %c0_i32 : i32
    %16 = arith.extui %15 : i1 to i32
    %c0_i32_17 = arith.constant 0 : i32
    %17 = arith.cmpi ne, %16, %c0_i32_17 : i32
    scf.if %17 {
      %c1_i32_74 = arith.constant 1 : i32
      %62 = arith.subi %1, %c1_i32_74 : i32
      %c0_75 = arith.constant 0 : index
      %63 = arith.index_cast %62 : i32 to index
      %c0_76 = arith.constant 0 : index
      %c0_77 = arith.constant 0 : index
      %64 = vector.load %arg2[%c0_75, %63, %c0_76, %c0_77] : memref<1x16x16x4xf32, #tpu.memory_space<vmem>>, vector<1x1x16x4xf32>
      %65 = vector.shape_cast %64 : vector<1x1x16x4xf32> to vector<1x16x4xf32>
      %66 = arith.truncf %65 : vector<1x16x4xf32> to vector<1x16x4xbf16>
      %c0_78 = arith.constant 0 : index
      %c1_79 = arith.constant 1 : index
      %c0_80 = arith.constant 0 : index
      %67 = vector.load %arg8[%c0_78, %c1_79, %c0_80] : memref<10x18x4xbf16, #tpu.memory_space<vmem>>, vector<1x16x4xbf16>
      tpu.vector_store %arg8[%c0_78, %c1_79, %c0_80], %66 {strides = array<i32>} : memref<10x18x4xbf16, #tpu.memory_space<vmem>>, vector<1x16x4xbf16>,
    } else {
    }
    %c1_i32 = arith.constant 1 : i32
    %18 = arith.cmpi slt, %arg1, %c1_i32 : i32
    %19 = arith.extui %18 : i1 to i32
    %c0_i32_18 = arith.constant 0 : i32
    %20 = arith.cmpi ne, %19, %c0_i32_18 : i32
    scf.if %20 {
      %c8_i32_74 = arith.constant 8 : i32
      %62 = arith.addi %1, %c8_i32_74 : i32
      %c0_75 = arith.constant 0 : index
      %63 = arith.index_cast %62 : i32 to index
      %c0_76 = arith.constant 0 : index
      %c0_77 = arith.constant 0 : index
      %64 = vector.load %arg2[%c0_75, %63, %c0_76, %c0_77] : memref<1x16x16x4xf32, #tpu.memory_space<vmem>>, vector<1x1x16x4xf32>
      %65 = vector.shape_cast %64 : vector<1x1x16x4xf32> to vector<1x16x4xf32>
      %66 = arith.truncf %65 : vector<1x16x4xf32> to vector<1x16x4xbf16>
      %c9_78 = arith.constant 9 : index
      %c1_79 = arith.constant 1 : index
      %c0_80 = arith.constant 0 : index
      %67 = vector.load %arg8[%c9_78, %c1_79, %c0_80] : memref<10x18x4xbf16, #tpu.memory_space<vmem>>, vector<1x16x4xbf16>
      tpu.vector_store %arg8[%c9_78, %c1_79, %c0_80], %66 {strides = array<i32>} : memref<10x18x4xbf16, #tpu.memory_space<vmem>>, vector<1x16x4xbf16>,
    } else {
    }
    %c0_19 = arith.constant 0 : index
    %c0_20 = arith.constant 0 : index
    %c0_21 = arith.constant 0 : index
    %21 = vector.load %arg8[%c0_19, %c0_20, %c0_21] : memref<10x18x4xbf16, #tpu.memory_space<vmem>>, vector<8x16x4xbf16>
    %22 = vector.shape_cast %21 : vector<8x16x4xbf16> to vector<128x4xbf16>
    %c0_22 = arith.constant 0 : index
    %c0_23 = arith.constant 0 : index
    %23 = vector.load %arg9[%c0_22, %c0_23] : memref<128x36xbf16, #tpu.memory_space<vmem>>, vector<128x4xbf16>
    tpu.vector_store %arg9[%c0_22, %c0_23], %22 {strides = array<i32>} : memref<128x36xbf16, #tpu.memory_space<vmem>>, vector<128x4xbf16>,
    %c0_24 = arith.constant 0 : index
    %c1_25 = arith.constant 1 : index
    %c0_26 = arith.constant 0 : index
    %24 = vector.load %arg8[%c0_24, %c1_25, %c0_26] : memref<10x18x4xbf16, #tpu.memory_space<vmem>>, vector<8x16x4xbf16>
    %25 = vector.shape_cast %24 : vector<8x16x4xbf16> to vector<128x4xbf16>
    %c0_27 = arith.constant 0 : index
    %c4 = arith.constant 4 : index
    %26 = vector.load %arg9[%c0_27, %c4] : memref<128x36xbf16, #tpu.memory_space<vmem>>, vector<128x4xbf16>
    tpu.vector_store %arg9[%c0_27, %c4], %25 {strides = array<i32>} : memref<128x36xbf16, #tpu.memory_space<vmem>>, vector<128x4xbf16>,
    %c0_28 = arith.constant 0 : index
    %c2 = arith.constant 2 : index
    %c0_29 = arith.constant 0 : index
    %27 = vector.load %arg8[%c0_28, %c2, %c0_29] : memref<10x18x4xbf16, #tpu.memory_space<vmem>>, vector<8x16x4xbf16>
    %28 = vector.shape_cast %27 : vector<8x16x4xbf16> to vector<128x4xbf16>
    %c0_30 = arith.constant 0 : index
    %c8 = arith.constant 8 : index
    %29 = vector.load %arg9[%c0_30, %c8] : memref<128x36xbf16, #tpu.memory_space<vmem>>, vector<128x4xbf16>
    tpu.vector_store %arg9[%c0_30, %c8], %28 {strides = array<i32>} : memref<128x36xbf16, #tpu.memory_space<vmem>>, vector<128x4xbf16>,
    %c1_31 = arith.constant 1 : index
    %c0_32 = arith.constant 0 : index
    %c0_33 = arith.constant 0 : index
    %30 = vector.load %arg8[%c1_31, %c0_32, %c0_33] : memref<10x18x4xbf16, #tpu.memory_space<vmem>>, vector<8x16x4xbf16>
    %31 = vector.shape_cast %30 : vector<8x16x4xbf16> to vector<128x4xbf16>
    %c0_34 = arith.constant 0 : index
    %c12 = arith.constant 12 : index
    %32 = vector.load %arg9[%c0_34, %c12] : memref<128x36xbf16, #tpu.memory_space<vmem>>, vector<128x4xbf16>
    tpu.vector_store %arg9[%c0_34, %c12], %31 {strides = array<i32>} : memref<128x36xbf16, #tpu.memory_space<vmem>>, vector<128x4xbf16>,
    %c1_35 = arith.constant 1 : index
    %c1_36 = arith.constant 1 : index
    %c0_37 = arith.constant 0 : index
    %33 = vector.load %arg8[%c1_35, %c1_36, %c0_37] : memref<10x18x4xbf16, #tpu.memory_space<vmem>>, vector<8x16x4xbf16>
    %34 = vector.shape_cast %33 : vector<8x16x4xbf16> to vector<128x4xbf16>
    %c0_38 = arith.constant 0 : index
    %c16 = arith.constant 16 : index
    %35 = vector.load %arg9[%c0_38, %c16] : memref<128x36xbf16, #tpu.memory_space<vmem>>, vector<128x4xbf16>
    tpu.vector_store %arg9[%c0_38, %c16], %34 {strides = array<i32>} : memref<128x36xbf16, #tpu.memory_space<vmem>>, vector<128x4xbf16>,
    %c1_39 = arith.constant 1 : index
    %c2_40 = arith.constant 2 : index
    %c0_41 = arith.constant 0 : index
    %36 = vector.load %arg8[%c1_39, %c2_40, %c0_41] : memref<10x18x4xbf16, #tpu.memory_space<vmem>>, vector<8x16x4xbf16>
    %37 = vector.shape_cast %36 : vector<8x16x4xbf16> to vector<128x4xbf16>
    %c0_42 = arith.constant 0 : index
    %c20 = arith.constant 20 : index
    %38 = vector.load %arg9[%c0_42, %c20] : memref<128x36xbf16, #tpu.memory_space<vmem>>, vector<128x4xbf16>
    tpu.vector_store %arg9[%c0_42, %c20], %37 {strides = array<i32>} : memref<128x36xbf16, #tpu.memory_space<vmem>>, vector<128x4xbf16>,
    %c2_43 = arith.constant 2 : index
    %c0_44 = arith.constant 0 : index
    %c0_45 = arith.constant 0 : index
    %39 = vector.load %arg8[%c2_43, %c0_44, %c0_45] : memref<10x18x4xbf16, #tpu.memory_space<vmem>>, vector<8x16x4xbf16>
    %40 = vector.shape_cast %39 : vector<8x16x4xbf16> to vector<128x4xbf16>
    %c0_46 = arith.constant 0 : index
    %c24 = arith.constant 24 : index
    %41 = vector.load %arg9[%c0_46, %c24] : memref<128x36xbf16, #tpu.memory_space<vmem>>, vector<128x4xbf16>
    tpu.vector_store %arg9[%c0_46, %c24], %40 {strides = array<i32>} : memref<128x36xbf16, #tpu.memory_space<vmem>>, vector<128x4xbf16>,
    %c2_47 = arith.constant 2 : index
    %c1_48 = arith.constant 1 : index
    %c0_49 = arith.constant 0 : index
    %42 = vector.load %arg8[%c2_47, %c1_48, %c0_49] : memref<10x18x4xbf16, #tpu.memory_space<vmem>>, vector<8x16x4xbf16>
    %43 = vector.shape_cast %42 : vector<8x16x4xbf16> to vector<128x4xbf16>
    %c0_50 = arith.constant 0 : index
    %c28 = arith.constant 28 : index
    %44 = vector.load %arg9[%c0_50, %c28] : memref<128x36xbf16, #tpu.memory_space<vmem>>, vector<128x4xbf16>
    tpu.vector_store %arg9[%c0_50, %c28], %43 {strides = array<i32>} : memref<128x36xbf16, #tpu.memory_space<vmem>>, vector<128x4xbf16>,
    %c2_51 = arith.constant 2 : index
    %c2_52 = arith.constant 2 : index
    %c0_53 = arith.constant 0 : index
    %45 = vector.load %arg8[%c2_51, %c2_52, %c0_53] : memref<10x18x4xbf16, #tpu.memory_space<vmem>>, vector<8x16x4xbf16>
    %46 = vector.shape_cast %45 : vector<8x16x4xbf16> to vector<128x4xbf16>
    %c0_54 = arith.constant 0 : index
    %c32 = arith.constant 32 : index
    %47 = vector.load %arg9[%c0_54, %c32] : memref<128x36xbf16, #tpu.memory_space<vmem>>, vector<128x4xbf16>
    tpu.vector_store %arg9[%c0_54, %c32], %46 {strides = array<i32>} : memref<128x36xbf16, #tpu.memory_space<vmem>>, vector<128x4xbf16>,
    %c0_55 = arith.constant 0 : index
    %c0_56 = arith.constant 0 : index
    %48 = vector.load %arg9[%c0_55, %c0_56] : memref<128x36xbf16, #tpu.memory_space<vmem>>, vector<128x36xbf16>
    %c0_57 = arith.constant 0 : index
    %c0_58 = arith.constant 0 : index
    %49 = vector.load %arg5[%c0_57, %c0_58] : memref<36x4xbf16, #tpu.memory_space<vmem>>, vector<36x4xbf16>
    %cst_59 = arith.constant dense<0.000000e+00> : vector<128x4xf32>
    %50 = tpu.matmul %48, %49, %cst_59 {dimension_numbers = #tpu.dot_dimension_numbers<[1], [0], [0], [1], [0, 0, 1, 1], [], []>} : vector<128x36xbf16>, vector<36x4xbf16>, vector<128x4xf32> -> vector<128x4xf32>
    %51 = vector.shape_cast %50 : vector<128x4xf32> to vector<1x8x16x4xf32>
    %c0_60 = arith.constant 0 : index
    %c0_61 = arith.constant 0 : index
    %c0_62 = arith.constant 0 : index
    %c0_63 = arith.constant 0 : index
    %52 = vector.load %arg6[%c0_60, %c0_61, %c0_62, %c0_63] : memref<1x8x16x4xf32, #tpu.memory_space<vmem>>, vector<1x8x16x4xf32>
    tpu.vector_store %arg6[%c0_60, %c0_61, %c0_62, %c0_63], %51 {strides = array<i32>} : memref<1x8x16x4xf32, #tpu.memory_space<vmem>>, vector<1x8x16x4xf32>,
    %cst_64 = arith.constant dense<0.000000e+00> : vector<4xf32>
    %53 = vector.multi_reduction <add>, %50, %cst_64 [0] : vector<128x4xf32> to vector<4xf32>
    %54 = vector.shape_cast %53 : vector<4xf32> to vector<1x4xf32>
    %55 = arith.mulf %50, %50 : vector<128x4xf32>
    %cst_65 = arith.constant dense<0.000000e+00> : vector<4xf32>
    %56 = vector.multi_reduction <add>, %55, %cst_65 [0] : vector<128x4xf32> to vector<4xf32>
    %57 = vector.shape_cast %56 : vector<4xf32> to vector<1x4xf32>
    %58 = vector.shape_cast %54 : vector<1x4xf32> to vector<1x1x1x4xf32>
    %c0_66 = arith.constant 0 : index
    %c0_67 = arith.constant 0 : index
    %c0_68 = arith.constant 0 : index
    %c0_69 = arith.constant 0 : index
    %59 = vector.load %arg7[%c0_66, %c0_67, %c0_68, %c0_69] : memref<1x1x2x4xf32, #tpu.memory_space<vmem>>, vector<1x1x1x4xf32>
    tpu.vector_store %arg7[%c0_66, %c0_67, %c0_68, %c0_69], %58 {strides = array<i32>} : memref<1x1x2x4xf32, #tpu.memory_space<vmem>>, vector<1x1x1x4xf32>,
    %60 = vector.shape_cast %57 : vector<1x4xf32> to vector<1x1x1x4xf32>
    %c0_70 = arith.constant 0 : index
    %c0_71 = arith.constant 0 : index
    %c1_72 = arith.constant 1 : index
    %c0_73 = arith.constant 0 : index
    %61 = vector.load %arg7[%c0_70, %c0_71, %c1_72, %c0_73] : memref<1x1x2x4xf32, #tpu.memory_space<vmem>>, vector<1x1x1x4xf32>
    tpu.vector_store %arg7[%c0_70, %c0_71, %c1_72, %c0_73], %60 {strides = array<i32>} : memref<1x1x2x4xf32, #tpu.memory_space<vmem>>, vector<1x1x1x4xf32>,
    return
  }
  func.func @transform_0(%arg0: i32, %arg1: i32) -> (i32, i32, i32, i32) {
    %c0_i32 = arith.constant 0 : i32
    %c0_i32_0 = arith.constant 0 : i32
    %c0_i32_1 = arith.constant 0 : i32
    %c0_i32_2 = arith.constant 0 : i32
    return %arg0, %c0_i32, %c0_i32_0, %c0_i32_1 : i32, i32, i32, i32
  }
  func.func @transform_1(%arg0: i32, %arg1: i32) -> (i32, i32) {
    %c0_i32 = arith.constant 0 : i32
    %c0_i32_0 = arith.constant 0 : i32
    %c0_i32_1 = arith.constant 0 : i32
    return %c0_i32, %c0_i32_0 : i32, i32
  }
  func.func @transform_2(%arg0: i32, %arg1: i32) -> (i32, i32) {
    %c0_i32 = arith.constant 0 : i32
    %c0_i32_0 = arith.constant 0 : i32
    %c0_i32_1 = arith.constant 0 : i32
    return %c0_i32, %c0_i32_0 : i32, i32
  }
  func.func @transform_3(%arg0: i32, %arg1: i32) -> (i32, i32) {
    %c0_i32 = arith.constant 0 : i32
    %c0_i32_0 = arith.constant 0 : i32
    %c0_i32_1 = arith.constant 0 : i32
    return %c0_i32, %c0_i32_0 : i32, i32
  }
  func.func @transform_4(%arg0: i32, %arg1: i32) -> (i32, i32, i32, i32) {
    %c0_i32 = arith.constant 0 : i32
    %c0_i32_0 = arith.constant 0 : i32
    %c0_i32_1 = arith.constant 0 : i32
    return %arg0, %arg1, %c0_i32, %c0_i32_0 : i32, i32, i32, i32
  }
  func.func @transform_5(%arg0: i32, %arg1: i32) -> (i32, i32, i32, i32) {
    %c0_i32 = arith.constant 0 : i32
    %c0_i32_0 = arith.constant 0 : i32
    %c0_i32_1 = arith.constant 0 : i32
    return %arg0, %arg1, %c0_i32, %c0_i32_0 : i32, i32, i32, i32
  }
}

</mosaic_0001>

<bundles_post_ra>
// kernel: tpu_custom_call.1
= control target key start
LH: loop header
LB: loop body
LE: loop exit
PB: predicated region body
PF: predicated region fallthrough
CT: control target
= control target key end

     0   :  { %s4463_s0 = inlined_call_operand.hbm [shape: f32[2,16,16,4], index: 0, kind: input, shape index: {}]   ;;  %s4464_s1 = inlined_call_operand.hbm [shape: f32[1,4], index: 1, kind: input, shape index: {}]   ;;  %s4465_s2 = inlined_call_operand.hbm [shape: f32[1,4], index: 2, kind: input, shape index: {}]   ;;  %s4466_s3 = inlined_call_operand.hbm [shape: bf16[36,4], index: 3, kind: input, shape index: {}]   ;;  %s4467_s4 = inlined_call_operand.hbm [shape: f32[2,16,16,4], index: 4, kind: output, shape index: {0}]   ;;  %s4468_s5 = inlined_call_operand.hbm [shape: f32[2,2,2,4], index: 5, kind: output, shape index: {1}]  }
   0x1   :  { %4479 = sst [smem:[#allocation23_spill]] %s4464_s1 }
   0x2   :  { %4480 = sst [smem:[#allocation24_spill]] %s4465_s2 }
   0x3   :  { %4481 = sst [smem:[#allocation25_spill]] %s4466_s3 }
   0x4   :  { %4482 = sst [smem:[#allocation26_spill]] %s4467_s4 }
   0x5   :  { %4483 = sst [smem:[#allocation27_spill]] %s4468_s5 }
   0x6   :  { %11 = vsyncpa [#allocation5], 0 }
   0x7   :  { %13 = vsyncpa [#allocation5 + $0x1], 0 }
   0x8   :  { %14 = vsyncpa [#allocation8], 0 }
   0x9   :  { %15 = vsyncpa [#allocation11], 0 }
   0xa   :  { %16 = vsyncpa [#allocation6], 0 }
   0xb   :  { %18 = vsyncpa [#allocation6 + $0x1], 0 }
   0xc   :  { %19 = vsyncpa [#allocation14], 0 }
   0xd   :  { %21 = vsyncpa [#allocation14 + $0x1], 0  ;;  %s3499_s18 = smov 0   ;;  %s3501_s19 = smov 0  }
   0xe   :  { %s3503_s20 = smov 0   ;;  %s3505_s21 = smov 0  }
   0xf   :  { %s3507_s22 = smov 0   ;;  %s3509_s23 = smov 0  }
  0x10   :  { %s3511_s24 = smov 0   ;;  %s3513_s25 = smov 0  }
  0x11   :  { %s3515_s26 = smov 0   ;;  %s3517_s27 = smov 0  }
  0x12   :  { %s3519_s28 = smov 0  }
  0x13 LB: > { %4484 = sst [smem:[#allocation20_spill]] %s3407_s18  ;;  %s2763_s29 = sadd.s32 4294967295, %s3447_s28   ;;  %s3447_s28 = sphi %s3519_s28, %s27_s28   ;;  %s3443_s27 = sphi %s3517_s27, %s4532_s27   ;;  %s3439_s26 = sphi %s3515_s26, %s4531_s26   ;;  %s3435_s25 = sphi %s3513_s25, %s4530_s25   ;;  %s3431_s24 = sphi %s3511_s24, %s4529_s24   ;;  %s3427_s23 = sphi %s3509_s23, %s4528_s23   ;;  %s3423_s22 = sphi %s3507_s22, %s4527_s22   ;;  %s3419_s21 = sphi %s3505_s21, %s4526_s21   ;;  %s3415_s20 = sphi %s3503_s20, %s4525_s20   ;;  %s3411_s19 = sphi %s3501_s19, %s4524_s19   ;;  %s3407_s18 = sphi %s3499_s18, %s4523_s18  }
  0x14   : > { %s2764_s30 = sadd.s32 4294967294, %s3447_s28   ;;  %p59_p0 = scmp.ne.s32.totalorder %s3423_s22, %s3419_s21 }
  0x15   : > { %p3555_p1 = scmp.eq.s32.totalorder %s2763_s29, 0  ;;  %p147_p2 = scmp.ne.s32.totalorder %s3415_s20, %s3411_s19 }
  0x16   : > { %p148_p4 = scmp.eq.s32.totalorder %s2763_s29, 3  ;;  %p153_p5 = scmp.ne.s32.totalorder %s3411_s19, %s3407_s18 }
  0x17   : > { %s4485_s6 = scalar_select %p3555_p1, 1, 0 }
  0x18   : > { %p3564_p3 = por %p3555_p1, %p59_p0  ;;  %p154_p6 = scmp.eq.s32.totalorder %s2764_s30, 3 }
  0x19   : > { %p3570_p7 = por %p148_p4, %p147_p2  ;;  %p2765_p8 = scmp.ge.s32.totalorder %s3447_s28, 1 }
  0x1a   : > { %s4486_s8 = scalar_select %p3564_p3, 1, 0 }
  0x1b   : > { %s4487_s9 = scalar_select %p3570_p7, 1, 0 }
  0x1c   : > { %p3575_p9 = por %p154_p6, %p153_p5  ;;  %p189_p10 = scmp.lt.s32.totalorder %s3447_s28, 5 }
  0x1d   : > { %s3449_s12 = smov [#allocation7]   ;;  %s3450_s14 = smov [#allocation9]  }
  0x1e   : > { %s4488_s10 = scalar_select %p3575_p9, 1, 0 }
  0x1f   : > { %p3580_p11 = pnand %p2765_p8, %p189_p10  ;;  %s202_s13 = sshll.u32 %s3449_s12, 4  ;;  %s203_s13 = int_to_ptr.vmem [resolvable:$true] %s202_s13 }
  0x20   : > { %4489 = sst [smem:[#allocation21_spill]] %s4488_s10  ;;  %s213_s15 = sshll.u32 %s3450_s14, 4  ;;  %s3592_s15 = int_to_ptr.vmem [resolvable:$true] %s213_s15 }
  0x21   : > { %s4490_s11 = scalar_select %p3580_p11, 1, 0 }
  0x22   : > { %p3010_p12 = pneg %p3580_p11  ;;  %s3451_s17 = smov [#allocation10]  }
  0x23   : > { %s223_s21 = sshll.u32 %s3451_s17, 4  ;;  %s4492_s1 = sld [smem:[#allocation23_spill]]  ;;  %s3594_s21 = int_to_ptr.vmem [resolvable:$true] %s223_s21 }
  0x24   : > { %p3588_p13 = pnand %p3010_p12, %p3555_p1 }
  0x26   : > { %p3604_p2 = pneg %p3588_p13 }
  0x29   : > { %s3171_s12 = scalar_lea.hbm %s4492_s1, 16 }
  0x2a   : > { %p3172_p0 = scmp.ne.s32.totalorder %s4492_s1, %s3171_s12  ;;  %p3178_p6 = scmp.lt.u32.totalorder %s3171_s12, %s4492_s1 }
  0x2c   : > { %p3174_p4 = pnand %p3604_p2, %p3172_p0 }
  0x2e   : > { %p3175_p5 = pneg %p3174_p4 }
  0x30   : > { %p3180_p8 = pnand %p3178_p6, %p3175_p5 }
  0x32   : > { %3183 = shalt.err (!%p3180_p8)
}
  0x33   : > { %s3184_s29 = scalar_lea.vmem %s203_s13, 16  ;;  %s3191_s7 = scalar_lea.vmem %s203_s13, 32 }
  0x34   : > { %p3185_p10 = scmp.ne.s32.totalorder %s203_s13, %s3184_s29  ;;  %p3192_p7 = scmp.lt.s32.totalorder %s203_s13, %s203_s13 }
  0x35   : > { %p3193_p1 = scmp.lt.s32.totalorder %s3191_s7, %s3184_s29 }
  0x36   : > { %p3187_p12 = pnand %p3185_p10, %p3604_p2 }
  0x37   : > { %p3194_p3 = por %p3193_p1, %p3192_p7 }
  0x38   : > { %p3188_p9 = pneg %p3187_p12 }
  0x3a   : > { %p3195_p11 = pnand %p3194_p3, %p3188_p9 }
  0x3c   : > { %3198 = shalt.err (!%p3195_p11)
}
  0x3d   : > { %3013 = dma.hbm_to_vmem [thread:$0]  (!%p3588_p13), %s4492_s1, 16, %s203_s13, [#allocation8]  }
  0x3e   : > { %s4494_s2 = sld [smem:[#allocation24_spill]] }
  0x44   : > { %s3199_s17 = scalar_lea.hbm %s4494_s2, 16 }
  0x45   : > { %p3200_p0 = scmp.ne.s32.totalorder %s4494_s2, %s3199_s17  ;;  %p3206_p3 = scmp.lt.u32.totalorder %s3199_s17, %s4494_s2 }
  0x47   : > { %p3202_p4 = pnand %p3200_p0, %p3604_p2 }
  0x49   : > { %p3203_p1 = pneg %p3202_p4 }
  0x4b   : > { %p3208_p7 = pnand %p3206_p3, %p3203_p1 }
  0x4d   : > { %3211 = shalt.err (!%p3208_p7)
}
  0x4e   : > { %s3212_s13 = scalar_lea.vmem %s3592_s15, 16  ;;  %s3219_s4 = scalar_lea.vmem %s3592_s15, 32 }
  0x4f   : > { %p3213_p9 = scmp.ne.s32.totalorder %s3592_s15, %s3212_s13  ;;  %p3220_p6 = scmp.lt.s32.totalorder %s3592_s15, %s3592_s15 }
  0x50   : > { %p3221_p8 = scmp.lt.s32.totalorder %s3219_s4, %s3212_s13 }
  0x51   : > { %p3215_p11 = pnand %p3213_p9, %p3604_p2 }
  0x52   : > { %p3222_p10 = por %p3221_p8, %p3220_p6 }
  0x53   : > { %p3216_p5 = pneg %p3215_p11 }
  0x55   : > { %p3223_p12 = pnand %p3222_p10, %p3216_p5 }
  0x57   : > { %3226 = shalt.err (!%p3223_p12)
}
  0x58   : > { %3016 = dma.hbm_to_vmem [thread:$0]  (!%p3588_p13), %s4494_s2, 16, %s3592_s15, [#allocation8]  }
  0x59   : > { %s4495_s3 = sld [smem:[#allocation25_spill]] }
  0x5f   : > { %s3227_s12 = scalar_lea.hbm %s4495_s3, 320 }
  0x60   : > { %p3228_p0 = scmp.ne.s32.totalorder %s4495_s3, %s3227_s12  ;;  %p3234_p3 = scmp.lt.u32.totalorder %s3227_s12, %s4495_s3 }
  0x62   : > { %p3230_p4 = pnand %p3228_p0, %p3604_p2 }
  0x64   : > { %p3231_p1 = pneg %p3230_p4 }
  0x66   : > { %p3236_p7 = pnand %p3234_p3, %p3231_p1 }
  0x68   : > { %3239 = shalt.err (!%p3236_p7)
}
  0x69   : > { %s3240_s15 = scalar_lea.vmem %s3594_s21, 320  ;;  %p3248_p6 = scmp.lt.s32.totalorder %s3594_s21, %s3594_s21 }
  0x6a   : > { %p3241_p9 = scmp.ne.s32.totalorder %s3594_s21, %s3240_s15  ;;  %p3249_p8 = scmp.lt.s32.totalorder %s3240_s15, %s3240_s15 }
  0x6c   : > { %p3243_p11 = pnand %p3241_p9, %p3604_p2  ;;  %p3250_p10 = por %p3249_p8, %p3248_p6 }
  0x6e   : > { %p3244_p5 = pneg %p3243_p11 }
  0x70   : > { %p3251_p12 = pnand %p3250_p10, %p3244_p5 }
  0x72   : > { %3254 = shalt.err (!%p3251_p12)
}
  0x73   : > { %s3452_s4 = smov 64   ;;  %s3453_s14 = smov 4  }
  0x74   : > { %3019 = dma.hbm_to_vmem [thread:$0]  (!%p3588_p13), %s4495_s3, 320, %s3594_s21, [#allocation11], %s3452_s4, %s3452_s4, %s3453_s14  }
  0x75   : > { %s36_s30 = sadd.s32 1, %s3439_s26  ;;  %s39_s18 = sadd.s32 1, %s3443_s27 }
  0x76   : > { %p37_p2 = scmp.ge.s32.totalorder %s36_s30, 2  ;;  %s46_s12 = sadd.s32 1, %s3427_s23 }
  0x77   : > { %p53_p0 = scmp.ne.s32.totalorder %s3427_s23, %s3423_s22  ;;  %p54_p4 = scmp.eq.s32.totalorder %s3447_s28, 0 }
  0x78   : > { %s4534_s30 = smov (%p37_p2, %s36_s30), 0  ;;  %s4536_s18 = smov (!%p37_p2, %s39_s18), %s3443_s27 }
  0x79   : > { %s133_s16 = ssub.s32 %s3439_s26, %s4534_s30  ;;  %p41_p1 = scmp.ge.s32.totalorder %s4536_s18, 2 }
  0x7a   : > { %p3034_p3 = scmp.lt.s32.totalorder %s3447_s28, 4  ;;  %p3679_p13 = por %p54_p4, %p53_p0 }
  0x7b   : > { %s237_s17 = sand.u32 1, %s3427_s23   ;;  %s4538_s18 = smov (%p41_p1, %s4536_s18), 0 }
  0x7c   : > { %4497 = sst [smem:[#allocation22_spill]] %s4538_s18  ;;  %s2770_s29 = sshll.u32 %s237_s17, 8 }
  0x7d   : > { %s43_s7 = ssub.s32 %s3443_s27, %s4538_s18  ;;  %s2927_s15 = sshll.u32 %s3443_s27, 12 }
  0x7e   : > { %p44_p7 = scmp.eq.s32.totalorder %s43_s7, 0  ;;  %s134_s13 = sor.u32 %s133_s16, %s43_s7 }
  0x7f   : > { %p135_p9 = scmp.eq.s32.totalorder %s134_s13, 0  ;;  %s4498_s14 = sadd.s32 1, %s3415_s20 }
  0x80   : > { %s3690_s4 = scalar_select %p44_p7, %s3427_s23, %s46_s12  }
  0x81   : > { %s3695_s5 = scalar_select %p135_p9, %s3415_s20, %s4498_s14  }
  0x82   : > { %s3700_s2 = scalar_lea.hbm %s4463_s0, %s2927_s15  ;;  %s241_s3 = scalar_lea.vmem [#allocation4], %s2770_s29 }
  0x83   : > { %s248_s18 = sshll.u32 %s241_s3, 4  ;;  %p3708_p11 = pnand %p3034_p3, %p3679_p13  ;;  %s3702_s18 = int_to_ptr.vmem [resolvable:$true] %s248_s18 }
  0x84   : > { %s3712_s16 = scalar_lea.sflag [#allocation5], %s237_s17  ;;  %s3255_s1 = scalar_lea.hbm %s3700_s2, 4096 }
  0x85   : > { %p3256_p5 = scmp.ne.s32.totalorder %s3700_s2, %s3255_s1  ;;  %p3257_p6 = pneg %p3708_p11 }
  0x86   : > { %s3260_s21 = scalar_lea.hbm %s4463_s0, 8192  ;;  %p3261_p12 = scmp.lt.u32.totalorder %s3700_s2, %s4463_s0 }
  0x87   : > { %p3258_p8 = pnand %p3257_p6, %p3256_p5  ;;  %p3262_p2 = scmp.lt.u32.totalorder %s3260_s21, %s3255_s1 }
  0x88   : > { %p3264_p4 = scmp.lt.u32.totalorder %s3255_s1, %s3700_s2 }
  0x89   : > { %p3259_p10 = pneg %p3258_p8  ;;  %p3263_p0 = por %p3262_p2, %p3261_p12 }
  0x8b   : > { %p3265_p1 = por %p3264_p4, %p3263_p0 }
  0x8d   : > { %p3266_p3 = pnand %p3265_p1, %p3259_p10 }
  0x8f   : > { %3269 = shalt.err (!%p3266_p3)
}
  0x90   : > { %s3270_s17 = scalar_lea.vmem %s3702_s18, 4096  ;;  %s3454_s15 = smov [#allocation4]  }
  0x91   : > { %p3271_p13 = scmp.ne.s32.totalorder %s3702_s18, %s3270_s17  ;;  %s3275_s14 = sshll.u32 %s3454_s15, 4  ;;  %s3276_s14 = int_to_ptr.vmem [resolvable:$false] %s3275_s14 }
  0x92   : > { %s3277_s10 = scalar_lea.vmem %s3276_s14, 8192  ;;  %p3278_p5 = scmp.lt.s32.totalorder %s3702_s18, %s3276_s14 }
  0x93   : > { %p3273_p7 = pnand %p3271_p13, %p3257_p6  ;;  %p3279_p8 = scmp.lt.s32.totalorder %s3277_s10, %s3270_s17 }
  0x95   : > { %p3274_p9 = pneg %p3273_p7  ;;  %p3280_p12 = por %p3279_p8, %p3278_p5 }
  0x97   : > { %p3281_p2 = pnand %p3280_p12, %p3274_p9 }
  0x99   : > { %3284 = shalt.err (!%p3281_p2)
}
  0x9a   : > { %s3455_s1 = smov 128   ;;  %s3456_s3 = smov 8  }
  0x9b   : > { %3023 = dma.hbm_to_vmem [thread:$0]  (!%p3708_p11), %s3700_s2, 4096, %s3702_s18, %s3712_s16, %s3455_s1, %s3455_s1, %s3456_s3  }
  0x9c   : > { %p4500_p6 = scmp.ne.s32.totalorder %s4490_s11, 0 }
  0x9d   : > { %s262_s29 = sand.u32 (!%p4500_p6), 1, %s3423_s22   ;;  %p4501_p10 = scmp.ne.s32.totalorder (!%p4500_p6), %s4486_s8, 0 }
  0x9e   : > { %260 = sbr.rel (%p4500_p6) target bundleno = 780 (0x30c), region = 36  ;;  %s3743_s21 = sshll.u32 (!%p4500_p6), %s262_s29, 8 }
  0x9f   : > { %s263_s7 = scalar_lea.sflag (!%p4500_p6), [#allocation5], %s262_s29  ;;  %s266_s13 = scalar_lea.vmem (!%p4500_p6), [#allocation4], %s3743_s21 }
  0xa5   : > { %3386 = dma.done.wait (%p4501_p10), %s263_s7, 4096  }
  0xa6   : > { %3388 = vsyncadd (%p4501_p10), %s263_s7, 4294963200  ;;  %p4502_p0 = scmp.ne.s32.totalorder %s4485_s6, 0 }
  0xa8   : > { %3390 = dma.done.wait (%p4502_p0), [#allocation8], 32  }
  0xa9   : > { %3392 = vsyncadd (%p4502_p0), [#allocation8], 4294967264 }
  0xaa   : > { %3394 = dma.done.wait (%p4502_p0), [#allocation11], 320  }
  0xab   : > { %3396 = vsyncadd (%p4502_p0), [#allocation11], 4294966976  ;;  %vm316_vm0 = vcmask 24576   ;;  %vm313_vm1 = vcmask 27648   ;;  %s3759_s2 = sand.u32 1, %s3411_s19   ;;  %s2780_s8 = sshll.u32 %s3431_s24, 3 }
  0xac   : > { %vm324_vm2 = vsmask.f32 256  ;;  %s2778_s11 = sshll.u32 %s3759_s2, 7  ;;  %s2779_s18 = sshll.u32 %s3759_s2, 1  ;;  %v3457_v0 = vmov 0  }
  0xad   : > { %314 = vst.msk [vmem:[#allocation2] sm:$0xf] %vm313_vm1, %v3457_v0  ;;  %315 = vst.msk [vmem:[#allocation2 + $0x4] sm:$0xf] %vm313_vm1, %v3457_v0  ;;  %s2928_s6 = sshll.u32 %s3431_s24, 7  ;;  %s3905_s16 = scalar_lea.vmem [#allocation12], %s2778_s11 }
  0xae   : > { %317 = vst.msk [vmem:[#allocation2 + $0x8] sm:$0x1] %vm316_vm0, %v3457_v0  ;;  %321 = vst.msk [vmem:[#allocation2 + $0x74] sm:$0x1] %vm316_vm0, %v3457_v0  ;;  %vm350_vm4 = vsmask.f32 7938  ;;  %s3779_s12 = scalar_lea.vmem %s266_s13, %s2928_s6 [#allocation4] }
  0xaf   : > { %319 = vst.msk [vmem:[#allocation2 + $0x6c] sm:$0xf] %vm313_vm1, %v3457_v0  ;;  %320 = vst.msk [vmem:[#allocation2 + $0x70] sm:$0xf] %vm313_vm1, %v3457_v0  ;;  %v326_v2 = vld [vmem:[#allocation2 + $0xc] sm:$0x1] }
  0xb0   : > { %vm3773_vm3 = vmand %vm316_vm0, %vm324_vm2  ;;  %v329_v3 = vld [vmem:[#allocation2 + $0x18] sm:$0x1]  ;;  %v332_v4 = vld [vmem:[#allocation2 + $0x24] sm:$0x1]  ;;  %vm442_vm6 = vsmask.f32 4368 }
  0xb1   : > { %v327_v5 = vsel %vm3773_vm3, 0, %v326_v2  ;;  %v330_v6 = vsel %vm3773_vm3, 0, %v329_v3  ;;  %v333_v7 = vsel %vm3773_vm3, 0, %v332_v4  ;;  %v335_v8 = vld [vmem:[#allocation2 + $0x30] sm:$0x1]  ;;  %vm3789_vm5 = vmand %vm316_vm0, %vm350_vm4  ;;  %v378_v10 = vld [vmem:[%s3779_s12] sm:$0xff] }
  0xb2   : > { %328 = vst [vmem:[#allocation2 + $0xc] sm:$0x1] %v327_v5  ;;  %331 = vst [vmem:[#allocation2 + $0x18] sm:$0x1] %v330_v6  ;;  %v336_v11 = vsel %vm3773_vm3, 0, %v335_v8  ;;  %v379_v14 = vld [vmem:[%s3779_s12 + $0x8] sm:$0xff]  ;;  %v2929_v23 = vpack.c.bf16 %v378_v10, %v378_v10 }
  0xb3   : > { %334 = vst [vmem:[#allocation2 + $0x24] sm:$0x1] %v333_v7  ;;  %v338_v12 = vld [vmem:[#allocation2 + $0x3c] sm:$0x1]  ;;  %v341_v13 = vld [vmem:[#allocation2 + $0x48] sm:$0x1]  ;;  %v2930_v28 = vpack.c.bf16 %v379_v14, %v379_v14  ;;  %vm3826_vm7 = vmand %vm313_vm1, %vm350_vm4 }
  0xb4   : > { %337 = vst [vmem:[#allocation2 + $0x30] sm:$0x1] %v336_v11  ;;  %v339_v15 = vsel %vm3773_vm3, 0, %v338_v12  ;;  %v342_v16 = vsel %vm3773_vm3, 0, %v341_v13  ;;  %v344_v17 = vld [vmem:[#allocation2 + $0x54] sm:$0x1]  ;;  %vm3833_vm8 = vmor %vm324_vm2, %vm442_vm6 }
  0xb5   : > { %v347_v18 = vld [vmem:[#allocation2 + $0x60] sm:$0x1]  ;;  %340 = vst [vmem:[#allocation2 + $0x3c] sm:$0x1] %v339_v15  ;;  %343 = vst [vmem:[#allocation2 + $0x48] sm:$0x1] %v342_v16 }
  0xb6   : > { %v345_v19 = vsel %vm3773_vm3, 0, %v344_v17  ;;  %v348_v20 = vsel %vm3773_vm3, 0, %v347_v18  ;;  %v352_v21 = vld [vmem:[#allocation2 + $0x14] sm:$0x1]  ;;  %v355_v22 = vld [vmem:[#allocation2 + $0x20] sm:$0x1] }
  0xb7   : > { %346 = vst [vmem:[#allocation2 + $0x54] sm:$0x1] %v345_v19  ;;  %349 = vst [vmem:[#allocation2 + $0x60] sm:$0x1] %v348_v20  ;;  %v353_v24 = vsel %vm3789_vm5, 0, %v352_v21  ;;  %v356_v25 = vsel %vm3789_vm5, 0, %v355_v22 }
  0xb8   : > { %v358_v26 = vld [vmem:[#allocation2 + $0x2c] sm:$0x1]  ;;  %v361_v27 = vld [vmem:[#allocation2 + $0x38] sm:$0x1]  ;;  %354 = vst [vmem:[#allocation2 + $0x14] sm:$0x1] %v353_v24 }
  0xb9   : > { %357 = vst [vmem:[#allocation2 + $0x20] sm:$0x1] %v356_v25  ;;  %v359_v29 = vsel %vm3789_vm5, 0, %v358_v26  ;;  %v362_v30 = vsel %vm3789_vm5, 0, %v361_v27  ;;  %v364_v31 = vld [vmem:[#allocation2 + $0x44] sm:$0x1] }
  0xba   : > { %v367_v32 = vld [vmem:[#allocation2 + $0x50] sm:$0x1]  ;;  %360 = vst [vmem:[#allocation2 + $0x2c] sm:$0x1] %v359_v29  ;;  %363 = vst [vmem:[#allocation2 + $0x38] sm:$0x1] %v362_v30 }
  0xbb   : > { %v365_v33 = vsel %vm3789_vm5, 0, %v364_v31  ;;  %v368_v34 = vsel %vm3789_vm5, 0, %v367_v32  ;;  %v370_v35 = vld [vmem:[#allocation2 + $0x5c] sm:$0x1]  ;;  %v373_v36 = vld [vmem:[#allocation2 + $0x68] sm:$0x1] }
  0xbc   : > { %366 = vst [vmem:[#allocation2 + $0x44] sm:$0x1] %v365_v33  ;;  %369 = vst [vmem:[#allocation2 + $0x50] sm:$0x1] %v368_v34  ;;  %v371_v37 = vsel %vm3789_vm5, 0, %v370_v35  ;;  %v374_v38 = vsel %vm3789_vm5, 0, %v373_v36 }
  0xbd   : > { %v445_v39 = vshrl.u32 %v2929_v23, 16  ;;  %v448_v40 = vshll.u32 %v2929_v23, 16  ;;  %v380_v41 = vld [vmem:[%s3779_s12 + $0x10] sm:$0xff]  ;;  %v381_v42 = vld [vmem:[%s3779_s12 + $0x18] sm:$0xff]  ;;  %372 = vst [vmem:[#allocation2 + $0x5c] sm:$0x1] %v371_v37 }
  0xbe   : > { %375 = vst [vmem:[#allocation2 + $0x68] sm:$0x1] %v374_v38  ;;  %v453_v43 = vshrl.u32 %v2930_v28, 16  ;;  %v456_v44 = vshll.u32 %v2930_v28, 16  ;;  %v2931_v45 = vpack.c.bf16 %v380_v41, %v380_v41  ;;  %v2932_v46 = vpack.c.bf16 %v381_v42, %v381_v42  ;;  %v606_v48 = vld [vmem:[#allocation2 + $0xc] sm:$0xf] }
  0xbf   : > { %v447_v47 = vrot.slane %v445_v39, 7  ;;  %v382_v49 = vld [vmem:[%s3779_s12 + $0x20] sm:$0xff]  ;;  %v383_v55 = vld [vmem:[%s3779_s12 + $0x28] sm:$0xff]  ;;  %v610_v63 = vld [vmem:[#allocation2 + $0x14] sm:$0x1]  ;;  %s3909_s17 = scalar_lea.vmem [#allocation13], %s2779_s18 }
  0xc0   : > { %v455_v51 = vrot.slane %v453_v43, 7  ;;  %v462_v52 = vshrl.u32 %v2931_v45, 16  ;;  %v465_v53 = vshll.u32 %v2931_v45, 16  ;;  %v470_v54 = vshrl.u32 %v2932_v46, 16  ;;  %v613_v4 = vld [vmem:[#allocation2 + $0x18] sm:$0xf] }
  0xc1   : > { %v450_v56 = vor.u32 %v448_v40, %v447_v47  ;;  %v451_v58 = vrot.slane %v447_v47, 4  ;;  %v473_v59 = vshll.u32 %v2932_v46, 16  ;;  %v2933_v60 = vpack.c.bf16 %v382_v49, %v382_v49  ;;  %v384_v8 = vld [vmem:[%s3779_s12 + $0x30] sm:$0xff]  ;;  %v385_v9 = vld [vmem:[%s3779_s12 + $0x38] sm:$0xff]  ;;  %v617_v14 = vld [vmem:[#allocation2 + $0x20] sm:$0x1] }
  0xc2   : > { %v458_v61 = vor.u32 %v456_v44, %v455_v51  ;;  %v460_v62 = vrot.slane %v455_v51, 4  ;;  %v464_v0 = vrot.slane %v462_v52, 7  ;;  %v472_v2 = vrot.slane %v470_v54, 7  ;;  %v620_v20 = vld [vmem:[#allocation2 + $0x24] sm:$0xf]  ;;  %v387_v25 = vld [vmem:[%s3779_s12 + $0x48] sm:$0xff] }
  0xc3   : > { %v607_v3 = vsel %vm3826_vm7, %v450_v56, %v606_v48  ;;  %v479_v5 = vshrl.u32 %v2933_v60, 16  ;;  %v482_v6 = vshll.u32 %v2933_v60, 16  ;;  %v2934_v7 = vpack.c.bf16 %v383_v55, %v383_v55  ;;  %v386_v24 = vld [vmem:[%s3779_s12 + $0x40] sm:$0xff]  ;;  %v624_v35 = vld [vmem:[#allocation2 + $0x2c] sm:$0x1]  ;;  %v388_v44 = vld [vmem:[%s3779_s12 + $0x50] sm:$0xff] }
  0xc4   : > { %608 = vst [vmem:[#allocation2 + $0xc] sm:$0xf] %v607_v3  ;;  %v459_v10 = vsel %vm3833_vm8, %v451_v58, %v458_v61  ;;  %v611_v11 = vsel %vm3773_vm3, %v460_v62, %v610_v63  ;;  %v467_v12 = vor.u32 %v465_v53, %v464_v0  ;;  %v468_v13 = vrot.slane %v464_v0, 4  ;;  %v627_v42 = vld [vmem:[#allocation2 + $0x30] sm:$0xf]  ;;  %v389_v49 = vld [vmem:[%s3779_s12 + $0x58] sm:$0xff] }
  0xc5   : > { %609 = vst.msk [vmem:[#allocation2 + $0x10] sm:$0xf] %vm313_vm1, %v459_v10  ;;  %612 = vst [vmem:[#allocation2 + $0x14] sm:$0x1] %v611_v11  ;;  %v475_v15 = vor.u32 %v473_v59, %v472_v2  ;;  %v477_v16 = vrot.slane %v472_v2, 4  ;;  %v481_v17 = vrot.slane %v479_v5, 7  ;;  %v2935_v22 = vpack.c.bf16 %v384_v8, %v384_v8 }
  0xc6   : > { %v487_v18 = vshrl.u32 %v2934_v7, 16  ;;  %v614_v19 = vsel %vm3826_vm7, %v467_v12, %v613_v4  ;;  %v490_v21 = vshll.u32 %v2934_v7, 16  ;;  %v2936_v23 = vpack.c.bf16 %v385_v9, %v385_v9  ;;  %v390_v51 = vld [vmem:[%s3779_s12 + $0x60] sm:$0xff]  ;;  %v631_v56 = vld [vmem:[#allocation2 + $0x38] sm:$0x1]  ;;  %p2798_p11 = scmp.le.s32.totalorder %s3431_s24, 0 }
  0xc7   : > { %615 = vst [vmem:[#allocation2 + $0x18] sm:$0xf] %v614_v19  ;;  %v476_v26 = vsel %vm3833_vm8, %v468_v13, %v475_v15  ;;  %v618_v27 = vsel %vm3773_vm3, %v477_v16, %v617_v14  ;;  %v484_v28 = vor.u32 %v482_v6, %v481_v17  ;;  %v485_v29 = vrot.slane %v481_v17, 4  ;;  %v634_v63 = vld [vmem:[#allocation2 + $0x3c] sm:$0xf]  ;;  %v391_v13 = vld [vmem:[%s3779_s12 + $0x68] sm:$0xff] }
  0xc8   : > { %616 = vst.msk [vmem:[#allocation2 + $0x1c] sm:$0xf] %vm313_vm1, %v476_v26  ;;  %619 = vst [vmem:[#allocation2 + $0x20] sm:$0x1] %v618_v27  ;;  %v489_v30 = vrot.slane %v487_v18, 7  ;;  %v496_v31 = vshrl.u32 %v2935_v22, 16  ;;  %v2937_v37 = vpack.c.bf16 %v386_v24, %v386_v24  ;;  %v2938_v38 = vpack.c.bf16 %v387_v25, %v387_v25 }
  0xc9   : > { %v499_v32 = vshll.u32 %v2935_v22, 16  ;;  %v504_v33 = vshrl.u32 %v2936_v23, 16  ;;  %v621_v34 = vsel %vm3826_vm7, %v484_v28, %v620_v20  ;;  %v507_v36 = vshll.u32 %v2936_v23, 16  ;;  %v638_v8 = vld [vmem:[#allocation2 + $0x44] sm:$0x1]  ;;  %v392_v14 = vld [vmem:[%s3779_s12 + $0x70] sm:$0xff] }
  0xca   : > { %622 = vst [vmem:[#allocation2 + $0x24] sm:$0xf] %v621_v34  ;;  %v492_v39 = vor.u32 %v490_v21, %v489_v30  ;;  %v494_v40 = vrot.slane %v489_v30, 4  ;;  %v498_v41 = vrot.slane %v496_v31, 7  ;;  %v513_v45 = vshrl.u32 %v2937_v37, 16  ;;  %v393_v19 = vld [vmem:[%s3779_s12 + $0x78] sm:$0xff] }
  0xcb   : > { %v506_v43 = vrot.slane %v504_v33, 7  ;;  %v516_v46 = vshll.u32 %v2937_v37, 16  ;;  %v521_v47 = vshrl.u32 %v2938_v38, 16  ;;  %v524_v48 = vshll.u32 %v2938_v38, 16  ;;  %v641_v24 = vld [vmem:[#allocation2 + $0x48] sm:$0xf] }
  0xcc   : > { %v493_v52 = vsel %vm3833_vm8, %v485_v29, %v492_v39  ;;  %v625_v53 = vsel %vm3773_vm3, %v494_v40, %v624_v35  ;;  %v501_v54 = vor.u32 %v499_v32, %v498_v41  ;;  %v502_v55 = vrot.slane %v498_v41, 4  ;;  %v645_v31 = vld [vmem:[#allocation2 + $0x50] sm:$0x1]  ;;  %v648_v32 = vld [vmem:[#allocation2 + $0x54] sm:$0xf]  ;;  %s2799_s15 = sadd.s32 (!%p2798_p11), 4294967295, %s2780_s8 }
  0xcd   : > { %623 = vst.msk [vmem:[#allocation2 + $0x28] sm:$0xf] %vm313_vm1, %v493_v52  ;;  %626 = vst [vmem:[#allocation2 + $0x2c] sm:$0x1] %v625_v53  ;;  %v509_v58 = vor.u32 %v507_v36, %v506_v43  ;;  %v511_v59 = vrot.slane %v506_v43, 4  ;;  %v515_v60 = vrot.slane %v513_v45, 7  ;;  %v2939_v0 = vpack.c.bf16 %v388_v44, %v388_v44 }
  0xce   : > { %v523_v61 = vrot.slane %v521_v47, 7  ;;  %v628_v62 = vsel %vm3826_vm7, %v501_v54, %v627_v42  ;;  %v2940_v2 = vpack.c.bf16 %v389_v49, %v389_v49  ;;  %v2941_v3 = vpack.c.bf16 %v390_v51, %v390_v51  ;;  %v652_v49 = vld [vmem:[#allocation2 + $0x5c] sm:$0x1]  ;;  %v655_v51 = vld [vmem:[#allocation2 + $0x60] sm:$0xf]  ;;  %s2800_s14 = sshll.u32 (!%p2798_p11), %s2799_s15, 4 }
  0xcf   : > { %629 = vst [vmem:[#allocation2 + $0x30] sm:$0xf] %v628_v62  ;;  %v510_v4 = vsel %vm3833_vm8, %v502_v55, %v509_v58  ;;  %v632_v5 = vsel %vm3773_vm3, %v511_v59, %v631_v56  ;;  %v518_v6 = vor.u32 %v516_v46, %v515_v60  ;;  %v519_v7 = vrot.slane %v515_v60, 4  ;;  %v659_v62 = vld [vmem:[#allocation2 + $0x68] sm:$0x1]  ;;  %s668_s10 = scalar_lea.vmem (!%p2798_p11), %s266_s13, %s2800_s14 [#allocation4] }
  0xd0   : > { %630 = vst.msk [vmem:[#allocation2 + $0x34] sm:$0xf] %vm313_vm1, %v510_v4  ;;  %633 = vst [vmem:[#allocation2 + $0x38] sm:$0x1] %v632_v5  ;;  %v526_v9 = vor.u32 %v524_v48, %v523_v61  ;;  %v528_v10 = vrot.slane %v523_v61, 4  ;;  %v530_v11 = vshrl.u32 %v2939_v0, 16  ;;  %v2942_v27 = vpack.c.bf16 %v391_v13, %v391_v13 }
  0xd1   : > { %v533_v12 = vshll.u32 %v2939_v0, 16  ;;  %v635_v15 = vsel %vm3826_vm7, %v518_v6, %v634_v63  ;;  %v538_v16 = vshrl.u32 %v2940_v2, 16  ;;  %v541_v17 = vshll.u32 %v2940_v2, 16  ;;  %v669_v4 = vld [vmem:[%s668_s10] sm:$0xff] (!%p2798_p11)  ;;  %v670_v5 = vld [vmem:[%s668_s10 + $0x8] sm:$0xff] (!%p2798_p11) }
  0xd2   : > { %v547_v18 = vshrl.u32 %v2941_v3, 16  ;;  %636 = vst [vmem:[#allocation2 + $0x3c] sm:$0xf] %v635_v15  ;;  %v527_v20 = vsel %vm3833_vm8, %v519_v7, %v526_v9  ;;  %v639_v21 = vsel %vm3773_vm3, %v528_v10, %v638_v8  ;;  %v532_v22 = vrot.slane %v530_v11, 7  ;;  %v701_v15 = vld [vmem:[#allocation2 + $0x8] sm:$0x1] (!%p2798_p11) }
  0xd3   : > { %v550_v23 = vshll.u32 %v2941_v3, 16  ;;  %637 = vst.msk [vmem:[#allocation2 + $0x40] sm:$0xf] %vm313_vm1, %v527_v20  ;;  %640 = vst [vmem:[#allocation2 + $0x44] sm:$0x1] %v639_v21  ;;  %v540_v25 = vrot.slane %v538_v16, 7  ;;  %v2943_v28 = vpack.c.bf16 %v392_v14, %v392_v14  ;;  %v2944_v33 = vpack.c.bf16 %v393_v19, %v393_v19 }
  0xd4   : > { %v549_v26 = vrot.slane %v547_v18, 7  ;;  %v535_v29 = vor.u32 %v533_v12, %v532_v22  ;;  %v536_v30 = vrot.slane %v532_v22, 4  ;;  %v555_v38 = vshrl.u32 %v2942_v27, 16  ;;  %v697_v14 = vld [vmem:[#allocation2] sm:$0xf] (!%p2798_p11) }
  0xd5   : > { %v543_v34 = vor.u32 %v541_v17, %v540_v25  ;;  %v545_v35 = vrot.slane %v540_v25, 4  ;;  %v558_v39 = vshll.u32 %v2942_v27, 16  ;;  %v564_v40 = vshrl.u32 %v2943_v28, 16 }
  0xd6   : > { %v552_v36 = vor.u32 %v550_v23, %v549_v26  ;;  %v642_v37 = vsel %vm3826_vm7, %v535_v29, %v641_v24  ;;  %v567_v44 = vshll.u32 %v2943_v28, 16  ;;  %v553_v45 = vrot.slane %v549_v26, 4 }
  0xd7   : > { %643 = vst [vmem:[#allocation2 + $0x48] sm:$0xf] %v642_v37  ;;  %v544_v41 = vsel %vm3833_vm8, %v536_v30, %v543_v34  ;;  %v646_v42 = vsel %vm3773_vm3, %v545_v35, %v645_v31  ;;  %v557_v46 = vrot.slane %v555_v38, 7  ;;  %v566_v47 = vrot.slane %v564_v40, 7 }
  0xd8   : > { %v649_v43 = vsel %vm3826_vm7, %v552_v36, %v648_v32  ;;  %644 = vst.msk [vmem:[#allocation2 + $0x4c] sm:$0xf] %vm313_vm1, %v544_v41  ;;  %647 = vst [vmem:[#allocation2 + $0x50] sm:$0x1] %v646_v42  ;;  %v572_v48 = vshrl.u32 %v2944_v33, 16  ;;  %v575_v52 = vshll.u32 %v2944_v33, 16  ;;  %v2945_v6 = vpack.c.bf16 (!%p2798_p11), %v669_v4, %v669_v4 }
  0xd9   : > { %650 = vst [vmem:[#allocation2 + $0x54] sm:$0xf] %v649_v43  ;;  %v560_v53 = vor.u32 %v558_v39, %v557_v46  ;;  %v562_v54 = vrot.slane %v557_v46, 4  ;;  %v569_v55 = vor.u32 %v567_v44, %v566_v47  ;;  %v570_v56 = vrot.slane %v566_v47, 4  ;;  %665 = sbr.rel (%p2798_p11) target bundleno = 228 (0xe4), region = 56 }
  0xda   : > { %v574_v58 = vrot.slane %v572_v48, 7  ;;  %v2946_v7 = vpack.c.bf16 (!%p2798_p11), %v670_v5, %v670_v5  ;;  %v678_v8 = vshrl.u32 (!%p2798_p11), %v2945_v6, 16  ;;  %v681_v9 = vshll.u32 (!%p2798_p11), %v2945_v6, 16 }
  0xdb   : > { %v561_v59 = vsel %vm3833_vm8, %v553_v45, %v560_v53  ;;  %v653_v60 = vsel %vm3773_vm3, %v562_v54, %v652_v49  ;;  %v656_v61 = vsel %vm3826_vm7, %v569_v55, %v655_v51 }
  0xdc   : > { %651 = vst.msk [vmem:[#allocation2 + $0x58] sm:$0xf] %vm313_vm1, %v561_v59  ;;  %654 = vst [vmem:[#allocation2 + $0x5c] sm:$0x1] %v653_v60  ;;  %v577_v63 = vor.u32 %v575_v52, %v574_v58  ;;  %v579_v0 = vrot.slane %v574_v58, 4  ;;  %v686_v10 = vshrl.u32 (!%p2798_p11), %v2946_v7, 16 }
  0xdd   : > { %657 = vst [vmem:[#allocation2 + $0x60] sm:$0xf] %v656_v61  ;;  %v689_v11 = vshll.u32 (!%p2798_p11), %v2946_v7, 16  ;;  %v680_v12 = vrot.slane (!%p2798_p11), %v678_v8, 7 }
  0xde   : > { %v578_v2 = vsel %vm3833_vm8, %v570_v56, %v577_v63  ;;  %v660_v3 = vsel %vm3773_vm3, %v579_v0, %v659_v62  ;;  %v688_v13 = vrot.slane (!%p2798_p11), %v686_v10, 7 }
  0xdf   : > { %658 = vst.msk [vmem:[#allocation2 + $0x64] sm:$0xf] %vm313_vm1, %v578_v2  ;;  %661 = vst [vmem:[#allocation2 + $0x68] sm:$0x1] %v660_v3  ;;  %v683_v16 = vor.u32 (!%p2798_p11), %v681_v9, %v680_v12  ;;  %v684_v17 = vrot.slane (!%p2798_p11), %v680_v12, 4 }
  0xe0   : > { %v691_v18 = vor.u32 %v689_v11, %v688_v13  ;;  %v693_v19 = vrot.slane %v688_v13, 4 }
  0xe1   : > { %v698_v20 = vsel %vm3826_vm7, %v683_v16, %v697_v14 }
  0xe2   : > { %v692_v21 = vsel %vm3833_vm8, %v684_v17, %v691_v18  ;;  %v702_v22 = vsel %vm3773_vm3, %v693_v19, %v701_v15  ;;  %699 = vst [vmem:[#allocation2] sm:$0xf] %v698_v20 }
  0xe3   : > { %700 = vst.msk [vmem:[#allocation2 + $0x4] sm:$0xf] %vm313_vm1, %v692_v21  ;;  %703 = vst [vmem:[#allocation2 + $0x8] sm:$0x1] %v702_v22 }
  0xe4 PF: > { %p2803_p4 = scmp.ge.s32.totalorder %s3431_s24, 1 }
  0xe5   : > { %v2806_v23 = vld [vmem:[%s3779_s12 + $0x80] sm:$0xff] (!%p2803_p4)  ;;  %v2807_v24 = vld [vmem:[%s3779_s12 + $0x88] sm:$0xff] (!%p2803_p4)  ;;  %v743_v34 = vld [vmem:[#allocation2 + $0x74] sm:$0x1] (!%p2803_p4) }
  0xe6   : > { %707 = sbr.rel (%p2803_p4) target bundleno = 241 (0xf1), region = 60  ;;  %v2948_v25 = vpack.c.bf16 (!%p2803_p4), %v2806_v23, %v2806_v23  ;;  %v2949_v26 = vpack.c.bf16 (!%p2803_p4), %v2807_v24, %v2807_v24  ;;  %v739_v33 = vld [vmem:[#allocation2 + $0x6c] sm:$0xf] (!%p2803_p4) }
  0xe8   : > { %v720_v27 = vshrl.u32 (!%p2803_p4), %v2948_v25, 16  ;;  %v723_v28 = vshll.u32 (!%p2803_p4), %v2948_v25, 16  ;;  %v728_v29 = vshrl.u32 (!%p2803_p4), %v2949_v26, 16  ;;  %v731_v30 = vshll.u32 (!%p2803_p4), %v2949_v26, 16 }
  0xea   : > { %v722_v31 = vrot.slane (!%p2803_p4), %v720_v27, 7  ;;  %v730_v32 = vrot.slane (!%p2803_p4), %v728_v29, 7 }
  0xec   : > { %v725_v35 = vor.u32 (!%p2803_p4), %v723_v28, %v722_v31  ;;  %v726_v36 = vrot.slane (!%p2803_p4), %v722_v31, 4  ;;  %v733_v37 = vor.u32 (!%p2803_p4), %v731_v30, %v730_v32  ;;  %v735_v38 = vrot.slane (!%p2803_p4), %v730_v32, 4 }
  0xee   : > { %v740_v39 = vsel %vm3826_vm7, %v725_v35, %v739_v33  ;;  %v734_v40 = vsel %vm3833_vm8, %v726_v36, %v733_v37  ;;  %v744_v41 = vsel %vm3773_vm3, %v735_v38, %v743_v34 }
  0xef   : > { %741 = vst [vmem:[#allocation2 + $0x6c] sm:$0xf] %v740_v39  ;;  %742 = vst.msk [vmem:[#allocation2 + $0x70] sm:$0xf] %vm313_vm1, %v734_v40 }
  0xf0   : > { %745 = vst [vmem:[#allocation2 + $0x74] sm:$0x1] %v744_v41 }
  0xf1 PF: > { %v3144_v42 = vld [vmem:[#allocation2 + $0xc] sm:$0xff]   ;;  %v3145_v43 = vld [vmem:[#allocation2 + $0x18] sm:$0xff]   ;;  %s3458_s1 = smov 12   ;;  %v819_v44 = vld [vmem:[#allocation2] sm:$0xf]  ;;  %vm1143_vm11 = vcmask 1042432  }
  0xf2   : > { %1315 = vrot.lane.b32.xlu0 %v3144_v42, %s3458_s1  ;;  %v820_v45 = vld [vmem:[#allocation2 + $0x4] sm:$0xf]  ;;  %v821_v50 = vld [vmem:[#allocation2 + $0x8] sm:$0x1]  ;;  %1317 = vrot.lane.b32.xlu1 %v3145_v43, %s3458_s1  ;;  %vm843_vm9 = vsmask.f32 3328 }
  0xf3   : > { %vm844_vm10 = vsmask.f32 7440  ;;  %v847_v57 = vshrl.u32 %v819_v44, 16  ;;  %v850_v1 = vshll.u32 %v819_v44, 16  ;;  %v856_v46 = vshll.u32 %v820_v45, 16  ;;  %s3459_s3 = smov 8  }
  0xf4   : > { %v860_v47 = vshrl.u32 %v820_v45, 16  ;;  %v866_v48 = vshll.u32 %v821_v50, 16  ;;  %v1095_v49 = vld [vmem:[#allocation2] sm:$0xe]  ;;  %v1096_v53 = vld [vmem:[#allocation2 + $0x4] sm:$0xf]  ;;  %vm3941_vm14 = vmor %vm843_vm9, %vm844_vm10 }
  0xf5   : > { %v849_v51 = vrot.slane %v847_v57, 4  ;;  %v852_v52 = vrot.slane %v850_v1, 5  ;;  %v1097_v54 = vld [vmem:[#allocation2 + $0x8] sm:$0x1]  ;;  %v858_v55 = vrot.slane %v856_v46, 5  ;;  %vm1144_vm12 = vcmask 1046532  }
  0xf6   : > { %v862_v56 = vrot.slane %v860_v47, 4  ;;  %v868_v58 = vrot.slane %v866_v48, 5  ;;  %vm3935_vm13 = vmor %vm1143_vm11, %vm1144_vm12  ;;  %v2826_v61 = vrot.slane %v1095_v49, 9  ;;  %v1148_v62 = vrot.slane %v1096_v53, 5  ;;  %v822_v0 = vld [vmem:[#allocation2 + $0xc] sm:$0xf] }
  0xf7   : > { %v853_v59 = vor.u32 %v852_v52, %v849_v51  ;;  %v1151_v63 = vrot.slane %v1097_v54, 5  ;;  %v823_v4 = vld [vmem:[#allocation2 + $0x10] sm:$0xf]  ;;  %v824_v5 = vld [vmem:[#allocation2 + $0x14] sm:$0x1]  ;;  %v871_v6 = vshrl.u32 %v822_v0, 16 }
  0xf8   : > { %v863_v3 = vor.u32 %v862_v56, %v858_v55  ;;  %v874_v7 = vshll.u32 %v822_v0, 16  ;;  %v1149_v9 = vsel %vm3935_vm13, %v2826_v61, %v1148_v62  ;;  %v1150_v10 = vrot.slane %v1148_v62, 4  ;;  %v1098_v12 = vld [vmem:[#allocation2 + $0xc] sm:$0xe]  ;;  %v1099_v17 = vld [vmem:[#allocation2 + $0x10] sm:$0xf] }
  0xf9   : > { %v854_v8 = vrot.slane %v853_v59, 4  ;;  %v880_v11 = vshll.u32 %v823_v4, 16  ;;  %v873_v14 = vrot.slane %v871_v6, 4  ;;  %v884_v16 = vshrl.u32 %v823_v4, 16  ;;  %v1100_v22 = vld [vmem:[#allocation2 + $0x14] sm:$0x1] }
  0xfa   : > { %v864_v13 = vrot.slane %v863_v3, 4  ;;  %v876_v15 = vrot.slane %v874_v7, 5  ;;  %v1152_v19 = vsel %vm3935_vm13, %v1150_v10, %v1151_v63  ;;  %v890_v21 = vshll.u32 %v824_v5, 16  ;;  %v1348_v23 = vld [vmem:[#allocation2 + $0xc] sm:$0xf]  ;;  %s3460_s29 = smov 4  }
  0xfb   : > { %v859_v18 = vsel %vm3941_vm14, %v854_v8, %v858_v55  ;;  %v882_v20 = vrot.slane %v880_v11, 5  ;;  %v2834_v25 = vcombine.low %v1149_v9, %v1152_v19  ;;  %v886_v27 = vrot.slane %v884_v16, 4  ;;  %v1349_v28 = vld [vmem:[#allocation2 + $0x10] sm:$0xf]  ;;  %v1350_v36 = vld [vmem:[#allocation2 + $0x14] sm:$0x1] }
  0xfc   : > { %v869_v24 = vsel %vm3941_vm14, %v864_v13, %v868_v58  ;;  %v877_v26 = vor.u32 %v876_v15, %v873_v14  ;;  %v892_v30 = vrot.slane %v890_v21, 5  ;;  %v2827_v31 = vrot.slane %v1098_v12, 9  ;;  %v1351_v42 = vld [vmem:[#allocation2 + $0x18] sm:$0xf]  ;;  %v1352_v48 = vld [vmem:[#allocation2 + $0x1c] sm:$0xf] }
  0xfd   : > { %v2818_v29 = vcombine.low %v859_v18, %v869_v24  ;;  %v1155_v32 = vrot.slane %v1099_v17, 5  ;;  %1226 = vrot.lane.b32.xlu1 %v2834_v25, %s3459_s3  ;;  %v887_v34 = vor.u32 %v886_v27, %v882_v20  ;;  %v1158_v35 = vrot.slane %v1100_v22, 5  ;;  %v1353_v53 = vld [vmem:[#allocation2 + $0x20] sm:$0x1]  ;;  %v1621_v55 = vld [vmem:[#allocation2 + $0xc] sm:$0xe] }
  0xfe   : > { %v878_v33 = vrot.slane %v877_v26, 4  ;;  %v1373_v37 = vshrl.u32 %v1348_v23, 16  ;;  %v1376_v40 = vshll.u32 %v1348_v23, 16  ;;  %v1382_v41 = vshll.u32 %v1349_v28, 16  ;;  %v1622_v62 = vld [vmem:[#allocation2 + $0x10] sm:$0xf] }
  0xff   : > { %1062 = vrot.lane.b32.xlu0 %v2818_v29, %s3460_s29  ;;  %v1156_v38 = vsel %vm3935_vm13, %v2827_v31, %v1155_v32  ;;  %v1157_v39 = vrot.slane %v1155_v32, 4  ;;  %v888_v44 = vrot.slane %v887_v34, 4  ;;  %v1386_v50 = vshrl.u32 %v1349_v28, 16  ;;  %v1623_v63 = vld [vmem:[#allocation2 + $0x14] sm:$0x1]  ;;  %s3461_s21 = smov 16  }
 0x100   : > { %v883_v43 = vsel %vm3941_vm14, %v878_v33, %v882_v20  ;;  %v1375_v45 = vrot.slane %v1373_v37, 4  ;;  %v1378_v1 = vrot.slane %v1376_v40, 5  ;;  %v1384_v46 = vrot.slane %v1382_v41, 5  ;;  %v1624_v6 = vld [vmem:[#allocation2 + $0x18] sm:$0xe]  ;;  %s3462_s7 = smov 20  }
 0x101   : > { %v1159_v57 = vsel %vm3935_vm13, %v1157_v39, %v1158_v35  ;;  %v1392_v47 = vshll.u32 %v1350_v36, 16  ;;  %v893_v49 = vsel %vm3941_vm14, %v888_v44, %v892_v30  ;;  %v1388_v52 = vrot.slane %v1386_v50, 4  ;;  %v1625_v7 = vld [vmem:[#allocation2 + $0x1c] sm:$0xf]  ;;  %v1626_v12 = vld [vmem:[#allocation2 + $0x20] sm:$0x1] }
 0x102   : > { %v2835_v51 = vcombine.low %v1156_v38, %v1159_v57  ;;  %v1397_v54 = vshrl.u32 %v1351_v42, 16  ;;  %v2819_v56 = vcombine.low %v883_v43, %v893_v49  ;;  %v1379_v58 = vor.u32 %v1378_v1, %v1375_v45  ;;  %v1872_v21 = vld [vmem:[#allocation2 + $0x18] sm:$0xf]  ;;  %v1873_v30 = vld [vmem:[#allocation2 + $0x1c] sm:$0xf]  ;;  %s3463_s13 = smov 24  }
 0x103   : > { %v1394_v59 = vrot.slane %v1392_v47, 5  ;;  %v1400_v61 = vshll.u32 %v1351_v42, 16  ;;  %v1389_v0 = vor.u32 %v1388_v52, %v1384_v46  ;;  %v1406_v4 = vshll.u32 %v1352_v48, 16  ;;  %v1874_v34 = vld [vmem:[#allocation2 + $0x20] sm:$0x1]  ;;  %s3464_s8 = smov 28  }
 0x104   : > { %1228 = vrot.lane.b32.xlu1 %v2835_v51, %s3459_s3  ;;  %v1399_v3 = vrot.slane %v1397_v54, 4  ;;  %v1410_v5 = vshrl.u32 %v1352_v48, 16  ;;  %1064 = vrot.lane.b32.xlu0 %v2819_v56, %s3460_s29  ;;  %v1380_v8 = vrot.slane %v1379_v58, 4  ;;  %v1416_v10 = vshll.u32 %v1353_v53, 16  ;;  %v1875_v40 = vld [vmem:[#allocation2 + $0x24] sm:$0xf] }
 0x105   : > { %v1402_v9 = vrot.slane %v1400_v61, 5  ;;  %v2858_v11 = vrot.slane %v1621_v55, 9  ;;  %v1390_v13 = vrot.slane %v1389_v0, 4  ;;  %v1408_v14 = vrot.slane %v1406_v4, 5  ;;  %v1876_v45 = vld [vmem:[#allocation2 + $0x28] sm:$0xf] }
 0x106   : > { %v1412_v15 = vrot.slane %v1410_v5, 4  ;;  %v1671_v16 = vrot.slane %v1622_v62, 5  ;;  %v1385_v17 = vsel %vm3941_vm14, %v1380_v8, %v1384_v46  ;;  %v1418_v19 = vrot.slane %v1416_v10, 5  ;;  %v1877_v47 = vld [vmem:[#allocation2 + $0x2c] sm:$0x1]  ;;  %v3146_v51 = vld [vmem:[#allocation2 + $0x18] sm:$0xff]  }
 0x107   : > { %v1403_v18 = vor.u32 %v1402_v9, %v1399_v3  ;;  %v1674_v20 = vrot.slane %v1623_v63, 5  ;;  %v1395_v22 = vsel %vm3941_vm14, %v1390_v13, %v1394_v59  ;;  %v2859_v28 = vrot.slane %v1624_v6, 9  ;;  %v2145_v48 = vld [vmem:[#allocation2 + $0x18] sm:$0xe]  ;;  %v2146_v55 = vld [vmem:[#allocation2 + $0x1c] sm:$0xf] }
 0x108   : > { %v1413_v23 = vor.u32 %v1412_v15, %v1408_v14  ;;  %v1672_v24 = vsel %vm3935_vm13, %v2858_v11, %v1671_v16  ;;  %v1673_v25 = vrot.slane %v1671_v16, 4  ;;  %v2850_v26 = vcombine.low %v1385_v17, %v1395_v22  ;;  %v2147_v62 = vld [vmem:[#allocation2 + $0x20] sm:$0x1]  ;;  %v825_v5 = vld [vmem:[#allocation2 + $0x18] sm:$0xf]  ;;  %s3465_s11 = smov 32  }
 0x109   : > { %v1404_v27 = vrot.slane %v1403_v18, 4  ;;  %v1678_v29 = vrot.slane %v1625_v7, 5  ;;  %v1681_v33 = vrot.slane %v1626_v12, 5  ;;  %v1897_v35 = vshrl.u32 %v1872_v21, 16  ;;  %v826_v18 = vld [vmem:[#allocation2 + $0x1c] sm:$0xf] }
 0x10a   : > { %v1414_v31 = vrot.slane %v1413_v23, 4  ;;  %v1675_v32 = vsel %vm3935_vm13, %v1673_v25, %v1674_v20  ;;  %1588 = vrot.lane.b32.xlu0 %v2850_v26, %s3461_s21  ;;  %v1900_v43 = vshll.u32 %v1872_v21, 16  ;;  %v1906_v44 = vshll.u32 %v1873_v30, 16  ;;  %s2950_s18 = sshll.u32 %s3431_s24, 4  ;;  %s2921_s6 = sshll.u32 %s3435_s25, 5 }
 0x10b   : > { %v1409_v36 = vsel %vm3941_vm14, %v1404_v27, %v1408_v14  ;;  %v2866_v37 = vcombine.low %v1672_v24, %v1675_v32  ;;  %v1679_v38 = vsel %vm3935_vm13, %v2859_v28, %v1678_v29  ;;  %v1680_v39 = vrot.slane %v1678_v29, 4  ;;  %v3147_v14 = vld [vmem:[#allocation2 + $0x24] sm:$0xff]   ;;  %v827_v24 = vld [vmem:[#allocation2 + $0x20] sm:$0x1]  ;;  %s2587_s12 = sadd.s32 %s2950_s18, %s2921_s6  ;;  %s2590_s15 = sshll.u32 %s3905_s16, 4  ;;  %s4344_s15 = int_to_ptr.vmem [resolvable:$true] %s2590_s15 }
 0x10c   : > { %v1419_v41 = vsel %vm3941_vm14, %v1414_v31, %v1418_v19  ;;  %v1899_v42 = vrot.slane %v1897_v35, 4  ;;  %v1910_v1 = vshrl.u32 %v1873_v30, 16  ;;  %v1916_v46 = vshll.u32 %v1874_v34, 16  ;;  %v2148_v29 = vld [vmem:[#allocation2 + $0x24] sm:$0xe]  ;;  %s2922_s14 = sshll.u32 %s2587_s12, 7 }
 0x10d   : > { %v2851_v50 = vcombine.low %v1409_v36, %v1419_v41  ;;  %v1682_v57 = vsel %vm3935_vm13, %v1680_v39, %v1681_v33  ;;  %v1902_v52 = vrot.slane %v1900_v43, 5  ;;  %v1908_v53 = vrot.slane %v1906_v44, 5  ;;  %v2149_v34 = vld [vmem:[#allocation2 + $0x28] sm:$0xf]  ;;  %v2150_v35 = vld [vmem:[#allocation2 + $0x2c] sm:$0x1] }
 0x10e   : > { %v2867_v49 = vcombine.low %v1679_v38, %v1682_v57  ;;  %v1921_v54 = vshrl.u32 %v1875_v40, 16  ;;  %1749 = vrot.lane.b32.xlu0 %v2866_v37, %s3462_s7  ;;  %v1912_v56 = vrot.slane %v1910_v1, 4  ;;  %v1918_v58 = vrot.slane %v1916_v46, 5  ;;  %v829_v41 = vld [vmem:[#allocation2 + $0x28] sm:$0xf]  ;;  %v3162_v57 = vld [vmem:[#allocation10] sm:$0xff]  }
 0x10f   : > { %1590 = vrot.lane.b32.xlu1 %v2851_v50, %s3461_s21  ;;  %v1924_v59 = vshll.u32 %v1875_v40, 16  ;;  %v1930_v61 = vshll.u32 %v1876_v45, 16  ;;  %v1903_v63 = vor.u32 %v1902_v52, %v1899_v42  ;;  %v1934_v3 = vshrl.u32 %v1876_v45, 16  ;;  %v828_v40 = vld [vmem:[#allocation2 + $0x24] sm:$0xf]  ;;  %2962 = vmatprep.subr.bf16.mxu0 %v3162_v57  ;;  %p4516_p3 = scmp.ne.s32.totalorder %s4487_s9, 0 }
 0x110   : > { %v1923_v0 = vrot.slane %v1921_v54, 4  ;;  %v1940_v4 = vshll.u32 %v1877_v47, 16  ;;  %v1913_v6 = vor.u32 %v1912_v56, %v1908_v53  ;;  %v2890_v9 = vrot.slane %v2145_v48, 9  ;;  %v830_v50 = vld [vmem:[#allocation2 + $0x2c] sm:$0x1]  ;;  %2984 = vmatprep.subr.bf16.mxu1 %v3162_v57  ;;  %2963 = vmatpush3.bf16.msra.mxu0 %v3162_v57 }
 0x111   : > { %v1926_v7 = vrot.slane %v1924_v59, 5  ;;  %v1932_v8 = vrot.slane %v1930_v61, 5  ;;  %v1904_v10 = vrot.slane %v1903_v63, 4  ;;  %v1936_v11 = vrot.slane %v1934_v3, 4  ;;  %v1101_v59 = vld [vmem:[#allocation2 + $0x18] sm:$0xe]  ;;  %2987 = vmatpush3.bf16.msra.mxu1 %v3162_v57 }
 0x112   : > { %v1942_v12 = vrot.slane %v1940_v4, 5  ;;  %v2195_v13 = vrot.slane %v2146_v55, 5  ;;  %1839 = vrot.lane.b32.xlu0 %v3146_v51, %s3463_s13  ;;  %v1914_v15 = vrot.slane %v1913_v6, 4  ;;  %v2198_v17 = vrot.slane %v2147_v62, 5  ;;  %v1102_v3 = vld [vmem:[#allocation2 + $0x1c] sm:$0xf] }
 0x113   : > { %1751 = vrot.lane.b32.xlu1 %v2867_v49, %s3462_s7  ;;  %v1927_v16 = vor.u32 %v1926_v7, %v1923_v0  ;;  %v895_v19 = vshrl.u32 %v825_v5, 16  ;;  %v1909_v20 = vsel %vm3941_vm14, %v1904_v10, %v1908_v53  ;;  %v1937_v21 = vor.u32 %v1936_v11, %v1932_v8 }
 0x114   : > { %v2196_v22 = vsel %vm3935_vm13, %v2890_v9, %v2195_v13  ;;  %v2197_v23 = vrot.slane %v2195_v13, 4  ;;  %v1919_v25 = vsel %vm3941_vm14, %v1914_v15, %v1918_v58  ;;  %v898_v28 = vshll.u32 %v825_v5, 16  ;;  %v1104_v9 = vld [vmem:[#allocation2 + $0x24] sm:$0xe]  ;;  %v1106_v15 = vld [vmem:[#allocation2 + $0x2c] sm:$0x1] }
 0x115   : > { %v1928_v26 = vrot.slane %v1927_v16, 4  ;;  %v897_v27 = vrot.slane %v895_v19, 4  ;;  %v2882_v30 = vcombine.low %v1909_v20, %v1919_v25  ;;  %v1938_v31 = vrot.slane %v1937_v21, 4  ;;  %v1354_v20 = vld [vmem:[#allocation2 + $0x24] sm:$0xf] }
 0x116   : > { %v2199_v32 = vsel %vm3935_vm13, %v2197_v23, %v2198_v17  ;;  %v904_v33 = vshll.u32 %v826_v18, 16  ;;  %v900_v38 = vrot.slane %v898_v28, 5  ;;  %v908_v39 = vshrl.u32 %v826_v18, 16  ;;  %v1355_v25 = vld [vmem:[#allocation2 + $0x28] sm:$0xf] }
 0x117   : > { %1841 = vrot.lane.b32.xlu1 %v3147_v14, %s3463_s13  ;;  %v1933_v36 = vsel %vm3941_vm14, %v1928_v26, %v1932_v8  ;;  %v2898_v37 = vcombine.low %v2196_v22, %v2199_v32  ;;  %2112 = vrot.lane.b32.xlu0 %v2882_v30, %s3464_s8  ;;  %v1943_v42 = vsel %vm3941_vm14, %v1938_v31, %v1942_v12  ;;  %v914_v44 = vshll.u32 %v827_v24, 16  ;;  %v1103_v8 = vld [vmem:[#allocation2 + $0x20] sm:$0x1]  ;;  %v1105_v14 = vld [vmem:[#allocation2 + $0x28] sm:$0xf] }
 0x118   : > { %v906_v43 = vrot.slane %v904_v33, 5  ;;  %v2891_v45 = vrot.slane %v2148_v29, 9  ;;  %v2883_v1 = vcombine.low %v1933_v36, %v1943_v42  ;;  %v901_v46 = vor.u32 %v900_v38, %v897_v27  ;;  %v1356_v30 = vld [vmem:[#allocation2 + $0x2c] sm:$0x1]  ;;  %v1357_v31 = vld [vmem:[#allocation2 + $0x30] sm:$0xf] }
 0x119   : > { %v910_v47 = vrot.slane %v908_v39, 4  ;;  %v2202_v48 = vrot.slane %v2149_v34, 5  ;;  %v916_v49 = vrot.slane %v914_v44, 5  ;;  %v2205_v51 = vrot.slane %v2150_v35, 5  ;;  %v3164_v32 = vld [vmem:[#allocation10 + $0x8] sm:$0xff]  }
 0x11a   : > { %v919_v52 = vshrl.u32 %v828_v40, 16  ;;  %v922_v53 = vshll.u32 %v828_v40, 16  ;;  %v902_v54 = vrot.slane %v901_v46, 4  ;;  %v928_v63 = vshll.u32 %v829_v41, 16  ;;  %v1359_v42 = vld [vmem:[#allocation2 + $0x38] sm:$0x1]  ;;  %2964 = vmatprep.subr.bf16.mxu0 %v3164_v32  ;;  %2985 = vmatprep.subr.bf16.mxu1 %v3164_v32 }
 0x11b   : > { %2114 = vrot.lane.b32.xlu1 %v2883_v1, %s3464_s8  ;;  %v911_v55 = vor.u32 %v910_v47, %v906_v43  ;;  %v2203_v56 = vsel %vm3935_vm13, %v2891_v45, %v2202_v48  ;;  %v2204_v58 = vrot.slane %v2202_v48, 4  ;;  %2273 = vrot.lane.b32.xlu0 %v2898_v37, %s3465_s11  ;;  %v932_v0 = vshrl.u32 %v829_v41, 16  ;;  %v1358_v37 = vld [vmem:[#allocation2 + $0x34] sm:$0xf]  ;;  %v1627_v48 = vld [vmem:[#allocation2 + $0x24] sm:$0xe] }
 0x11c   : > { %v921_v61 = vrot.slane %v919_v52, 4  ;;  %v924_v62 = vrot.slane %v922_v53, 5  ;;  %v907_v4 = vsel %vm3941_vm14, %v902_v54, %v906_v43  ;;  %v938_v7 = vshll.u32 %v830_v50, 16  ;;  %2965 = vmatpush3.bf16.msra.mxu0 %v3164_v32  ;;  %2988 = vmatpush3.bf16.msra.mxu1 %v3164_v32 }
 0x11d   : > { %v912_v5 = vrot.slane %v911_v55, 4  ;;  %v2206_v6 = vsel %vm3935_vm13, %v2204_v58, %v2205_v51  ;;  %v930_v12 = vrot.slane %v928_v63, 5  ;;  %v934_v13 = vrot.slane %v932_v0, 4  ;;  %v3148_v51 = vld [vmem:[#allocation2 + $0x24] sm:$0xff]  }
 0x11e   : > { %v2899_v10 = vcombine.low %v2203_v56, %v2206_v6  ;;  %v925_v11 = vor.u32 %v924_v62, %v921_v61  ;;  %v940_v17 = vrot.slane %v938_v7, 5  ;;  %v2828_v18 = vrot.slane %v1101_v59, 9  ;;  %v1628_v55 = vld [vmem:[#allocation2 + $0x28] sm:$0xf]  ;;  %v1629_v62 = vld [vmem:[#allocation2 + $0x2c] sm:$0x1] }
 0x11f   : > { %v917_v16 = vsel %vm3941_vm14, %v912_v5, %v916_v49  ;;  %v1162_v19 = vrot.slane %v1102_v3, 5  ;;  %v935_v23 = vor.u32 %v934_v13, %v930_v12  ;;  %v1165_v24 = vrot.slane %v1103_v8, 5  ;;  %v1630_v5 = vld [vmem:[#allocation2 + $0x30] sm:$0xe] }
 0x120   : > { %v2820_v21 = vcombine.low %v907_v4, %v917_v16  ;;  %2275 = vrot.lane.b32.xlu0 %v2899_v10, %s3465_s11  ;;  %v926_v22 = vrot.slane %v925_v11, 4  ;;  %v2829_v28 = vrot.slane %v1104_v9, 9  ;;  %v1169_v29 = vrot.slane %v1105_v14, 5  ;;  %v1631_v10 = vld [vmem:[#allocation2 + $0x34] sm:$0xf] }
 0x121   : > { %v1163_v26 = vsel %vm3935_vm13, %v2828_v18, %v1162_v19  ;;  %v1164_v27 = vrot.slane %v1162_v19, 4  ;;  %v936_v34 = vrot.slane %v935_v23, 4  ;;  %v1172_v35 = vrot.slane %v1106_v15, 5  ;;  %v1632_v15 = vld [vmem:[#allocation2 + $0x38] sm:$0x1]  ;;  %v3149_v16 = vld [vmem:[#allocation2 + $0x30] sm:$0xff]  }
 0x122   : > { %1066 = vrot.lane.b32.xlu1 %v2820_v21, %s3460_s29  ;;  %v931_v33 = vsel %vm3941_vm14, %v926_v22, %v930_v12  ;;  %v1421_v36 = vshrl.u32 %v1354_v20, 16  ;;  %v1170_v39 = vsel %vm3935_vm13, %v2829_v28, %v1169_v29  ;;  %v1171_v40 = vrot.slane %v1169_v29, 4  ;;  %v1878_v21 = vld [vmem:[#allocation2 + $0x30] sm:$0xf] }
 0x123   : > { %v1166_v38 = vsel %vm3935_vm13, %v1164_v27, %v1165_v24  ;;  %v1424_v41 = vshll.u32 %v1354_v20, 16  ;;  %v941_v43 = vsel %vm3941_vm14, %v936_v34, %v940_v17  ;;  %v1430_v50 = vshll.u32 %v1355_v25, 16  ;;  %v1880_v34 = vld [vmem:[#allocation2 + $0x38] sm:$0x1] }
 0x124   : > { %v2836_v44 = vcombine.low %v1163_v26, %v1166_v38  ;;  %v1423_v45 = vrot.slane %v1421_v36, 4  ;;  %v2821_v57 = vcombine.low %v931_v33, %v941_v43  ;;  %v1173_v1 = vsel %vm3935_vm13, %v1171_v40, %v1172_v35  ;;  %v1881_v40 = vld [vmem:[#allocation2 + $0x3c] sm:$0xf] }
 0x125   : > { %v1426_v46 = vrot.slane %v1424_v41, 5  ;;  %v1434_v47 = vshrl.u32 %v1355_v25, 16  ;;  %v2837_v49 = vcombine.low %v1170_v39, %v1173_v1  ;;  %v1432_v52 = vrot.slane %v1430_v50, 5 }
 0x126   : > { %1230 = vrot.lane.b32.xlu0 %v2836_v44, %s3459_s3  ;;  %v1440_v53 = vshll.u32 %v1356_v30, 16  ;;  %v1445_v54 = vshrl.u32 %v1357_v31, 16  ;;  %1068 = vrot.lane.b32.xlu1 %v2821_v57, %s3460_s29  ;;  %v1448_v59 = vshll.u32 %v1357_v31, 16  ;;  %v1454_v61 = vshll.u32 %v1358_v37, 16  ;;  %v1879_v30 = vld [vmem:[#allocation2 + $0x34] sm:$0xf] }
 0x127   : > { %v1427_v56 = vor.u32 %v1426_v46, %v1423_v45  ;;  %v1436_v58 = vrot.slane %v1434_v47, 4  ;;  %v1458_v3 = vshrl.u32 %v1358_v37, 16  ;;  %v1464_v4 = vshll.u32 %v1359_v42, 16  ;;  %v1882_v45 = vld [vmem:[#allocation2 + $0x40] sm:$0xf] }
 0x128   : > { %v1442_v63 = vrot.slane %v1440_v53, 5  ;;  %v1447_v0 = vrot.slane %v1445_v54, 4  ;;  %v1450_v8 = vrot.slane %v1448_v59, 5  ;;  %v1456_v9 = vrot.slane %v1454_v61, 5  ;;  %v1883_v47 = vld [vmem:[#allocation2 + $0x44] sm:$0x1] }
 0x129   : > { %v1428_v6 = vrot.slane %v1427_v56, 4  ;;  %v1437_v7 = vor.u32 %v1436_v58, %v1432_v52  ;;  %v1460_v11 = vrot.slane %v1458_v3, 4  ;;  %v1466_v12 = vrot.slane %v1464_v4, 5  ;;  %v2152_v54 = vld [vmem:[#allocation2 + $0x34] sm:$0xf] }
 0x12a   : > { %1319 = vrot.lane.b32.xlu0 %v3148_v51, %s3458_s1  ;;  %v2860_v13 = vrot.slane %v1627_v48, 9  ;;  %v1685_v14 = vrot.slane %v1628_v55, 5  ;;  %1232 = vrot.lane.b32.xlu1 %v2837_v49, %s3459_s3  ;;  %v1451_v19 = vor.u32 %v1450_v8, %v1447_v0  ;;  %v1688_v20 = vrot.slane %v1629_v62, 5  ;;  %v2151_v48 = vld [vmem:[#allocation2 + $0x30] sm:$0xe] }
 0x12b   : > { %v1433_v17 = vsel %vm3941_vm14, %v1428_v6, %v1432_v52  ;;  %v1438_v18 = vrot.slane %v1437_v7, 4  ;;  %v1461_v22 = vor.u32 %v1460_v11, %v1456_v9  ;;  %v2861_v25 = vrot.slane %v1630_v5, 9  ;;  %v2153_v61 = vld [vmem:[#allocation2 + $0x38] sm:$0x1]  ;;  %v3150_v62 = vld [vmem:[#allocation2 + $0x30] sm:$0xff]  }
 0x12c   : > { %v1686_v23 = vsel %vm3935_vm13, %v2860_v13, %v1685_v14  ;;  %v1687_v24 = vrot.slane %v1685_v14, 4  ;;  %v1452_v27 = vrot.slane %v1451_v19, 4  ;;  %v1692_v28 = vrot.slane %v1631_v10, 5  ;;  %v831_v5 = vld [vmem:[#allocation2 + $0x30] sm:$0xf] }
 0x12d   : > { %v1443_v26 = vsel %vm3941_vm14, %v1438_v18, %v1442_v63  ;;  %v1695_v29 = vrot.slane %v1632_v15, 5  ;;  %v1462_v32 = vrot.slane %v1461_v22, 4  ;;  %v1945_v35 = vshrl.u32 %v1878_v21, 16  ;;  %v832_v14 = vld [vmem:[#allocation2 + $0x34] sm:$0xf]  ;;  %v3151_v15 = vld [vmem:[#allocation2 + $0x3c] sm:$0xff]  }
 0x12e   : > { %v2852_v31 = vcombine.low %v1433_v17, %v1443_v26  ;;  %v1689_v33 = vsel %vm3935_vm13, %v1687_v24, %v1688_v20  ;;  %1321 = vrot.lane.b32.xlu1 %v3149_v16, %s3458_s1  ;;  %v1457_v36 = vsel %vm3941_vm14, %v1452_v27, %v1456_v9  ;;  %v1693_v38 = vsel %vm3935_vm13, %v2861_v25, %v1692_v28  ;;  %v833_v19 = vld [vmem:[#allocation2 + $0x38] sm:$0x1] }
 0x12f   : > { %v2868_v37 = vcombine.low %v1686_v23, %v1689_v33  ;;  %v1694_v39 = vrot.slane %v1692_v28, 4  ;;  %v1467_v41 = vsel %vm3941_vm14, %v1462_v32, %v1466_v12  ;;  %v1947_v42 = vrot.slane %v1945_v35, 4 }
 0x130   : > { %1592 = vrot.lane.b32.xlu0 %v2852_v31, %s3461_s21  ;;  %v1948_v43 = vshll.u32 %v1878_v21, 16  ;;  %v1954_v44 = vshll.u32 %v1879_v30, 16  ;;  %v2853_v50 = vcombine.low %v1457_v36, %v1467_v41  ;;  %v1958_v1 = vshrl.u32 %v1879_v30, 16  ;;  %v2154_v21 = vld [vmem:[#allocation2 + $0x3c] sm:$0xe] }
 0x131   : > { %v1696_v57 = vsel %vm3935_vm13, %v1694_v39, %v1695_v29  ;;  %v1964_v46 = vshll.u32 %v1880_v34, 16  ;;  %v1969_v53 = vshrl.u32 %v1881_v40, 16  ;;  %v1972_v58 = vshll.u32 %v1881_v40, 16  ;;  %v2155_v34 = vld [vmem:[#allocation2 + $0x40] sm:$0xf] }
 0x132   : > { %v2869_v49 = vcombine.low %v1693_v38, %v1696_v57  ;;  %v1950_v51 = vrot.slane %v1948_v43, 5  ;;  %v1956_v52 = vrot.slane %v1954_v44, 5  ;;  %1594 = vrot.lane.b32.xlu1 %v2853_v50, %s3461_s21  ;;  %v1960_v55 = vrot.slane %v1958_v1, 4  ;;  %v2156_v39 = vld [vmem:[#allocation2 + $0x44] sm:$0x1] }
 0x133   : > { %v1966_v56 = vrot.slane %v1964_v46, 5  ;;  %v1978_v59 = vshll.u32 %v1882_v45, 16  ;;  %v1971_v0 = vrot.slane %v1969_v53, 4  ;;  %v1982_v3 = vshrl.u32 %v1882_v45, 16  ;;  %v834_v40 = vld [vmem:[#allocation2 + $0x3c] sm:$0xf] }
 0x134   : > { %1753 = vrot.lane.b32.xlu0 %v2868_v37, %s3462_s7  ;;  %v1951_v63 = vor.u32 %v1950_v51, %v1947_v42  ;;  %v1988_v4 = vshll.u32 %v1883_v47, 16  ;;  %v1961_v6 = vor.u32 %v1960_v55, %v1956_v52  ;;  %v1974_v7 = vrot.slane %v1972_v58, 5  ;;  %v835_v46 = vld [vmem:[#allocation2 + $0x40] sm:$0xf]  ;;  %v836_v47 = vld [vmem:[#allocation2 + $0x44] sm:$0x1] }
 0x135   : > { %v1980_v8 = vrot.slane %v1978_v59, 5  ;;  %v2892_v9 = vrot.slane %v2151_v48, 9  ;;  %v1984_v11 = vrot.slane %v1982_v3, 4  ;;  %v2209_v13 = vrot.slane %v2152_v54, 5  ;;  %v1107_v53 = vld [vmem:[#allocation2 + $0x30] sm:$0xe] }
 0x136   : > { %v1952_v10 = vrot.slane %v1951_v63, 4  ;;  %v1990_v12 = vrot.slane %v1988_v4, 5  ;;  %1755 = vrot.lane.b32.xlu1 %v2869_v49, %s3462_s7  ;;  %v1962_v16 = vrot.slane %v1961_v6, 4  ;;  %v1975_v17 = vor.u32 %v1974_v7, %v1971_v0  ;;  %v1108_v59 = vld [vmem:[#allocation2 + $0x34] sm:$0xf] }
 0x137   : > { %v2212_v18 = vrot.slane %v2153_v61, 5  ;;  %v943_v20 = vshrl.u32 %v831_v5, 16  ;;  %v1985_v23 = vor.u32 %v1984_v11, %v1980_v8  ;;  %v2210_v24 = vsel %vm3935_vm13, %v2892_v9, %v2209_v13  ;;  %v1109_v61 = vld [vmem:[#allocation2 + $0x38] sm:$0x1]  ;;  %v1110_v4 = vld [vmem:[#allocation2 + $0x3c] sm:$0xe] }
 0x138   : > { %1843 = vrot.lane.b32.xlu0 %v3150_v62, %s3463_s13  ;;  %v1957_v22 = vsel %vm3941_vm14, %v1952_v10, %v1956_v52  ;;  %v2211_v25 = vrot.slane %v2209_v13, 4  ;;  %v1967_v26 = vsel %vm3941_vm14, %v1962_v16, %v1966_v56  ;;  %v1976_v27 = vrot.slane %v1975_v17, 4  ;;  %v1112_v10 = vld [vmem:[#allocation2 + $0x44] sm:$0x1]  ;;  %v1360_v11 = vld [vmem:[#allocation2 + $0x3c] sm:$0xf] }
 0x139   : > { %v945_v28 = vrot.slane %v943_v20, 4  ;;  %v946_v29 = vshll.u32 %v831_v5, 16  ;;  %v2884_v30 = vcombine.low %v1957_v22, %v1967_v26  ;;  %v1986_v31 = vrot.slane %v1985_v23, 4  ;;  %v1111_v5 = vld [vmem:[#allocation2 + $0x40] sm:$0xf] }
 0x13a   : > { %v2213_v32 = vsel %vm3935_vm13, %v2211_v25, %v2212_v18  ;;  %v952_v33 = vshll.u32 %v832_v14, 16  ;;  %1845 = vrot.lane.b32.xlu1 %v3151_v15, %s3463_s13  ;;  %v1981_v35 = vsel %vm3941_vm14, %v1976_v27, %v1980_v8  ;;  %v956_v38 = vshrl.u32 %v832_v14, 16 }
 0x13b   : > { %v2900_v36 = vcombine.low %v2210_v24, %v2213_v32  ;;  %v948_v37 = vrot.slane %v946_v29, 5  ;;  %v1991_v41 = vsel %vm3941_vm14, %v1986_v31, %v1990_v12  ;;  %v962_v43 = vshll.u32 %v833_v19, 16 }
 0x13c   : > { %2116 = vrot.lane.b32.xlu0 %v2884_v30, %s3464_s8  ;;  %v954_v42 = vrot.slane %v952_v33, 5  ;;  %v2893_v44 = vrot.slane %v2154_v21, 9  ;;  %v2885_v45 = vcombine.low %v1981_v35, %v1991_v41  ;;  %v958_v57 = vrot.slane %v956_v38, 4  ;;  %v1363_v38 = vld [vmem:[#allocation2 + $0x48] sm:$0xf] }
 0x13d   : > { %v949_v50 = vor.u32 %v948_v37, %v945_v28  ;;  %v2216_v1 = vrot.slane %v2155_v34, 5  ;;  %v964_v48 = vrot.slane %v962_v43, 5  ;;  %v2219_v49 = vrot.slane %v2156_v39, 5  ;;  %v1361_v28 = vld [vmem:[#allocation2 + $0x40] sm:$0xf] }
 0x13e   : > { %v967_v51 = vshrl.u32 %v834_v40, 16  ;;  %v970_v52 = vshll.u32 %v834_v40, 16  ;;  %2118 = vrot.lane.b32.xlu1 %v2885_v45, %s3464_s8  ;;  %v959_v55 = vor.u32 %v958_v57, %v954_v42  ;;  %v976_v0 = vshll.u32 %v835_v46, 16  ;;  %v1364_v43 = vld [vmem:[#allocation2 + $0x4c] sm:$0xf] }
 0x13f   : > { %v950_v54 = vrot.slane %v949_v50, 4  ;;  %v2217_v56 = vsel %vm3935_vm13, %v2893_v44, %v2216_v1  ;;  %v2218_v58 = vrot.slane %v2216_v1, 4  ;;  %v980_v3 = vshrl.u32 %v835_v46, 16  ;;  %v1365_v1 = vld [vmem:[#allocation2 + $0x50] sm:$0x1] }
 0x140   : > { %2277 = vrot.lane.b32.xlu0 %v2900_v36, %s3465_s11  ;;  %v969_v62 = vrot.slane %v967_v51, 4  ;;  %v972_v63 = vrot.slane %v970_v52, 5  ;;  %v960_v7 = vrot.slane %v959_v55, 4  ;;  %v986_v9 = vshll.u32 %v836_v47, 16  ;;  %v1362_v36 = vld [vmem:[#allocation2 + $0x44] sm:$0x1] }
 0x141   : > { %v955_v6 = vsel %vm3941_vm14, %v950_v54, %v954_v42  ;;  %v2220_v8 = vsel %vm3935_vm13, %v2218_v58, %v2219_v49  ;;  %v978_v14 = vrot.slane %v976_v0, 5  ;;  %v982_v15 = vrot.slane %v980_v3, 4  ;;  %v1633_v46 = vld [vmem:[#allocation2 + $0x3c] sm:$0xe]  ;;  %v1636_v3 = vld [vmem:[#allocation2 + $0x48] sm:$0xe] }
 0x142   : > { %v2901_v12 = vcombine.low %v2217_v56, %v2220_v8  ;;  %v973_v13 = vor.u32 %v972_v63, %v969_v62  ;;  %v965_v16 = vsel %vm3941_vm14, %v960_v7, %v964_v48  ;;  %v988_v17 = vrot.slane %v986_v9, 5  ;;  %v3152_v48 = vld [vmem:[#allocation2 + $0x3c] sm:$0xff]   ;;  %v1637_v8 = vld [vmem:[#allocation2 + $0x4c] sm:$0xf] }
 0x143   : > { %v2830_v18 = vrot.slane %v1107_v53, 9  ;;  %v1176_v19 = vrot.slane %v1108_v59, 5  ;;  %v2822_v20 = vcombine.low %v955_v6, %v965_v16  ;;  %v983_v22 = vor.u32 %v982_v15, %v978_v14  ;;  %v1634_v53 = vld [vmem:[#allocation2 + $0x40] sm:$0xf]  ;;  %v1635_v59 = vld [vmem:[#allocation2 + $0x44] sm:$0x1] }
 0x144   : > { %2279 = vrot.lane.b32.xlu0 %v2901_v12, %s3465_s11  ;;  %v974_v21 = vrot.slane %v973_v13, 4  ;;  %v1179_v23 = vrot.slane %v1109_v61, 5  ;;  %v2831_v26 = vrot.slane %v1110_v4, 9  ;;  %v1183_v27 = vrot.slane %v1111_v5, 5  ;;  %v1638_v13 = vld [vmem:[#allocation2 + $0x50] sm:$0x1] }
 0x145   : > { %v1177_v24 = vsel %vm3935_vm13, %v2830_v18, %v1176_v19  ;;  %v1178_v25 = vrot.slane %v1176_v19, 4  ;;  %1070 = vrot.lane.b32.xlu1 %v2822_v20, %s3460_s29  ;;  %v984_v30 = vrot.slane %v983_v22, 4  ;;  %v1186_v31 = vrot.slane %v1112_v10, 5  ;;  %v1884_v19 = vld [vmem:[#allocation2 + $0x48] sm:$0xf] }
 0x146   : > { %v979_v29 = vsel %vm3941_vm14, %v974_v21, %v978_v14  ;;  %v1469_v32 = vshrl.u32 %v1360_v11, 16  ;;  %v1184_v34 = vsel %vm3935_vm13, %v2831_v26, %v1183_v27  ;;  %v1185_v35 = vrot.slane %v1183_v27, 4  ;;  %v3153_v14 = vld [vmem:[#allocation2 + $0x48] sm:$0xff]  }
 0x147   : > { %v1180_v33 = vsel %vm3935_vm13, %v1178_v25, %v1179_v23  ;;  %v1472_v37 = vshll.u32 %v1360_v11, 16  ;;  %v989_v39 = vsel %vm3941_vm14, %v984_v30, %v988_v17  ;;  %v1478_v42 = vshll.u32 %v1361_v28, 16 }
 0x148   : > { %v2838_v40 = vcombine.low %v1177_v24, %v1180_v33  ;;  %v1471_v41 = vrot.slane %v1469_v32, 4  ;;  %v2823_v44 = vcombine.low %v979_v29, %v989_v39  ;;  %v1187_v45 = vsel %vm3935_vm13, %v1185_v35, %v1186_v31  ;;  %v1886_v32 = vld [vmem:[#allocation2 + $0x50] sm:$0x1]  ;;  %v1888_v39 = vld [vmem:[#allocation2 + $0x58] sm:$0xf] }
 0x149   : > { %v1474_v50 = vrot.slane %v1472_v37, 5  ;;  %v1482_v57 = vshrl.u32 %v1361_v28, 16  ;;  %v2839_v47 = vcombine.low %v1184_v34, %v1187_v45  ;;  %v1480_v49 = vrot.slane %v1478_v42, 5  ;;  %v1885_v28 = vld [vmem:[#allocation2 + $0x4c] sm:$0xf] }
 0x14a   : > { %1234 = vrot.lane.b32.xlu0 %v2838_v40, %s3459_s3  ;;  %v1488_v51 = vshll.u32 %v1362_v36, 16  ;;  %v1493_v52 = vshrl.u32 %v1363_v38, 16  ;;  %1072 = vrot.lane.b32.xlu1 %v2823_v44, %s3460_s29  ;;  %v1496_v56 = vshll.u32 %v1363_v38, 16  ;;  %v1502_v58 = vshll.u32 %v1364_v43, 16  ;;  %v1887_v34 = vld [vmem:[#allocation2 + $0x54] sm:$0xf] }
 0x14b   : > { %v1475_v54 = vor.u32 %v1474_v50, %v1471_v41  ;;  %v1484_v55 = vrot.slane %v1482_v57, 4  ;;  %v1506_v63 = vshrl.u32 %v1364_v43, 16  ;;  %v1512_v0 = vshll.u32 %v1365_v1, 16  ;;  %v1889_v40 = vld [vmem:[#allocation2 + $0x5c] sm:$0x1] }
 0x14c   : > { %v1490_v61 = vrot.slane %v1488_v51, 5  ;;  %v1495_v62 = vrot.slane %v1493_v52, 4  ;;  %v1498_v6 = vrot.slane %v1496_v56, 5  ;;  %v1504_v7 = vrot.slane %v1502_v58, 5  ;;  %v2157_v45 = vld [vmem:[#allocation2 + $0x48] sm:$0xe] }
 0x14d   : > { %v1476_v4 = vrot.slane %v1475_v54, 4  ;;  %v1485_v5 = vor.u32 %v1484_v55, %v1480_v49  ;;  %v1508_v9 = vrot.slane %v1506_v63, 4  ;;  %v1514_v10 = vrot.slane %v1512_v0, 5 }
 0x14e   : > { %1323 = vrot.lane.b32.xlu0 %v3152_v48, %s3458_s1  ;;  %v2862_v11 = vrot.slane %v1633_v46, 9  ;;  %v1699_v12 = vrot.slane %v1634_v53, 5  ;;  %1236 = vrot.lane.b32.xlu1 %v2839_v47, %s3459_s3  ;;  %v1499_v17 = vor.u32 %v1498_v6, %v1495_v62  ;;  %v1702_v18 = vrot.slane %v1635_v59, 5  ;;  %v2158_v47 = vld [vmem:[#allocation2 + $0x4c] sm:$0xf] }
 0x14f   : > { %v1481_v15 = vsel %vm3941_vm14, %v1476_v4, %v1480_v49  ;;  %v1486_v16 = vrot.slane %v1485_v5, 4  ;;  %v1509_v20 = vor.u32 %v1508_v9, %v1504_v7  ;;  %v2863_v23 = vrot.slane %v1636_v3, 9  ;;  %v2159_v53 = vld [vmem:[#allocation2 + $0x50] sm:$0x1]  ;;  %v3154_v59 = vld [vmem:[#allocation2 + $0x48] sm:$0xff]  }
 0x150   : > { %v1700_v21 = vsel %vm3935_vm13, %v2862_v11, %v1699_v12  ;;  %v1701_v22 = vrot.slane %v1699_v12, 4  ;;  %v1500_v25 = vrot.slane %v1499_v17, 4  ;;  %v1706_v26 = vrot.slane %v1637_v8, 5  ;;  %v837_v3 = vld [vmem:[#allocation2 + $0x48] sm:$0xf]  ;;  %v3155_v12 = vld [vmem:[#allocation2 + $0x54] sm:$0xff]  }
 0x151   : > { %v1491_v24 = vsel %vm3941_vm14, %v1486_v16, %v1490_v61  ;;  %v1709_v27 = vrot.slane %v1638_v13, 5  ;;  %v1510_v30 = vrot.slane %v1509_v20, 4  ;;  %v1993_v33 = vshrl.u32 %v1884_v19, 16  ;;  %v838_v16 = vld [vmem:[#allocation2 + $0x4c] sm:$0xf] }
 0x152   : > { %v2854_v29 = vcombine.low %v1481_v15, %v1491_v24  ;;  %v1703_v31 = vsel %vm3935_vm13, %v1701_v22, %v1702_v18  ;;  %1325 = vrot.lane.b32.xlu1 %v3153_v14, %s3458_s1  ;;  %v1505_v35 = vsel %vm3941_vm14, %v1500_v25, %v1504_v7  ;;  %v1707_v37 = vsel %vm3935_vm13, %v2863_v23, %v1706_v26  ;;  %v839_v22 = vld [vmem:[#allocation2 + $0x50] sm:$0x1] }
 0x153   : > { %v2870_v36 = vcombine.low %v1700_v21, %v1703_v31  ;;  %v1708_v38 = vrot.slane %v1706_v26, 4  ;;  %v1515_v41 = vsel %vm3941_vm14, %v1510_v30, %v1514_v10  ;;  %v1995_v42 = vrot.slane %v1993_v33, 4  ;;  %v2162_v33 = vld [vmem:[#allocation2 + $0x5c] sm:$0x1] }
 0x154   : > { %1596 = vrot.lane.b32.xlu0 %v2854_v29, %s3461_s21  ;;  %v1996_v43 = vshll.u32 %v1884_v19, 16  ;;  %v2002_v44 = vshll.u32 %v1885_v28, 16  ;;  %v2855_v50 = vcombine.low %v1505_v35, %v1515_v41  ;;  %v2006_v1 = vshrl.u32 %v1885_v28, 16 }
 0x155   : > { %v1710_v57 = vsel %vm3935_vm13, %v1708_v38, %v1709_v27  ;;  %v2012_v46 = vshll.u32 %v1886_v32, 16  ;;  %v2017_v52 = vshrl.u32 %v1887_v34, 16  ;;  %v2020_v56 = vshll.u32 %v1887_v34, 16  ;;  %v2160_v27 = vld [vmem:[#allocation2 + $0x54] sm:$0xe] }
 0x156   : > { %v2871_v48 = vcombine.low %v1707_v37, %v1710_v57  ;;  %v1998_v49 = vrot.slane %v1996_v43, 5  ;;  %v2004_v51 = vrot.slane %v2002_v44, 5  ;;  %1598 = vrot.lane.b32.xlu1 %v2855_v50, %s3461_s21  ;;  %v2008_v54 = vrot.slane %v2006_v1, 4  ;;  %v2161_v32 = vld [vmem:[#allocation2 + $0x58] sm:$0xf] }
 0x157   : > { %v2014_v55 = vrot.slane %v2012_v46, 5  ;;  %v2026_v58 = vshll.u32 %v1888_v39, 16  ;;  %v2019_v62 = vrot.slane %v2017_v52, 4  ;;  %v2030_v63 = vshrl.u32 %v1888_v39, 16  ;;  %v840_v38 = vld [vmem:[#allocation2 + $0x54] sm:$0xf] }
 0x158   : > { %1757 = vrot.lane.b32.xlu0 %v2870_v36, %s3462_s7  ;;  %v1999_v61 = vor.u32 %v1998_v49, %v1995_v42  ;;  %v2036_v0 = vshll.u32 %v1889_v40, 16  ;;  %v2009_v4 = vor.u32 %v2008_v54, %v2004_v51  ;;  %v2022_v5 = vrot.slane %v2020_v56, 5  ;;  %v841_v39 = vld [vmem:[#allocation2 + $0x58] sm:$0xf]  ;;  %v842_v44 = vld [vmem:[#allocation2 + $0x5c] sm:$0x1] }
 0x159   : > { %v2028_v6 = vrot.slane %v2026_v58, 5  ;;  %v2894_v7 = vrot.slane %v2157_v45, 9  ;;  %v2032_v9 = vrot.slane %v2030_v63, 4  ;;  %v2223_v11 = vrot.slane %v2158_v47, 5  ;;  %v1114_v52 = vld [vmem:[#allocation2 + $0x4c] sm:$0xf] }
 0x15a   : > { %v2000_v8 = vrot.slane %v1999_v61, 4  ;;  %v2038_v10 = vrot.slane %v2036_v0, 5  ;;  %1759 = vrot.lane.b32.xlu1 %v2871_v48, %s3462_s7  ;;  %v2010_v13 = vrot.slane %v2009_v4, 4  ;;  %v2023_v14 = vor.u32 %v2022_v5, %v2019_v62  ;;  %v1115_v5 = vld [vmem:[#allocation2 + $0x50] sm:$0x1] }
 0x15b   : > { %v2226_v15 = vrot.slane %v2159_v53, 5  ;;  %v991_v17 = vshrl.u32 %v837_v3, 16  ;;  %v2033_v19 = vor.u32 %v2032_v9, %v2028_v6  ;;  %v2224_v20 = vsel %vm3935_vm13, %v2894_v7, %v2223_v11 }
 0x15c   : > { %1847 = vrot.lane.b32.xlu0 %v3154_v59, %s3463_s13  ;;  %v2005_v18 = vsel %vm3941_vm14, %v2000_v8, %v2004_v51  ;;  %v2225_v21 = vrot.slane %v2223_v11, 4  ;;  %v2015_v23 = vsel %vm3941_vm14, %v2010_v13, %v2014_v55  ;;  %v2024_v24 = vrot.slane %v2023_v14, 4  ;;  %v1113_v51 = vld [vmem:[#allocation2 + $0x48] sm:$0xe]  ;;  %v1117_v11 = vld [vmem:[#allocation2 + $0x58] sm:$0xf] }
 0x15d   : > { %v993_v25 = vrot.slane %v991_v17, 4  ;;  %v994_v26 = vshll.u32 %v837_v3, 16  ;;  %v2886_v28 = vcombine.low %v2005_v18, %v2015_v23  ;;  %v2034_v29 = vrot.slane %v2033_v19, 4  ;;  %v1366_v17 = vld [vmem:[#allocation2 + $0x54] sm:$0xf] }
 0x15e   : > { %v2227_v30 = vsel %vm3935_vm13, %v2225_v21, %v2226_v15  ;;  %v1000_v31 = vshll.u32 %v838_v16, 16  ;;  %1849 = vrot.lane.b32.xlu1 %v3155_v12, %s3463_s13  ;;  %v2029_v34 = vsel %vm3941_vm14, %v2024_v24, %v2028_v6  ;;  %v1004_v37 = vshrl.u32 %v838_v16, 16  ;;  %v1116_v6 = vld [vmem:[#allocation2 + $0x54] sm:$0xe]  ;;  %v1118_v12 = vld [vmem:[#allocation2 + $0x5c] sm:$0x1] }
 0x15f   : > { %v2902_v35 = vcombine.low %v2224_v20, %v2227_v30  ;;  %v996_v36 = vrot.slane %v994_v26, 5  ;;  %v2039_v40 = vsel %vm3941_vm14, %v2034_v29, %v2038_v10  ;;  %v1010_v42 = vshll.u32 %v839_v22, 16  ;;  %v1367_v22 = vld [vmem:[#allocation2 + $0x58] sm:$0xf] }
 0x160   : > { %2120 = vrot.lane.b32.xlu0 %v2886_v28, %s3464_s8  ;;  %v1002_v41 = vrot.slane %v1000_v31, 5  ;;  %v2895_v43 = vrot.slane %v2160_v27, 9  ;;  %v2887_v45 = vcombine.low %v2029_v34, %v2039_v40  ;;  %v1006_v57 = vrot.slane %v1004_v37, 4  ;;  %v1368_v34 = vld [vmem:[#allocation2 + $0x5c] sm:$0x1] }
 0x161   : > { %v997_v50 = vor.u32 %v996_v36, %v993_v25  ;;  %v2230_v1 = vrot.slane %v2161_v32, 5  ;;  %v1012_v46 = vrot.slane %v1010_v42, 5  ;;  %v2233_v47 = vrot.slane %v2162_v33, 5  ;;  %v1369_v36 = vld [vmem:[#allocation2 + $0x60] sm:$0xf] }
 0x162   : > { %v1015_v48 = vshrl.u32 %v840_v38, 16  ;;  %v1018_v49 = vshll.u32 %v840_v38, 16  ;;  %2122 = vrot.lane.b32.xlu1 %v2887_v45, %s3464_s8  ;;  %v1007_v54 = vor.u32 %v1006_v57, %v1002_v41  ;;  %v1024_v61 = vshll.u32 %v841_v39, 16  ;;  %v1370_v42 = vld [vmem:[#allocation2 + $0x64] sm:$0xf] }
 0x163   : > { %v998_v53 = vrot.slane %v997_v50, 4  ;;  %v2231_v55 = vsel %vm3935_vm13, %v2895_v43, %v2230_v1  ;;  %v2232_v56 = vrot.slane %v2230_v1, 4  ;;  %v1028_v62 = vshrl.u32 %v841_v39, 16  ;;  %v1371_v43 = vld [vmem:[#allocation2 + $0x68] sm:$0x1] }
 0x164   : > { %2281 = vrot.lane.b32.xlu0 %v2902_v35, %s3465_s11  ;;  %v1017_v58 = vrot.slane %v1015_v48, 4  ;;  %v1020_v59 = vrot.slane %v1018_v49, 5  ;;  %v1008_v0 = vrot.slane %v1007_v54, 4  ;;  %v1034_v4 = vshll.u32 %v842_v44, 16  ;;  %v4148_v37 = vpop.permute.xlu0 %1315  ;;  %v4152_v44 = vpop.permute.xlu1 %1317  ;;  %v3156_v49 = vld [vmem:[#allocation2 + $0x54] sm:$0xff]  }
 0x165   : > { %v1003_v63 = vsel %vm3941_vm14, %v998_v53, %v1002_v41  ;;  %v2234_v3 = vsel %vm3935_vm13, %v2232_v56, %v2233_v47  ;;  %v1026_v9 = vrot.slane %v1024_v61, 5  ;;  %v1030_v10 = vrot.slane %v1028_v62, 4  ;;  %v1640_v47 = vld [vmem:[#allocation2 + $0x58] sm:$0xf]  ;;  %v1641_v54 = vld [vmem:[#allocation2 + $0x5c] sm:$0x1] }
 0x166   : > { %v2903_v7 = vcombine.low %v2231_v55, %v2234_v3  ;;  %v1021_v8 = vor.u32 %v1020_v59, %v1017_v58  ;;  %v1013_v13 = vsel %vm3941_vm14, %v1008_v0, %v1012_v46  ;;  %v1036_v14 = vrot.slane %v1034_v4, 5  ;;  %v1639_v46 = vld [vmem:[#allocation2 + $0x54] sm:$0xe]  ;;  %v1642_v61 = vld [vmem:[#allocation2 + $0x60] sm:$0xe] }
 0x167   : > { %v2832_v15 = vrot.slane %v1113_v51, 9  ;;  %v1190_v16 = vrot.slane %v1114_v52, 5  ;;  %v2824_v18 = vcombine.low %v1003_v63, %v1013_v13  ;;  %v1031_v20 = vor.u32 %v1030_v10, %v1026_v9  ;;  %v1643_v4 = vld [vmem:[#allocation2 + $0x64] sm:$0xf] }
 0x168   : > { %2283 = vrot.lane.b32.xlu0 %v2903_v7, %s3465_s11  ;;  %v1022_v19 = vrot.slane %v1021_v8, 4  ;;  %v1193_v21 = vrot.slane %v1115_v5, 5  ;;  %v2833_v25 = vrot.slane %v1116_v6, 9  ;;  %v1197_v26 = vrot.slane %v1117_v11, 5  ;;  %v1644_v5 = vld [vmem:[#allocation2 + $0x68] sm:$0x1] }
 0x169   : > { %v1191_v23 = vsel %vm3935_vm13, %v2832_v15, %v1190_v16  ;;  %v1192_v24 = vrot.slane %v1190_v16, 4  ;;  %1074 = vrot.lane.b32.xlu1 %v2824_v18, %s3460_s29  ;;  %v1032_v28 = vrot.slane %v1031_v20, 4  ;;  %v1200_v29 = vrot.slane %v1118_v12, 5  ;;  %v3157_v6 = vld [vmem:[#allocation2 + $0x60] sm:$0xff]  }
 0x16a   : > { %v1027_v27 = vsel %vm3941_vm14, %v1022_v19, %v1026_v9  ;;  %v1517_v30 = vshrl.u32 %v1366_v17, 16  ;;  %v1198_v32 = vsel %vm3935_vm13, %v2833_v25, %v1197_v26  ;;  %v1199_v33 = vrot.slane %v1197_v26, 4  ;;  %v3165_v25 = vld [vmem:[#allocation2 + $0x24] sm:$0xff]   ;;  %v3167_v26 = vld [vmem:[#allocation2 + $0x30] sm:$0xff]  }
 0x16b   : > { %v1194_v31 = vsel %vm3935_vm13, %v1192_v24, %v1193_v21  ;;  %v1520_v35 = vshll.u32 %v1366_v17, 16  ;;  %v1037_v38 = vsel %vm3941_vm14, %v1032_v28, %v1036_v14  ;;  %v1526_v41 = vshll.u32 %v1367_v22, 16  ;;  %v3160_v21 = vld [vmem:[#allocation2] sm:$0xff]   ;;  %v3163_v24 = vld [vmem:[#allocation2 + $0x18] sm:$0xff]   ;;  %v3169_v28 = vld [vmem:[#allocation2 + $0x48] sm:$0xff]  }
 0x16c   : > { %v2840_v39 = vcombine.low %v1191_v23, %v1194_v31  ;;  %v1519_v40 = vrot.slane %v1517_v30, 4  ;;  %v2825_v45 = vcombine.low %v1027_v27, %v1037_v38  ;;  %v1201_v50 = vsel %vm3935_vm13, %v1199_v33, %v1200_v29  ;;  %v3161_v23 = vld [vmem:[#allocation2 + $0xc] sm:$0xff]   ;;  %v3168_v27 = vld [vmem:[#allocation2 + $0x3c] sm:$0xff]   ;;  %v1891_v33 = vld [vmem:[#allocation2 + $0x64] sm:$0xf] }
 0x16d   : > { %v1522_v57 = vrot.slane %v1520_v35, 5  ;;  %v1530_v1 = vshrl.u32 %v1367_v22, 16  ;;  %v2841_v48 = vcombine.low %v1198_v32, %v1201_v50  ;;  %v1528_v51 = vrot.slane %v1526_v41, 5  ;;  %v1890_v22 = vld [vmem:[#allocation2 + $0x60] sm:$0xf] }
 0x16e   : > { %1238 = vrot.lane.b32.xlu0 %v2840_v39, %s3459_s3  ;;  %v1536_v52 = vshll.u32 %v1368_v34, 16  ;;  %v1541_v53 = vshrl.u32 %v1369_v36, 16  ;;  %1076 = vrot.lane.b32.xlu1 %v2825_v45, %s3460_s29  ;;  %v1544_v58 = vshll.u32 %v1369_v36, 16  ;;  %v1550_v59 = vshll.u32 %v1370_v42, 16  ;;  %v1892_v39 = vld [vmem:[#allocation2 + $0x68] sm:$0x1] }
 0x16f   : > { %v1523_v55 = vor.u32 %v1522_v57, %v1519_v40  ;;  %v1532_v56 = vrot.slane %v1530_v1, 4  ;;  %v1554_v0 = vshrl.u32 %v1370_v42, 16  ;;  %v1560_v3 = vshll.u32 %v1371_v43, 16  ;;  %v4161_v16 = vpop.permute.xlu1 %1226  ;;  %v3170_v40 = vld [vmem:[#allocation2 + $0x54] sm:$0xff]   ;;  %v1893_v45 = vld [vmem:[#allocation2 + $0x6c] sm:$0xf] }
 0x170   : > { %v1538_v62 = vrot.slane %v1536_v52, 5  ;;  %v1543_v63 = vrot.slane %v1541_v53, 4  ;;  %v1546_v9 = vrot.slane %v1544_v58, 5  ;;  %v1552_v10 = vrot.slane %v1550_v59, 5  ;;  %v1895_v52 = vld [vmem:[#allocation2 + $0x74] sm:$0x1] }
 0x171   : > { %v1524_v7 = vrot.slane %v1523_v55, 4  ;;  %v1533_v8 = vor.u32 %v1532_v56, %v1528_v51  ;;  %v4158_v11 = vpop.permute.xlu0 %1062  ;;  %v1556_v12 = vrot.slane %v1554_v0, 4  ;;  %v1562_v13 = vrot.slane %v1560_v3, 5  ;;  %v2163_v3 = vld [vmem:[#allocation2 + $0x60] sm:$0xe]  ;;  %s4515_s29 = sld [smem:[#allocation26_spill]] }
 0x172   : > { %1327 = vrot.lane.b32.xlu0 %v3156_v49, %s3458_s1  ;;  %v2864_v14 = vrot.slane %v1639_v46, 9  ;;  %v1713_v15 = vrot.slane %v1640_v47, 5  ;;  %1240 = vrot.lane.b32.xlu1 %v2841_v48, %s3459_s3  ;;  %v1547_v19 = vor.u32 %v1546_v9, %v1543_v63  ;;  %v1716_v20 = vrot.slane %v1641_v54, 5  ;;  %v1894_v47 = vld [vmem:[#allocation2 + $0x70] sm:$0xf] }
 0x173   : > { %v1529_v17 = vsel %vm3941_vm14, %v1524_v7, %v1528_v51  ;;  %v1534_v18 = vrot.slane %v1533_v8, 4  ;;  %v1557_v29 = vor.u32 %v1556_v12, %v1552_v10  ;;  %v2865_v32 = vrot.slane %v1642_v61, 9  ;;  %v3158_v61 = vld [vmem:[#allocation2 + $0x60] sm:$0xff]  }
 0x174   : > { %v1714_v30 = vsel %vm3935_vm13, %v2864_v14, %v1713_v15  ;;  %v1715_v31 = vrot.slane %v1713_v15, 4  ;;  %v1548_v35 = vrot.slane %v1547_v19, 4  ;;  %v1720_v36 = vrot.slane %v1643_v4, 5  ;;  %v2164_v8 = vld [vmem:[#allocation2 + $0x64] sm:$0xf] }
 0x175   : > { %v1539_v34 = vsel %vm3941_vm14, %v1534_v18, %v1538_v62  ;;  %v1723_v38 = vrot.slane %v1644_v5, 5  ;;  %v1558_v42 = vrot.slane %v1557_v29, 4  ;;  %vm1086_vm15 = vcmask 64544   ;;  %v2166_v19 = vld [vmem:[#allocation2 + $0x6c] sm:$0xe] }
 0x176   : > { %v2856_v41 = vcombine.low %v1529_v17, %v1539_v34  ;;  %v1717_v43 = vsel %vm3935_vm13, %v1715_v31, %v1716_v20  ;;  %1329 = vrot.lane.b32.xlu1 %v3157_v6, %s3458_s1  ;;  %v1553_v50 = vsel %vm3941_vm14, %v1548_v35, %v1552_v10  ;;  %v1721_v1 = vsel %vm3935_vm13, %v2865_v32, %v1720_v36  ;;  %v1065_v48 = vpop.permute.xlu0 %1064  ;;  %v1229_v53 = vpop.permute.xlu1 %1228 }
 0x177   : > { %v2872_v57 = vcombine.low %v1714_v30, %v1717_v43  ;;  %v1722_v46 = vrot.slane %v1720_v36, 4  ;;  %v1563_v49 = vsel %vm3941_vm14, %v1558_v42, %v1562_v13  ;;  %vm810_vm1 = vcmask 31744   ;;  %v2165_v13 = vld [vmem:[#allocation2 + $0x68] sm:$0x1]  ;;  %v2168_v30 = vld [vmem:[#allocation2 + $0x74] sm:$0x1] }
 0x178   : > { %1600 = vrot.lane.b32.xlu0 %v2856_v41, %s3461_s21  ;;  %vm1250_vm2 = vcmask 97344   ;;  %v2041_v51 = vshrl.u32 %v1890_v22, 16  ;;  %v2857_v54 = vcombine.low %v1553_v50, %v1563_v49  ;;  %811 = vst.msk [vmem:[#allocation3] sm:$0xff] %vm810_vm1, %v3160_v21  ;;  %v2044_v56 = vshll.u32 %v1890_v22, 16  ;;  %812 = vst.msk [vmem:[#allocation3 + $0x8] sm:$0xff] %vm810_vm1, %v3161_v23 }
 0x179   : > { %v1724_v55 = vsel %vm3935_vm13, %v1722_v46, %v1723_v38  ;;  %v2050_v58 = vshll.u32 %v1891_v33, 16  ;;  %813 = vst.msk [vmem:[#allocation3 + $0x10] sm:$0xff] %vm810_vm1, %v3163_v24  ;;  %814 = vst.msk [vmem:[#allocation3 + $0x18] sm:$0xff] %vm810_vm1, %v3165_v25  ;;  %v2054_v63 = vshrl.u32 %v1891_v33, 16  ;;  %v2060_v0 = vshll.u32 %v1892_v39, 16  ;;  %v3159_v25 = vld [vmem:[#allocation2 + $0x6c] sm:$0xff]  }
 0x17a   : > { %815 = vst.msk [vmem:[#allocation3 + $0x20] sm:$0xff] %vm810_vm1, %v3167_v26  ;;  %816 = vst.msk [vmem:[#allocation3 + $0x28] sm:$0xff] %vm810_vm1, %v3168_v27  ;;  %v2873_v59 = vcombine.low %v1721_v1, %v1724_v55  ;;  %v2043_v62 = vrot.slane %v2041_v51, 4  ;;  %1602 = vrot.lane.b32.xlu1 %v2857_v54, %s3461_s21  ;;  %v2046_v4 = vrot.slane %v2044_v56, 5  ;;  %v2065_v6 = vshrl.u32 %v1893_v45, 16  ;;  %s4352_s21 = scalar_lea.hbm %s4515_s29, %s2922_s14 }
 0x17b   : > { %817 = vst.msk [vmem:[#allocation3 + $0x30] sm:$0xff] %vm810_vm1, %v3169_v28  ;;  %818 = vst.msk [vmem:[#allocation3 + $0x38] sm:$0xff] %vm810_vm1, %v3170_v40  ;;  %v2052_v5 = vrot.slane %v2050_v58, 5  ;;  %v2068_v7 = vshll.u32 %v1893_v45, 16  ;;  %v2056_v9 = vrot.slane %v2054_v63, 4  ;;  %v2062_v10 = vrot.slane %v2060_v0, 5 }
 0x17c   : > { %1087 = vst.msk [vmem:[#allocation3] sm:$0xff] %vm1086_vm15, %v4158_v11  ;;  %1088 = vst.msk [vmem:[#allocation3 + $0x8] sm:$0xff] %vm1086_vm15, %v1065_v48  ;;  %1761 = vrot.lane.b32.xlu0 %v2872_v57, %s3462_s7  ;;  %v2074_v11 = vshll.u32 %v1894_v47, 16  ;;  %v2078_v12 = vshrl.u32 %v1894_v47, 16  ;;  %v2047_v14 = vor.u32 %v2046_v4, %v2043_v62  ;;  %v2067_v15 = vrot.slane %v2065_v6, 4 }
 0x17d   : > { %1251 = vst.msk [vmem:[#allocation3] sm:$0xff] %vm1250_vm2, %v4161_v16  ;;  %1252 = vst.msk [vmem:[#allocation3 + $0x8] sm:$0xff] %vm1250_vm2, %v1229_v53  ;;  %v2070_v17 = vrot.slane %v2068_v7, 5  ;;  %v2084_v18 = vshll.u32 %v1895_v52, 16  ;;  %v1589_v16 = vpop.permute.xlu0 %1588  ;;  %v2057_v20 = vor.u32 %v2056_v9, %v2052_v5  ;;  %v2896_v23 = vrot.slane %v2163_v3, 9 }
 0x17e   : > { %v2076_v21 = vrot.slane %v2074_v11, 5  ;;  %v2080_v22 = vrot.slane %v2078_v12, 4  ;;  %v2167_v24 = vld [vmem:[#allocation2 + $0x70] sm:$0xf]  ;;  %1763 = vrot.lane.b32.xlu1 %v2873_v59, %s3462_s7  ;;  %v2048_v26 = vrot.slane %v2047_v14, 4  ;;  %v2237_v29 = vrot.slane %v2164_v8, 5 }
 0x17f   : > { %v2071_v27 = vor.u32 %v2070_v17, %v2067_v15  ;;  %v2086_v28 = vrot.slane %v2084_v18, 5  ;;  %v2058_v31 = vrot.slane %v2057_v20, 4  ;;  %v2240_v33 = vrot.slane %v2165_v13, 5  ;;  %v3166_v47 = vld [vmem:[#allocation10 + $0x10] ss:$0 sps:$4 sm:$0x33]  }
 0x180   : > { %1851 = vrot.lane.b32.xlu0 %v3158_v61, %s3463_s13  ;;  %v2081_v32 = vor.u32 %v2080_v22, %v2076_v21  ;;  %v2897_v34 = vrot.slane %v2166_v19, 9  ;;  %v2053_v35 = vsel %vm3941_vm14, %v2048_v26, %v2052_v5  ;;  %v2238_v38 = vsel %vm3935_vm13, %v2896_v23, %v2237_v29  ;;  %s2569_s7 = scalar_lea.sflag [#allocation6], %s3759_s2 }
 0x181   : > { %v2072_v36 = vrot.slane %v2071_v27, 4  ;;  %v2239_v39 = vrot.slane %v2237_v29, 4  ;;  %v1591_v40 = vpop.permute.xlu1 %1590  ;;  %v1750_v41 = vpop.permute.xlu0 %1749  ;;  %v2063_v42 = vsel %vm3941_vm14, %v2058_v31, %v2062_v10  ;;  %v2244_v45 = vrot.slane %v2167_v24, 5 }
 0x182   : > { %v2082_v43 = vrot.slane %v2081_v32, 4  ;;  %v2247_v50 = vrot.slane %v2168_v30, 5  ;;  %1853 = vrot.lane.b32.xlu1 %v3159_v25, %s3463_s13  ;;  %v2888_v57 = vcombine.low %v2053_v35, %v2063_v42  ;;  %vm1339_vm3 = vcmask 130144   ;;  %s3285_s13 = scalar_lea.vmem %s4344_s15, 2048 }
 0x183   : > { %v2077_v1 = vsel %vm3941_vm14, %v2072_v36, %v2076_v21  ;;  %v2241_v46 = vsel %vm3935_vm13, %v2239_v39, %v2240_v33  ;;  %v2245_v51 = vsel %vm3935_vm13, %v2897_v34, %v2244_v45  ;;  %v2246_v52 = vrot.slane %v2244_v45, 4  ;;  %1340 = vst.msk [vmem:[#allocation3] sm:$0xff] %vm1339_vm3, %v4148_v37  ;;  %1341 = vst.msk [vmem:[#allocation3 + $0x8] sm:$0xff] %vm1339_vm3, %v4152_v44  ;;  %p3286_p1 = scmp.ne.s32.totalorder %s4344_s15, %s3285_s13 }
 0x184   : > { %v2087_v48 = vsel %vm3941_vm14, %v2082_v43, %v2086_v28  ;;  %v2904_v49 = vcombine.low %v2238_v38, %v2241_v46  ;;  %2124 = vrot.lane.b32.xlu0 %v2888_v57, %s3464_s8  ;;  %vm1612_vm4 = vcmask 162944   ;;  %vm1773_vm5 = vcmask 195744  }
 0x185   : > { %v2889_v53 = vcombine.low %v2077_v1, %v2087_v48  ;;  %v1752_v54 = vpop.permute.xlu1 %1751  ;;  %vm1863_vm6 = vcmask 228544   ;;  %v1840_v2 = vpop.permute.xlu0 %1839  ;;  %v2248_v55 = vsel %vm3935_vm13, %v2246_v52, %v2247_v50  ;;  %1613 = vst.msk [vmem:[#allocation3] sm:$0xff] %vm1612_vm4, %v1589_v16  ;;  %1614 = vst.msk [vmem:[#allocation3 + $0x8] sm:$0xff] %vm1612_vm4, %v1591_v40  ;;  %vm2359_vm7 = vcmask 1041408   ;;  %p3287_p13 = pnand %p3286_p1, %p4516_p3 }
 0x186   : > { %v2905_v37 = vcombine.low %v2245_v51, %v2248_v55  ;;  %1774 = vst.msk [vmem:[#allocation3] sm:$0xff] %vm1773_vm5, %v1750_v41  ;;  %1775 = vst.msk [vmem:[#allocation3 + $0x8] sm:$0xff] %vm1773_vm5, %v1752_v54  ;;  %2990 = vmatprep.subr.msk.bf16.mxu0 %vm2359_vm7, %v3166_v47  ;;  %v2361_v44 = vsel %vm2359_vm7, %v3166_v47, 0  ;;  %vm2136_vm8 = vcmask 261344   ;;  %2991 = vmatprep.subr.msk.bf16.mxu1 %vm2359_vm7, %v3166_v47  ;;  %vm2297_vm9 = vcmask 294144  }
 0x187   : > { %2126 = vrot.lane.b32.xlu1 %v2889_v53, %s3464_s8  ;;  %1864 = vst.msk [vmem:[#allocation3] sm:$0xff] %vm1863_vm6, %v1840_v2  ;;  %2967 = vmatpush3.bf16.msra.mxu0 %v2361_v44  ;;  %vm2334_vm10 = vcmask 293888   ;;  %p3288_p7 = pneg %p3287_p13  ;;  %s3466_s8 = smov [#allocation12]  }
 0x188   : > { %2285 = vrot.lane.b32.xlu0 %v2904_v49, %s3465_s11  ;;  %2989 = vmatpush3.bf16.msra.mxu1 %v2361_v44 }
 0x189   : > { %v1842_v60 = vpop.permute.xlu1 %1841  ;;  %v2113_v56 = vpop.permute.xlu0 %2112 }
 0x18a   : > { %1865 = vst.msk [vmem:[#allocation3 + $0x8] sm:$0xff] %vm1863_vm6, %v1842_v60 }
 0x18b   : > { %2287 = vrot.lane.b32.xlu1 %v2905_v37, %s3465_s11  ;;  %2137 = vst.msk [vmem:[#allocation3] sm:$0xff] %vm2136_vm8, %v2113_v56  ;;  %s3289_s11 = sshll.u32 %s3466_s8, 4  ;;  %s3290_s11 = int_to_ptr.vmem [resolvable:$false] %s3289_s11 }
 0x18c   : > { %s3291_s18 = scalar_lea.vmem %s3290_s11, 4096  ;;  %p3292_p9 = scmp.lt.s32.totalorder %s4344_s15, %s3290_s11 }
 0x18d   : > { %v2115_v58 = vpop.permute.xlu1 %2114  ;;  %v2274_v59 = vpop.permute.xlu0 %2273  ;;  %p3293_p5 = scmp.lt.s32.totalorder %s3291_s18, %s3285_s13 }
 0x18e   : > { %2138 = vst.msk [vmem:[#allocation3 + $0x8] sm:$0xff] %vm2136_vm8, %v2115_v58 }
 0x18f   : > { %2298 = vst.msk [vmem:[#allocation3] sm:$0xff] %vm2297_vm9, %v2274_v59  ;;  %p3294_p8 = por %p3293_p5, %p3292_p9 }
 0x191   : > { %p3295_p12 = pnand %p3294_p8, %p3288_p7 }
 0x192   : > { %v2276_v61 = vpop.permute.xlu0 %2275 }
 0x193   : > { %2299 = vst.msk [vmem:[#allocation3 + $0x8] sm:$0xff] %vm2297_vm9, %v2276_v61 }
 0x194   : > { %v1067_v62 = vpop.permute.xlu1 %1066 }
 0x195   : > { %1089 = vst.msk [vmem:[#allocation3 + $0x10] sm:$0xff] %vm1086_vm15, %v1067_v62 }
 0x196   : > { %v2306_v63 = vld [vmem:[#allocation3] sm:$0xff] }
 0x197   : > { %2968 = vmatprep.mubr.msk.bf16.mxu0 %vm2334_vm10, %v2306_v63 }
 0x198   : > { %v1231_v0 = vpop.permute.xlu0 %1230  ;;  %v1069_v3 = vpop.permute.xlu1 %1068 }
 0x199   : > { %1253 = vst.msk [vmem:[#allocation3 + $0x10] sm:$0xff] %vm1250_vm2, %v1231_v0 }
 0x19a   : > { %1090 = vst.msk [vmem:[#allocation3 + $0x18] sm:$0xff] %vm1086_vm15, %v1069_v3  ;;  %v2307_v4 = vld [vmem:[#allocation3 + $0x8] sm:$0xff] }
 0x19b   : > { %2969 = vmatmul.mubr.msk.bf16.vlgmr.msra.gmra.mrb[0].mxu0 %vm2334_vm10, %v2307_v4 }
 0x19c   : > { %v1320_v5 = vpop.permute.xlu0 %1319  ;;  %v1233_v6 = vpop.permute.xlu1 %1232 }
 0x19d   : > { %1342 = vst.msk [vmem:[#allocation3 + $0x10] sm:$0xff] %vm1339_vm3, %v1320_v5 }
 0x19e   : > { %1254 = vst.msk [vmem:[#allocation3 + $0x18] sm:$0xff] %vm1250_vm2, %v1233_v6 }
 0x1a0   : > { %v1322_v7 = vpop.permute.xlu1 %1321 }
 0x1a1   : > { %1343 = vst.msk [vmem:[#allocation3 + $0x18] sm:$0xff] %vm1339_vm3, %v1322_v7 }
 0x1a2   : > { %v1593_v8 = vpop.permute.xlu0 %1592 }
 0x1a3   : > { %1615 = vst.msk [vmem:[#allocation3 + $0x10] sm:$0xff] %vm1612_vm4, %v1593_v8 }
 0x1a4   : > { %v1595_v9 = vpop.permute.xlu1 %1594 }
 0x1a5   : > { %1616 = vst.msk [vmem:[#allocation3 + $0x18] sm:$0xff] %vm1612_vm4, %v1595_v9 }
 0x1a6   : > { %v1754_v10 = vpop.permute.xlu0 %1753 }
 0x1a7   : > { %1776 = vst.msk [vmem:[#allocation3 + $0x10] sm:$0xff] %vm1773_vm5, %v1754_v10 }
 0x1a8   : > { %v1756_v11 = vpop.permute.xlu1 %1755 }
 0x1a9   : > { %1777 = vst.msk [vmem:[#allocation3 + $0x18] sm:$0xff] %vm1773_vm5, %v1756_v11 }
 0x1aa   : > { %v1844_v12 = vpop.permute.xlu0 %1843 }
 0x1ab   : > { %1866 = vst.msk [vmem:[#allocation3 + $0x10] sm:$0xff] %vm1863_vm6, %v1844_v12 }
 0x1ac   : > { %v1846_v13 = vpop.permute.xlu1 %1845 }
 0x1ad   : > { %1867 = vst.msk [vmem:[#allocation3 + $0x18] sm:$0xff] %vm1863_vm6, %v1846_v13 }
 0x1ae   : > { %v2117_v14 = vpop.permute.xlu0 %2116 }
 0x1af   : > { %2139 = vst.msk [vmem:[#allocation3 + $0x10] sm:$0xff] %vm2136_vm8, %v2117_v14 }
 0x1b0   : > { %v2119_v15 = vpop.permute.xlu1 %2118 }
 0x1b1   : > { %2140 = vst.msk [vmem:[#allocation3 + $0x18] sm:$0xff] %vm2136_vm8, %v2119_v15 }
 0x1b2   : > { %v2278_v17 = vpop.permute.xlu0 %2277 }
 0x1b3   : > { %2300 = vst.msk [vmem:[#allocation3 + $0x10] sm:$0xff] %vm2297_vm9, %v2278_v17 }
 0x1b6   : > { %v2280_v18 = vpop.permute.xlu0 %2279 }
 0x1b7   : > { %2301 = vst.msk [vmem:[#allocation3 + $0x18] sm:$0xff] %vm2297_vm9, %v2280_v18  ;;  %v1071_v19 = vpop.permute.xlu1 %1070 }
 0x1b8   : > { %1091 = vst.msk [vmem:[#allocation3 + $0x20] sm:$0xff] %vm1086_vm15, %v1071_v19 }
 0x1ba   : > { %v2308_v16 = vld [vmem:[#allocation3 + $0x10] sm:$0xff] }
 0x1bb   : > { %2972 = vmatprep.mubr.msk.bf16.mxu0 %vm2334_vm10, %v2308_v16 }
 0x1bc   : > { %v1235_v20 = vpop.permute.xlu0 %1234  ;;  %v1073_v21 = vpop.permute.xlu1 %1072 }
 0x1bd   : > { %1255 = vst.msk [vmem:[#allocation3 + $0x20] sm:$0xff] %vm1250_vm2, %v1235_v20 }
 0x1be   : > { %1092 = vst.msk [vmem:[#allocation3 + $0x28] sm:$0xff] %vm1086_vm15, %v1073_v21  ;;  %v2309_v22 = vld [vmem:[#allocation3 + $0x18] sm:$0xff] }
 0x1bf   : > { %2973 = vmatmul.mubr.msk.bf16.gmra.mrb[4].mxu0 %vm2334_vm10, %v2309_v22 }
 0x1c0   : > { %v1324_v23 = vpop.permute.xlu0 %1323  ;;  %v1237_v24 = vpop.permute.xlu1 %1236 }
 0x1c1   : > { %1344 = vst.msk [vmem:[#allocation3 + $0x20] sm:$0xff] %vm1339_vm3, %v1324_v23 }
 0x1c2   : > { %1256 = vst.msk [vmem:[#allocation3 + $0x28] sm:$0xff] %vm1250_vm2, %v1237_v24 }
 0x1c4   : > { %v1326_v25 = vpop.permute.xlu1 %1325 }
 0x1c5   : > { %1345 = vst.msk [vmem:[#allocation3 + $0x28] sm:$0xff] %vm1339_vm3, %v1326_v25 }
 0x1c6   : > { %v1597_v26 = vpop.permute.xlu0 %1596 }
 0x1c7   : > { %1617 = vst.msk [vmem:[#allocation3 + $0x20] sm:$0xff] %vm1612_vm4, %v1597_v26 }
 0x1c8   : > { %v1599_v27 = vpop.permute.xlu1 %1598 }
 0x1c9   : > { %1618 = vst.msk [vmem:[#allocation3 + $0x28] sm:$0xff] %vm1612_vm4, %v1599_v27 }
 0x1ca   : > { %v1758_v28 = vpop.permute.xlu0 %1757 }
 0x1cb   : > { %1778 = vst.msk [vmem:[#allocation3 + $0x20] sm:$0xff] %vm1773_vm5, %v1758_v28 }
 0x1cc   : > { %v1760_v29 = vpop.permute.xlu1 %1759 }
 0x1cd   : > { %1779 = vst.msk [vmem:[#allocation3 + $0x28] sm:$0xff] %vm1773_vm5, %v1760_v29 }
 0x1ce   : > { %v1848_v30 = vpop.permute.xlu0 %1847 }
 0x1cf   : > { %1868 = vst.msk [vmem:[#allocation3 + $0x20] sm:$0xff] %vm1863_vm6, %v1848_v30 }
 0x1d0   : > { %v1850_v31 = vpop.permute.xlu1 %1849 }
 0x1d1   : > { %1869 = vst.msk [vmem:[#allocation3 + $0x28] sm:$0xff] %vm1863_vm6, %v1850_v31 }
 0x1d2   : > { %v2121_v32 = vpop.permute.xlu0 %2120 }
 0x1d3   : > { %2141 = vst.msk [vmem:[#allocation3 + $0x20] sm:$0xff] %vm2136_vm8, %v2121_v32 }
 0x1d4   : > { %v2123_v33 = vpop.permute.xlu1 %2122 }
 0x1d5   : > { %2142 = vst.msk [vmem:[#allocation3 + $0x28] sm:$0xff] %vm2136_vm8, %v2123_v33 }
 0x1d6   : > { %v2282_v34 = vpop.permute.xlu0 %2281 }
 0x1d7   : > { %2302 = vst.msk [vmem:[#allocation3 + $0x20] sm:$0xff] %vm2297_vm9, %v2282_v34 }
 0x1da   : > { %v2284_v35 = vpop.permute.xlu0 %2283 }
 0x1db   : > { %2303 = vst.msk [vmem:[#allocation3 + $0x28] sm:$0xff] %vm2297_vm9, %v2284_v35  ;;  %v1075_v36 = vpop.permute.xlu1 %1074 }
 0x1dc   : > { %1093 = vst.msk [vmem:[#allocation3 + $0x30] sm:$0xff] %vm1086_vm15, %v1075_v36 }
 0x1de   : > { %v2310_v38 = vld [vmem:[#allocation3 + $0x20] sm:$0xff] }
 0x1df   : > { %2976 = vmatprep.mubr.msk.bf16.mxu1 %vm2334_vm10, %v2310_v38 }
 0x1e0   : > { %v1239_v39 = vpop.permute.xlu0 %1238  ;;  %v1077_v40 = vpop.permute.xlu1 %1076 }
 0x1e1   : > { %1257 = vst.msk [vmem:[#allocation3 + $0x30] sm:$0xff] %vm1250_vm2, %v1239_v39 }
 0x1e2   : > { %1094 = vst.msk [vmem:[#allocation3 + $0x38] sm:$0xff] %vm1086_vm15, %v1077_v40  ;;  %v2311_v41 = vld [vmem:[#allocation3 + $0x28] sm:$0xff] }
 0x1e3   : > { %2977 = vmatmul.mubr.msk.bf16.vlgmr.msra.gmra.mrb[0].mxu1 %vm2334_vm10, %v2311_v41 }
 0x1e4   : > { %v1328_v42 = vpop.permute.xlu0 %1327  ;;  %v1241_v43 = vpop.permute.xlu1 %1240 }
 0x1e5   : > { %1346 = vst.msk [vmem:[#allocation3 + $0x30] sm:$0xff] %vm1339_vm3, %v1328_v42 }
 0x1e6   : > { %1258 = vst.msk [vmem:[#allocation3 + $0x38] sm:$0xff] %vm1250_vm2, %v1241_v43 }
 0x1e8   : > { %v1330_v45 = vpop.permute.xlu1 %1329 }
 0x1e9   : > { %1347 = vst.msk [vmem:[#allocation3 + $0x38] sm:$0xff] %vm1339_vm3, %v1330_v45 }
 0x1ea   : > { %v1601_v50 = vpop.permute.xlu0 %1600 }
 0x1eb   : > { %1619 = vst.msk [vmem:[#allocation3 + $0x30] sm:$0xff] %vm1612_vm4, %v1601_v50 }
 0x1ec   : > { %v1603_v57 = vpop.permute.xlu1 %1602 }
 0x1ed   : > { %1620 = vst.msk [vmem:[#allocation3 + $0x38] sm:$0xff] %vm1612_vm4, %v1603_v57 }
 0x1ee   : > { %v1762_v1 = vpop.permute.xlu0 %1761 }
 0x1ef   : > { %1780 = vst.msk [vmem:[#allocation3 + $0x30] sm:$0xff] %vm1773_vm5, %v1762_v1 }
 0x1f0   : > { %v1764_v46 = vpop.permute.xlu1 %1763 }
 0x1f1   : > { %1781 = vst.msk [vmem:[#allocation3 + $0x38] sm:$0xff] %vm1773_vm5, %v1764_v46 }
 0x1f2   : > { %v1852_v47 = vpop.permute.xlu0 %1851 }
 0x1f3   : > { %1870 = vst.msk [vmem:[#allocation3 + $0x30] sm:$0xff] %vm1863_vm6, %v1852_v47 }
 0x1f4   : > { %v1854_v48 = vpop.permute.xlu1 %1853 }
 0x1f5   : > { %1871 = vst.msk [vmem:[#allocation3 + $0x38] sm:$0xff] %vm1863_vm6, %v1854_v48 }
 0x1f6   : > { %v2125_v49 = vpop.permute.xlu0 %2124 }
 0x1f7   : > { %2143 = vst.msk [vmem:[#allocation3 + $0x30] sm:$0xff] %vm2136_vm8, %v2125_v49 }
 0x1f9   : > { %v2127_v51 = vpop.permute.xlu1 %2126 }
 0x1fa   : > { %2144 = vst.msk [vmem:[#allocation3 + $0x38] sm:$0xff] %vm2136_vm8, %v2127_v51  ;;  %v2286_v52 = vpop.permute.xlu0 %2285 }
 0x1fb   : > { %2304 = vst.msk [vmem:[#allocation3 + $0x30] sm:$0xff] %vm2297_vm9, %v2286_v52 }
 0x1fd   : > { %v2288_v53 = vpop.permute.xlu1 %2287 }
 0x1fe   : > { %2305 = vst.msk [vmem:[#allocation3 + $0x38] sm:$0xff] %vm2297_vm9, %v2288_v53 }
 0x202   : > { %v2312_v54 = vld [vmem:[#allocation3 + $0x30] sm:$0xff] }
 0x203   : > { %2980 = vmatprep.mubr.msk.bf16.mxu1 %vm2334_vm10, %v2312_v54 }
 0x205   : > { %v2313_v2 = vld [vmem:[#allocation3 + $0x38] sm:$0xff] }
 0x206   : > { %2981 = vmatmul.mubr.msk.bf16.gmra.mrb[4].mxu1 %vm2334_vm10, %v2313_v2 }
 0x26e   : > { %v2970_v55 = vpop.f32.mrb[0].mxu0 }
 0x26f   : > { %2462 = vst.msk [vmem:[%s3905_s16 + $0x10] sm:$0xff] %vm810_vm1, %v2970_v55  ;;  %v2397_v37 = vpop.f32.mrb[1].mxu0  ;;  %v2515_v58 = vmul.f32 %v2970_v55, %v2970_v55  ;;  %v2479_v0 = vsel %vm810_vm1, %v2970_v55, 0.0 }
 0x270   : > { %2460 = vst.msk [vmem:[%s3905_s16] sm:$0xff] %vm810_vm1, %v2397_v37  ;;  %v2513_v44 = vmul.f32 %v2397_v37, %v2397_v37  ;;  %v2971_v60 = vpop.f32.mrb[2].mxu0  ;;  %v2476_v59 = vsel %vm810_vm1, %v2397_v37, 0.0 }
 0x271   : > { %2463 = vst.msk [vmem:[%s3905_s16 + $0x18] sm:$0xff] %vm810_vm1, %v2971_v60  ;;  %v2400_v56 = vpop.f32.mrb[3].mxu0  ;;  %v2516_v4 = vmul.f32 %v2971_v60, %v2971_v60  ;;  %v2532_v8 = vsel %vm810_vm1, %v2515_v58, 0.0  ;;  %v2481_v9 = vsel %vm810_vm1, %v2971_v60, 0.0 }
 0x272   : > { %2461 = vst.msk [vmem:[%s3905_s16 + $0x8] sm:$0xff] %vm810_vm1, %v2400_v56  ;;  %v2477_v61 = vsel %vm810_vm1, %v2400_v56, 0.0  ;;  %v2514_v62 = vmul.f32 %v2400_v56, %v2400_v56  ;;  %v2529_v3 = vsel %vm810_vm1, %v2513_v44, 0.0 }
 0x273   : > { %v2478_v63 = vadd.f32 %v2477_v61, %v2476_v59  ;;  %v2534_v12 = vsel %vm810_vm1, %v2516_v4, 0.0 }
 0x274   : > { %v2530_v5 = vsel %vm810_vm1, %v2514_v62, 0.0 }
 0x275   : > { %v2480_v6 = vadd.f32 %v2479_v0, %v2478_v63  ;;  %v2531_v7 = vadd.f32 %v2530_v5, %v2529_v3 }
 0x277   : > { %v2533_v10 = vadd.f32 %v2532_v8, %v2531_v7  ;;  %v2482_v11 = vadd.f32 %v2481_v9, %v2480_v6 }
 0x279   : > { %v2535_v13 = vadd.f32 %v2534_v12, %v2533_v10 }
 0x292   : > { %v2974_v14 = vpop.f32.mrb[4].mxu0 }
 0x293   : > { %2466 = vst.msk [vmem:[%s3905_s16 + $0x30] sm:$0xff] %vm810_vm1, %v2974_v14  ;;  %v2413_v15 = vpop.f32.mrb[5].mxu0  ;;  %v2519_v21 = vmul.f32 %v2974_v14, %v2974_v14  ;;  %v2487_v27 = vsel %vm810_vm1, %v2974_v14, 0.0 }
 0x294   : > { %2464 = vst.msk [vmem:[%s3905_s16 + $0x20] sm:$0xff] %vm810_vm1, %v2413_v15  ;;  %v2483_v17 = vsel %vm810_vm1, %v2413_v15, 0.0  ;;  %v2517_v18 = vmul.f32 %v2413_v15, %v2413_v15  ;;  %v2975_v19 = vpop.f32.mrb[6].mxu0 }
 0x295   : > { %v2484_v16 = vadd.f32 %v2483_v17, %v2482_v11  ;;  %2467 = vst.msk [vmem:[%s3905_s16 + $0x38] sm:$0xff] %vm810_vm1, %v2975_v19  ;;  %v2416_v20 = vpop.f32.mrb[7].mxu0  ;;  %v2520_v28 = vmul.f32 %v2975_v19, %v2975_v19  ;;  %v2540_v32 = vsel %vm810_vm1, %v2519_v21, 0.0  ;;  %v2489_v33 = vsel %vm810_vm1, %v2975_v19, 0.0 }
 0x296   : > { %v2536_v22 = vsel %vm810_vm1, %v2517_v18, 0.0  ;;  %2465 = vst.msk [vmem:[%s3905_s16 + $0x28] sm:$0xff] %vm810_vm1, %v2416_v20  ;;  %v2485_v23 = vsel %vm810_vm1, %v2416_v20, 0.0  ;;  %v2518_v24 = vmul.f32 %v2416_v20, %v2416_v20 }
 0x297   : > { %v2537_v25 = vadd.f32 %v2536_v22, %v2535_v13  ;;  %v2486_v26 = vadd.f32 %v2485_v23, %v2484_v16  ;;  %v2542_v36 = vsel %vm810_vm1, %v2520_v28, 0.0 }
 0x298   : > { %v2538_v29 = vsel %vm810_vm1, %v2518_v24, 0.0 }
 0x299   : > { %v2488_v30 = vadd.f32 %v2487_v27, %v2486_v26  ;;  %v2539_v31 = vadd.f32 %v2538_v29, %v2537_v25 }
 0x29b   : > { %v2541_v34 = vadd.f32 %v2540_v32, %v2539_v31  ;;  %v2490_v35 = vadd.f32 %v2489_v33, %v2488_v30 }
 0x29d   : > { %v2543_v38 = vadd.f32 %v2542_v36, %v2541_v34 }
 0x2b6   : > { %v2978_v39 = vpop.f32.mrb[0].mxu1 }
 0x2b7   : > { %2470 = vst.msk [vmem:[%s3905_s16 + $0x50] sm:$0xff] %vm810_vm1, %v2978_v39  ;;  %v2429_v40 = vpop.f32.mrb[1].mxu1  ;;  %v2523_v57 = vmul.f32 %v2978_v39, %v2978_v39  ;;  %v2495_v51 = vsel %vm810_vm1, %v2978_v39, 0.0 }
 0x2b8   : > { %2468 = vst.msk [vmem:[%s3905_s16 + $0x40] sm:$0xff] %vm810_vm1, %v2429_v40  ;;  %v2491_v41 = vsel %vm810_vm1, %v2429_v40, 0.0  ;;  %v2521_v42 = vmul.f32 %v2429_v40, %v2429_v40  ;;  %v2979_v43 = vpop.f32.mrb[2].mxu1 }
 0x2b9   : > { %v2492_v45 = vadd.f32 %v2491_v41, %v2490_v35  ;;  %2471 = vst.msk [vmem:[%s3905_s16 + $0x58] sm:$0xff] %vm810_vm1, %v2979_v43  ;;  %v2432_v50 = vpop.f32.mrb[3].mxu1  ;;  %v2524_v52 = vmul.f32 %v2979_v43, %v2979_v43  ;;  %v2548_v55 = vsel %vm810_vm1, %v2523_v57, 0.0  ;;  %v2497_v37 = vsel %vm810_vm1, %v2979_v43, 0.0 }
 0x2ba   : > { %v2544_v1 = vsel %vm810_vm1, %v2521_v42, 0.0  ;;  %2469 = vst.msk [vmem:[%s3905_s16 + $0x48] sm:$0xff] %vm810_vm1, %v2432_v50  ;;  %v2493_v46 = vsel %vm810_vm1, %v2432_v50, 0.0  ;;  %v2522_v47 = vmul.f32 %v2432_v50, %v2432_v50 }
 0x2bb   : > { %v2545_v48 = vadd.f32 %v2544_v1, %v2543_v38  ;;  %v2494_v49 = vadd.f32 %v2493_v46, %v2492_v45  ;;  %v2550_v56 = vsel %vm810_vm1, %v2524_v52, 0.0 }
 0x2bc   : > { %v2546_v53 = vsel %vm810_vm1, %v2522_v47, 0.0 }
 0x2bd   : > { %v2496_v54 = vadd.f32 %v2495_v51, %v2494_v49  ;;  %v2547_v2 = vadd.f32 %v2546_v53, %v2545_v48 }
 0x2bf   : > { %v2549_v44 = vadd.f32 %v2548_v55, %v2547_v2  ;;  %v2498_v60 = vadd.f32 %v2497_v37, %v2496_v54 }
 0x2c1   : > { %v2551_v58 = vadd.f32 %v2550_v56, %v2549_v44 }
 0x2d9   : > { %v2982_v59 = vpop.f32.mrb[4].mxu1 }
 0x2da   : > { %2474 = vst.msk [vmem:[%s3905_s16 + $0x70] sm:$0xff] %vm810_vm1, %v2982_v59  ;;  %v2445_v61 = vpop.f32.mrb[5].mxu1  ;;  %v2527_v5 = vmul.f32 %v2982_v59, %v2982_v59 }
 0x2db   : > { %2472 = vst.msk [vmem:[%s3905_s16 + $0x60] sm:$0xff] %vm810_vm1, %v2445_v61  ;;  %v2499_v62 = vsel %vm810_vm1, %v2445_v61, 0.0  ;;  %v2525_v63 = vmul.f32 %v2445_v61, %v2445_v61  ;;  %v2983_v0 = vpop.f32.mrb[6].mxu1 }
 0x2dc   : > { %v2500_v3 = vadd.f32 %v2499_v62, %v2498_v60  ;;  %2475 = vst.msk [vmem:[%s3905_s16 + $0x78] sm:$0xff] %vm810_vm1, %v2983_v0  ;;  %v2448_v4 = vpop.f32.mrb[7].mxu1 }
 0x2dd   : > { %v2552_v6 = vsel %vm810_vm1, %v2525_v63, 0.0  ;;  %2473 = vst.msk [vmem:[%s3905_s16 + $0x68] sm:$0xff] %vm810_vm1, %v2448_v4  ;;  %v2501_v7 = vsel %vm810_vm1, %v2448_v4, 0.0  ;;  %v2526_v8 = vmul.f32 %v2448_v4, %v2448_v4 }
 0x2de   : > { %v2553_v9 = vadd.f32 %v2552_v6, %v2551_v58  ;;  %v2502_v10 = vadd.f32 %v2501_v7, %v2500_v3 }
 0x2df   : > { %3298 = shalt.err (!%p3295_p12)
}
 0x2e0   : > { %s3299_s16 = scalar_lea.hbm %s4352_s21, 2048  ;;  %s3303_s14 = scalar_lea.hbm %s4515_s29, 8192 }
 0x2e1   : > { %p3300_p2 = scmp.ne.s32.totalorder %s4352_s21, %s3299_s16  ;;  %p3304_p0 = scmp.lt.u32.totalorder %s4352_s21, %s4515_s29 }
 0x2e2   : > { %p3305_p11 = scmp.lt.u32.totalorder %s3303_s14, %s3299_s16  ;;  %p3307_p1 = scmp.lt.u32.totalorder %s3299_s16, %s4352_s21 }
 0x2e3   : > { %p3301_p6 = pnand %p3300_p2, %p4516_p3 }
 0x2e4   : > { %p3306_p4 = por %p3305_p11, %p3304_p0 }
 0x2e5   : > { %p3302_p10 = pneg %p3301_p6 }
 0x2e6   : > { %p3308_p13 = por %p3307_p1, %p3306_p4 }
 0x2e8   : > { %p3309_p7 = pnand %p3308_p13, %p3302_p10 }
 0x2ea   : > { %3312 = shalt.err (!%p3309_p7)
}
 0x2eb   : > { %s3467_s13 = smov 128   ;;  %v2503_v11 = vsel %vm810_vm1, %v2982_v59, 0.0  ;;  %v2528_v12 = vmul.f32 %v2983_v0, %v2983_v0  ;;  %v2554_v13 = vsel %vm810_vm1, %v2526_v8, 0.0  ;;  %v2556_v17 = vsel %vm810_vm1, %v2527_v5, 0.0  ;;  %s3468_s12 = smov [#allocation13]  }
 0x2ec   : > { %3006 = dma.vmem_to_hbm [thread:$0]  (%p4516_p3), %s4344_s15, 2048, %s4352_s21, %s2569_s7, %s3467_s13, %s3467_s13, %s3459_s3   ;;  %v2504_v14 = vadd.f32 %v2503_v11, %v2502_v10  ;;  %v2555_v15 = vadd.f32 %v2554_v13, %v2553_v9  ;;  %v2505_v18 = vsel %vm810_vm1, %v2983_v0, 0.0 }
 0x2ed   : > { %v2558_v20 = vsel %vm810_vm1, %v2528_v12, 0.0  ;;  %s2923_s3 = sshll.u32 %s3435_s25, 1  ;;  %s2608_s7 = sshll.u32 %s3909_s17, 4  ;;  %s4400_s7 = int_to_ptr.vmem [resolvable:$true] %s2608_s7 }
 0x2ee   : > { %v2506_v19 = vadd.f32 %v2505_v18, %v2504_v14  ;;  %v2557_v16 = vadd.f32 %v2556_v17, %v2555_v15  ;;  %s2604_s15 = sadd.s32 %s3431_s24, %s2923_s3  ;;  %s4517_s25 = sld [smem:[#allocation27_spill]] }
 0x2ef   : > { %s2924_s21 = sshll.u32 %s2604_s15, 5  ;;  %s2574_s24 = scalar_lea.sflag [#allocation14], %s3759_s2 }
 0x2f0   : > { %v2507_v21 = vrot.slane %v2506_v19, 4  ;;  %v2559_v22 = vadd.f32 %v2558_v20, %v2557_v16  ;;  %s3313_s6 = scalar_lea.vmem %s4400_s7, 32  ;;  %s3317_s14 = sshll.u32 %s3468_s12, 4  ;;  %s3318_s14 = int_to_ptr.vmem [resolvable:$false] %s3317_s14 }
 0x2f1   : > { %p3314_p9 = scmp.ne.s32.totalorder %s4400_s7, %s3313_s6  ;;  %s3319_s10 = scalar_lea.vmem %s3318_s14, 64 }
 0x2f2   : > { %v2508_v23 = vadd.f32 %v2507_v21, %v2506_v19  ;;  %v2560_v24 = vrot.slane %v2559_v22, 4  ;;  %p3320_p12 = scmp.lt.s32.totalorder %s4400_s7, %s3318_s14  ;;  %p3321_p2 = scmp.lt.s32.totalorder %s3319_s10, %s3313_s6 }
 0x2f3   : > { %p3315_p5 = pnand %p3314_p9, %p4516_p3 }
 0x2f4   : > { %v2509_v25 = vrot.slane %v2508_v23, 2  ;;  %v2561_v26 = vadd.f32 %v2560_v24, %v2559_v22  ;;  %s4518_s16 = smov %s4517_s25  ;;  %s4398_s18 = scalar_lea.hbm %s4517_s25, %s2924_s21 }
 0x2f5   : > { %p3316_p8 = pneg %p3315_p5  ;;  %p3322_p6 = por %p3321_p2, %p3320_p12 }
 0x2f6   : > { %v2510_v27 = vadd.f32 %v2509_v25, %v2508_v23  ;;  %v2562_v28 = vrot.slane %v2561_v26, 2 }
 0x2f7   : > { %p3323_p10 = pnand %p3322_p6, %p3316_p8 }
 0x2f8   : > { %v2511_v29 = vrot.slane %v2510_v27, 1  ;;  %v2563_v30 = vadd.f32 %v2562_v28, %v2561_v26 }
 0x2fa   : > { %v2512_v31 = vadd.f32 %v2511_v29, %v2510_v27  ;;  %v2564_v32 = vrot.slane %v2563_v30, 1 }
 0x2fc   : > { %v2565_v33 = vadd.f32 %v2564_v32, %v2563_v30  ;;  %2566 = vst.msk [vmem:[%s3909_s17] sm:$0x1] %vm316_vm0, %v2512_v31 }
 0x2fe   : > { %2567 = vst.msk [vmem:[%s3909_s17 + $0x1] sm:$0x1] %vm316_vm0, %v2565_v33 }
 0x2ff   : > { %3326 = shalt.err (!%p3323_p10)
}
 0x300   : > { %s3327_s2 = scalar_lea.hbm %s4398_s18, 32  ;;  %s3331_s13 = scalar_lea.hbm %s4518_s16, 128 }
 0x301   : > { %p3328_p0 = scmp.ne.s32.totalorder %s4398_s18, %s3327_s2  ;;  %p3332_p1 = scmp.lt.u32.totalorder %s4398_s18, %s4518_s16 }
 0x302   : > { %p3333_p13 = scmp.lt.u32.totalorder %s3331_s13, %s3327_s2  ;;  %p3335_p9 = scmp.lt.u32.totalorder %s3327_s2, %s4398_s18 }
 0x303   : > { %p3329_p11 = pnand %p3328_p0, %p4516_p3 }
 0x304   : > { %p3334_p7 = por %p3333_p13, %p3332_p1 }
 0x305   : > { %p3330_p4 = pneg %p3329_p11 }
 0x306   : > { %p3336_p5 = por %p3335_p9, %p3334_p7 }
 0x308   : > { %p3337_p8 = pnand %p3336_p5, %p3330_p4 }
 0x30a   : > { %3340 = shalt.err (!%p3337_p8)
}
 0x30b   : > { %3007 = dma.vmem_to_hbm [thread:$0]  (%p4516_p3), %s4400_s7, 32, %s4398_s18, %s2574_s24  }
 0x30c PF: > { %s4519_s21 = sld [smem:[#allocation20_spill]]  ;;  %s4520_s8 = sld [smem:[#allocation21_spill]] }
 0x30d   : > { %p3038_p12 = scmp.ge.s32.totalorder %s3447_s28, 2 }
 0x312   : > { %s2620_s11 = sand.u32 1, %s4519_s21   ;;  %p4521_p2 = scmp.ne.s32.totalorder %s4520_s8, 0 }
 0x313   : > { %s2621_s25 = scalar_lea.sflag [#allocation6], %s2620_s11 }
 0x314   : > { %p3025_p6 = pnand %p3038_p12, %p4521_p2 }
 0x316   : > { %3398 = dma.done.wait (!%p3025_p6), %s2621_s25, 2048  }
 0x317   : > { %3400 = vsyncadd (!%p3025_p6), %s2621_s25, 4294965248  ;;  %s2630_s6 = scalar_lea.sflag [#allocation14], %s2620_s11 }
 0x318   : > { %3402 = dma.done.wait (!%p3025_p6), %s2630_s6, 32  }
 0x319   : > { %3404 = vsyncadd (!%p3025_p6), %s2630_s6, 4294967264  ;;  %s27_s28 = sadd.s32 1, %s3447_s28   ;;  %s4522_s9 = sld [smem:[#allocation22_spill]] }
 0x31a   : > { %p24_p10 = scmp.ge.s32.totalorder %s27_s28, 6   ;;  %s4523_s18 = smov %s3411_s19 }
 0x31b   : > { %s4524_s19 = smov %s3415_s20  ;;  %s4525_s20 = smov %s3695_s5 }
 0x31c   : > { %s4526_s21 = smov %s3423_s22  ;;  %s4527_s22 = smov %s3427_s23 }
 0x31d   : > { %s4528_s23 = smov %s3690_s4  ;;  %s4529_s24 = smov %s3439_s26 }
 0x31e   : > { %s4530_s25 = smov %s3443_s27  ;;  %s4531_s26 = smov %s4534_s30 }
 0x31f   : > { %s4532_s27 = smov %s4522_s9  ;;  %26 = sbr.rel (!%p24_p10) target bundleno = 19 (0x13), region = 124 }
 0x326   :  { %2635 = vsyncpa [#allocation5], 1 }
 0x327   :  { %2637 = vsyncpa [#allocation5 + $0x1], 1 }
 0x328   :  { %2638 = vsyncpa [#allocation8], 1 }
 0x329   :  { %2639 = vsyncpa [#allocation11], 1 }
 0x32a   :  { %2640 = vsyncpa [#allocation6], 1 }
 0x32b   :  { %2642 = vsyncpa [#allocation6 + $0x1], 1 }
 0x32c   :  { %2643 = vsyncpa [#allocation14], 1 }
 0x32d   :  { %2645 = vsyncpa [#allocation14 + $0x1], 1 }

// kernel: tpu_custom_call.1
= control target key start
LH: loop header
LB: loop body
LE: loop exit
PB: predicated region body
PF: predicated region fallthrough
CT: control target
= control target key end

     0   :  { %s4463_s0 = inlined_call_operand.hbm [shape: f32[2,16,16,4], index: 0, kind: input, shape index: {}]   ;;  %s4464_s1 = inlined_call_operand.hbm [shape: f32[1,4], index: 1, kind: input, shape index: {}]   ;;  %s4465_s2 = inlined_call_operand.hbm [shape: f32[1,4], index: 2, kind: input, shape index: {}]   ;;  %s4466_s3 = inlined_call_operand.hbm [shape: bf16[36,4], index: 3, kind: input, shape index: {}]   ;;  %s4467_s4 = inlined_call_operand.hbm [shape: f32[2,16,16,4], index: 4, kind: output, shape index: {0}]   ;;  %s4468_s5 = inlined_call_operand.hbm [shape: f32[2,2,2,4], index: 5, kind: output, shape index: {1}]  }
   0x1   :  { %4479 = sst [smem:[#allocation23_spill]] %s4464_s1 }
   0x2   :  { %4480 = sst [smem:[#allocation24_spill]] %s4465_s2 }
   0x3   :  { %4481 = sst [smem:[#allocation25_spill]] %s4466_s3 }
   0x4   :  { %4482 = sst [smem:[#allocation26_spill]] %s4467_s4 }
   0x5   :  { %4483 = sst [smem:[#allocation27_spill]] %s4468_s5 }
   0x6   :  { %11 = vsyncpa [#allocation5], 0 }
   0x7   :  { %13 = vsyncpa [#allocation5 + $0x1], 0 }
   0x8   :  { %14 = vsyncpa [#allocation8], 0 }
   0x9   :  { %15 = vsyncpa [#allocation11], 0 }
   0xa   :  { %16 = vsyncpa [#allocation6], 0 }
   0xb   :  { %18 = vsyncpa [#allocation6 + $0x1], 0 }
   0xc   :  { %19 = vsyncpa [#allocation14], 0 }
   0xd   :  { %21 = vsyncpa [#allocation14 + $0x1], 0  ;;  %s3499_s18 = smov 0   ;;  %s3501_s19 = smov 0  }
   0xe   :  { %s3503_s20 = smov 0   ;;  %s3505_s21 = smov 0  }
   0xf   :  { %s3507_s22 = smov 0   ;;  %s3509_s23 = smov 0  }
  0x10   :  { %s3511_s24 = smov 0   ;;  %s3513_s25 = smov 0  }
  0x11   :  { %s3515_s26 = smov 0   ;;  %s3517_s27 = smov 0  }
  0x12   :  { %s3519_s28 = smov 0  }
  0x13 LB: > { %4484 = sst [smem:[#allocation20_spill]] %s3407_s18  ;;  %s2763_s29 = sadd.s32 4294967295, %s3447_s28   ;;  %s3447_s28 = sphi %s3519_s28, %s27_s28   ;;  %s3443_s27 = sphi %s3517_s27, %s4532_s27   ;;  %s3439_s26 = sphi %s3515_s26, %s4531_s26   ;;  %s3435_s25 = sphi %s3513_s25, %s4530_s25   ;;  %s3431_s24 = sphi %s3511_s24, %s4529_s24   ;;  %s3427_s23 = sphi %s3509_s23, %s4528_s23   ;;  %s3423_s22 = sphi %s3507_s22, %s4527_s22   ;;  %s3419_s21 = sphi %s3505_s21, %s4526_s21   ;;  %s3415_s20 = sphi %s3503_s20, %s4525_s20   ;;  %s3411_s19 = sphi %s3501_s19, %s4524_s19   ;;  %s3407_s18 = sphi %s3499_s18, %s4523_s18  }
  0x14   : > { %s2764_s30 = sadd.s32 4294967294, %s3447_s28   ;;  %p59_p0 = scmp.ne.s32.totalorder %s3423_s22, %s3419_s21 }
  0x15   : > { %p3555_p1 = scmp.eq.s32.totalorder %s2763_s29, 0  ;;  %p147_p2 = scmp.ne.s32.totalorder %s3415_s20, %s3411_s19 }
  0x16   : > { %p148_p4 = scmp.eq.s32.totalorder %s2763_s29, 3  ;;  %p153_p5 = scmp.ne.s32.totalorder %s3411_s19, %s3407_s18 }
  0x17   : > { %s4485_s6 = scalar_select %p3555_p1, 1, 0 }
  0x18   : > { %p3564_p3 = por %p3555_p1, %p59_p0  ;;  %p154_p6 = scmp.eq.s32.totalorder %s2764_s30, 3 }
  0x19   : > { %p3570_p7 = por %p148_p4, %p147_p2  ;;  %p2765_p8 = scmp.ge.s32.totalorder %s3447_s28, 1 }
  0x1a   : > { %s4486_s8 = scalar_select %p3564_p3, 1, 0 }
  0x1b   : > { %s4487_s9 = scalar_select %p3570_p7, 1, 0 }
  0x1c   : > { %p3575_p9 = por %p154_p6, %p153_p5  ;;  %p189_p10 = scmp.lt.s32.totalorder %s3447_s28, 5 }
  0x1d   : > { %s3449_s12 = smov [#allocation7]   ;;  %s3450_s14 = smov [#allocation9]  }
  0x1e   : > { %s4488_s10 = scalar_select %p3575_p9, 1, 0 }
  0x1f   : > { %p3580_p11 = pnand %p2765_p8, %p189_p10  ;;  %s202_s13 = sshll.u32 %s3449_s12, 4  ;;  %s203_s13 = int_to_ptr.vmem [resolvable:$true] %s202_s13 }
  0x20   : > { %4489 = sst [smem:[#allocation21_spill]] %s4488_s10  ;;  %s213_s15 = sshll.u32 %s3450_s14, 4  ;;  %s3592_s15 = int_to_ptr.vmem [resolvable:$true] %s213_s15 }
  0x21   : > { %s4490_s11 = scalar_select %p3580_p11, 1, 0 }
  0x22   : > { %p3010_p12 = pneg %p3580_p11  ;;  %s3451_s17 = smov [#allocation10]  }
  0x23   : > { %s223_s21 = sshll.u32 %s3451_s17, 4  ;;  %s4492_s1 = sld [smem:[#allocation23_spill]]  ;;  %s3594_s21 = int_to_ptr.vmem [resolvable:$true] %s223_s21 }
  0x24   : > { %p3588_p13 = pnand %p3010_p12, %p3555_p1 }
  0x26   : > { %p3604_p2 = pneg %p3588_p13 }
  0x29   : > { %s3171_s12 = scalar_lea.hbm %s4492_s1, 16 }
  0x2a   : > { %p3172_p0 = scmp.ne.s32.totalorder %s4492_s1, %s3171_s12  ;;  %p3178_p6 = scmp.lt.u32.totalorder %s3171_s12, %s4492_s1 }
  0x2c   : > { %p3174_p4 = pnand %p3604_p2, %p3172_p0 }
  0x2e   : > { %p3175_p5 = pneg %p3174_p4 }
  0x30   : > { %p3180_p8 = pnand %p3178_p6, %p3175_p5 }
  0x32   : > { %3183 = shalt.err (!%p3180_p8)
}
  0x33   : > { %s3184_s29 = scalar_lea.vmem %s203_s13, 16  ;;  %s3191_s7 = scalar_lea.vmem %s203_s13, 32 }
  0x34   : > { %p3185_p10 = scmp.ne.s32.totalorder %s203_s13, %s3184_s29  ;;  %p3192_p7 = scmp.lt.s32.totalorder %s203_s13, %s203_s13 }
  0x35   : > { %p3193_p1 = scmp.lt.s32.totalorder %s3191_s7, %s3184_s29 }
  0x36   : > { %p3187_p12 = pnand %p3185_p10, %p3604_p2 }
  0x37   : > { %p3194_p3 = por %p3193_p1, %p3192_p7 }
  0x38   : > { %p3188_p9 = pneg %p3187_p12 }
  0x3a   : > { %p3195_p11 = pnand %p3194_p3, %p3188_p9 }
  0x3c   : > { %3198 = shalt.err (!%p3195_p11)
}
  0x3d   : > { %3013 = dma.hbm_to_vmem [thread:$0]  (!%p3588_p13), %s4492_s1, 16, %s203_s13, [#allocation8]  }
  0x3e   : > { %s4494_s2 = sld [smem:[#allocation24_spill]] }
  0x44   : > { %s3199_s17 = scalar_lea.hbm %s4494_s2, 16 }
  0x45   : > { %p3200_p0 = scmp.ne.s32.totalorder %s4494_s2, %s3199_s17  ;;  %p3206_p3 = scmp.lt.u32.totalorder %s3199_s17, %s4494_s2 }
  0x47   : > { %p3202_p4 = pnand %p3200_p0, %p3604_p2 }
  0x49   : > { %p3203_p1 = pneg %p3202_p4 }
  0x4b   : > { %p3208_p7 = pnand %p3206_p3, %p3203_p1 }
  0x4d   : > { %3211 = shalt.err (!%p3208_p7)
}
  0x4e   : > { %s3212_s13 = scalar_lea.vmem %s3592_s15, 16  ;;  %s3219_s4 = scalar_lea.vmem %s3592_s15, 32 }
  0x4f   : > { %p3213_p9 = scmp.ne.s32.totalorder %s3592_s15, %s3212_s13  ;;  %p3220_p6 = scmp.lt.s32.totalorder %s3592_s15, %s3592_s15 }
  0x50   : > { %p3221_p8 = scmp.lt.s32.totalorder %s3219_s4, %s3212_s13 }
  0x51   : > { %p3215_p11 = pnand %p3213_p9, %p3604_p2 }
  0x52   : > { %p3222_p10 = por %p3221_p8, %p3220_p6 }
  0x53   : > { %p3216_p5 = pneg %p3215_p11 }
  0x55   : > { %p3223_p12 = pnand %p3222_p10, %p3216_p5 }
  0x57   : > { %3226 = shalt.err (!%p3223_p12)
}
  0x58   : > { %3016 = dma.hbm_to_vmem [thread:$0]  (!%p3588_p13), %s4494_s2, 16, %s3592_s15, [#allocation8]  }
  0x59   : > { %s4495_s3 = sld [smem:[#allocation25_spill]] }
  0x5f   : > { %s3227_s12 = scalar_lea.hbm %s4495_s3, 320 }
  0x60   : > { %p3228_p0 = scmp.ne.s32.totalorder %s4495_s3, %s3227_s12  ;;  %p3234_p3 = scmp.lt.u32.totalorder %s3227_s12, %s4495_s3 }
  0x62   : > { %p3230_p4 = pnand %p3228_p0, %p3604_p2 }
  0x64   : > { %p3231_p1 = pneg %p3230_p4 }
  0x66   : > { %p3236_p7 = pnand %p3234_p3, %p3231_p1 }
  0x68   : > { %3239 = shalt.err (!%p3236_p7)
}
  0x69   : > { %s3240_s15 = scalar_lea.vmem %s3594_s21, 320  ;;  %p3248_p6 = scmp.lt.s32.totalorder %s3594_s21, %s3594_s21 }
  0x6a   : > { %p3241_p9 = scmp.ne.s32.totalorder %s3594_s21, %s3240_s15  ;;  %p3249_p8 = scmp.lt.s32.totalorder %s3240_s15, %s3240_s15 }
  0x6c   : > { %p3243_p11 = pnand %p3241_p9, %p3604_p2  ;;  %p3250_p10 = por %p3249_p8, %p3248_p6 }
  0x6e   : > { %p3244_p5 = pneg %p3243_p11 }
  0x70   : > { %p3251_p12 = pnand %p3250_p10, %p3244_p5 }
  0x72   : > { %3254 = shalt.err (!%p3251_p12)
}
  0x73   : > { %s3452_s4 = smov 64   ;;  %s3453_s14 = smov 4  }
  0x74   : > { %3019 = dma.hbm_to_vmem [thread:$0]  (!%p3588_p13), %s4495_s3, 320, %s3594_s21, [#allocation11], %s3452_s4, %s3452_s4, %s3453_s14  }
  0x75   : > { %s36_s30 = sadd.s32 1, %s3439_s26  ;;  %s39_s18 = sadd.s32 1, %s3443_s27 }
  0x76   : > { %p37_p2 = scmp.ge.s32.totalorder %s36_s30, 2  ;;  %s46_s12 = sadd.s32 1, %s3427_s23 }
  0x77   : > { %p53_p0 = scmp.ne.s32.totalorder %s3427_s23, %s3423_s22  ;;  %p54_p4 = scmp.eq.s32.totalorder %s3447_s28, 0 }
  0x78   : > { %s4534_s30 = smov (%p37_p2, %s36_s30), 0  ;;  %s4536_s18 = smov (!%p37_p2, %s39_s18), %s3443_s27 }
  0x79   : > { %s133_s16 = ssub.s32 %s3439_s26, %s4534_s30  ;;  %p41_p1 = scmp.ge.s32.totalorder %s4536_s18, 2 }
  0x7a   : > { %p3034_p3 = scmp.lt.s32.totalorder %s3447_s28, 4  ;;  %p3679_p13 = por %p54_p4, %p53_p0 }
  0x7b   : > { %s237_s17 = sand.u32 1, %s3427_s23   ;;  %s4538_s18 = smov (%p41_p1, %s4536_s18), 0 }
  0x7c   : > { %4497 = sst [smem:[#allocation22_spill]] %s4538_s18  ;;  %s2770_s29 = sshll.u32 %s237_s17, 8 }
  0x7d   : > { %s43_s7 = ssub.s32 %s3443_s27, %s4538_s18  ;;  %s2927_s15 = sshll.u32 %s3443_s27, 12 }
  0x7e   : > { %p44_p7 = scmp.eq.s32.totalorder %s43_s7, 0  ;;  %s134_s13 = sor.u32 %s133_s16, %s43_s7 }
  0x7f   : > { %p135_p9 = scmp.eq.s32.totalorder %s134_s13, 0  ;;  %s4498_s14 = sadd.s32 1, %s3415_s20 }
  0x80   : > { %s3690_s4 = scalar_select %p44_p7, %s3427_s23, %s46_s12  }
  0x81   : > { %s3695_s5 = scalar_select %p135_p9, %s3415_s20, %s4498_s14  }
  0x82   : > { %s3700_s2 = scalar_lea.hbm %s4463_s0, %s2927_s15  ;;  %s241_s3 = scalar_lea.vmem [#allocation4], %s2770_s29 }
  0x83   : > { %s248_s18 = sshll.u32 %s241_s3, 4  ;;  %p3708_p11 = pnand %p3034_p3, %p3679_p13  ;;  %s3702_s18 = int_to_ptr.vmem [resolvable:$true] %s248_s18 }
  0x84   : > { %s3712_s16 = scalar_lea.sflag [#allocation5], %s237_s17  ;;  %s3255_s1 = scalar_lea.hbm %s3700_s2, 4096 }
  0x85   : > { %p3256_p5 = scmp.ne.s32.totalorder %s3700_s2, %s3255_s1  ;;  %p3257_p6 = pneg %p3708_p11 }
  0x86   : > { %s3260_s21 = scalar_lea.hbm %s4463_s0, 8192  ;;  %p3261_p12 = scmp.lt.u32.totalorder %s3700_s2, %s4463_s0 }
  0x87   : > { %p3258_p8 = pnand %p3257_p6, %p3256_p5  ;;  %p3262_p2 = scmp.lt.u32.totalorder %s3260_s21, %s3255_s1 }
  0x88   : > { %p3264_p4 = scmp.lt.u32.totalorder %s3255_s1, %s3700_s2 }
  0x89   : > { %p3259_p10 = pneg %p3258_p8  ;;  %p3263_p0 = por %p3262_p2, %p3261_p12 }
  0x8b   : > { %p3265_p1 = por %p3264_p4, %p3263_p0 }
  0x8d   : > { %p3266_p3 = pnand %p3265_p1, %p3259_p10 }
  0x8f   : > { %3269 = shalt.err (!%p3266_p3)
}
  0x90   : > { %s3270_s17 = scalar_lea.vmem %s3702_s18, 4096  ;;  %s3454_s15 = smov [#allocation4]  }
  0x91   : > { %p3271_p13 = scmp.ne.s32.totalorder %s3702_s18, %s3270_s17  ;;  %s3275_s14 = sshll.u32 %s3454_s15, 4  ;;  %s3276_s14 = int_to_ptr.vmem [resolvable:$false] %s3275_s14 }
  0x92   : > { %s3277_s10 = scalar_lea.vmem %s3276_s14, 8192  ;;  %p3278_p5 = scmp.lt.s32.totalorder %s3702_s18, %s3276_s14 }
  0x93   : > { %p3273_p7 = pnand %p3271_p13, %p3257_p6  ;;  %p3279_p8 = scmp.lt.s32.totalorder %s3277_s10, %s3270_s17 }
  0x95   : > { %p3274_p9 = pneg %p3273_p7  ;;  %p3280_p12 = por %p3279_p8, %p3278_p5 }
  0x97   : > { %p3281_p2 = pnand %p3280_p12, %p3274_p9 }
  0x99   : > { %3284 = shalt.err (!%p3281_p2)
}
  0x9a   : > { %s3455_s1 = smov 128   ;;  %s3456_s3 = smov 8  }
  0x9b   : > { %3023 = dma.hbm_to_vmem [thread:$0]  (!%p3708_p11), %s3700_s2, 4096, %s3702_s18, %s3712_s16, %s3455_s1, %s3455_s1, %s3456_s3  }
  0x9c   : > { %p4500_p6 = scmp.ne.s32.totalorder %s4490_s11, 0 }
  0x9d   : > { %s262_s29 = sand.u32 (!%p4500_p6), 1, %s3423_s22   ;;  %p4501_p10 = scmp.ne.s32.totalorder (!%p4500_p6), %s4486_s8, 0 }
  0x9e   : > { %260 = sbr.rel (%p4500_p6) target bundleno = 780 (0x30c), region = 36  ;;  %s3743_s21 = sshll.u32 (!%p4500_p6), %s262_s29, 8 }
  0x9f   : > { %s263_s7 = scalar_lea.sflag (!%p4500_p6), [#allocation5], %s262_s29  ;;  %s266_s13 = scalar_lea.vmem (!%p4500_p6), [#allocation4], %s3743_s21 }
  0xa5   : > { %3386 = dma.done.wait (%p4501_p10), %s263_s7, 4096  }
  0xa6   : > { %3388 = vsyncadd (%p4501_p10), %s263_s7, 4294963200  ;;  %p4502_p0 = scmp.ne.s32.totalorder %s4485_s6, 0 }
  0xa8   : > { %3390 = dma.done.wait (%p4502_p0), [#allocation8], 32  }
  0xa9   : > { %3392 = vsyncadd (%p4502_p0), [#allocation8], 4294967264 }
  0xaa   : > { %3394 = dma.done.wait (%p4502_p0), [#allocation11], 320  }
  0xab   : > { %3396 = vsyncadd (%p4502_p0), [#allocation11], 4294966976  ;;  %vm316_vm0 = vcmask 24576   ;;  %vm313_vm1 = vcmask 27648   ;;  %s3759_s2 = sand.u32 1, %s3411_s19   ;;  %s2780_s8 = sshll.u32 %s3431_s24, 3 }
  0xac   : > { %vm324_vm2 = vsmask.f32 256  ;;  %s2778_s11 = sshll.u32 %s3759_s2, 7  ;;  %s2779_s18 = sshll.u32 %s3759_s2, 1  ;;  %v3457_v0 = vmov 0  }
  0xad   : > { %314 = vst.msk [vmem:[#allocation2] sm:$0xf] %vm313_vm1, %v3457_v0  ;;  %315 = vst.msk [vmem:[#allocation2 + $0x4] sm:$0xf] %vm313_vm1, %v3457_v0  ;;  %s2928_s6 = sshll.u32 %s3431_s24, 7  ;;  %s3905_s16 = scalar_lea.vmem [#allocation12], %s2778_s11 }
  0xae   : > { %317 = vst.msk [vmem:[#allocation2 + $0x8] sm:$0x1] %vm316_vm0, %v3457_v0  ;;  %321 = vst.msk [vmem:[#allocation2 + $0x74] sm:$0x1] %vm316_vm0, %v3457_v0  ;;  %vm350_vm4 = vsmask.f32 7938  ;;  %s3779_s12 = scalar_lea.vmem %s266_s13, %s2928_s6 [#allocation4] }
  0xaf   : > { %319 = vst.msk [vmem:[#allocation2 + $0x6c] sm:$0xf] %vm313_vm1, %v3457_v0  ;;  %320 = vst.msk [vmem:[#allocation2 + $0x70] sm:$0xf] %vm313_vm1, %v3457_v0  ;;  %v326_v2 = vld [vmem:[#allocation2 + $0xc] sm:$0x1] }
  0xb0   : > { %vm3773_vm3 = vmand %vm316_vm0, %vm324_vm2  ;;  %v329_v3 = vld [vmem:[#allocation2 + $0x18] sm:$0x1]  ;;  %v332_v4 = vld [vmem:[#allocation2 + $0x24] sm:$0x1]  ;;  %vm442_vm6 = vsmask.f32 4368 }
  0xb1   : > { %v327_v5 = vsel %vm3773_vm3, 0, %v326_v2  ;;  %v330_v6 = vsel %vm3773_vm3, 0, %v329_v3  ;;  %v333_v7 = vsel %vm3773_vm3, 0, %v332_v4  ;;  %v335_v8 = vld [vmem:[#allocation2 + $0x30] sm:$0x1]  ;;  %vm3789_vm5 = vmand %vm316_vm0, %vm350_vm4  ;;  %v378_v10 = vld [vmem:[%s3779_s12] sm:$0xff] }
  0xb2   : > { %328 = vst [vmem:[#allocation2 + $0xc] sm:$0x1] %v327_v5  ;;  %331 = vst [vmem:[#allocation2 + $0x18] sm:$0x1] %v330_v6  ;;  %v336_v11 = vsel %vm3773_vm3, 0, %v335_v8  ;;  %v379_v14 = vld [vmem:[%s3779_s12 + $0x8] sm:$0xff]  ;;  %v2929_v23 = vpack.c.bf16 %v378_v10, %v378_v10 }
  0xb3   : > { %334 = vst [vmem:[#allocation2 + $0x24] sm:$0x1] %v333_v7  ;;  %v338_v12 = vld [vmem:[#allocation2 + $0x3c] sm:$0x1]  ;;  %v341_v13 = vld [vmem:[#allocation2 + $0x48] sm:$0x1]  ;;  %v2930_v28 = vpack.c.bf16 %v379_v14, %v379_v14  ;;  %vm3826_vm7 = vmand %vm313_vm1, %vm350_vm4 }
  0xb4   : > { %337 = vst [vmem:[#allocation2 + $0x30] sm:$0x1] %v336_v11  ;;  %v339_v15 = vsel %vm3773_vm3, 0, %v338_v12  ;;  %v342_v16 = vsel %vm3773_vm3, 0, %v341_v13  ;;  %v344_v17 = vld [vmem:[#allocation2 + $0x54] sm:$0x1]  ;;  %vm3833_vm8 = vmor %vm324_vm2, %vm442_vm6 }
  0xb5   : > { %v347_v18 = vld [vmem:[#allocation2 + $0x60] sm:$0x1]  ;;  %340 = vst [vmem:[#allocation2 + $0x3c] sm:$0x1] %v339_v15  ;;  %343 = vst [vmem:[#allocation2 + $0x48] sm:$0x1] %v342_v16 }
  0xb6   : > { %v345_v19 = vsel %vm3773_vm3, 0, %v344_v17  ;;  %v348_v20 = vsel %vm3773_vm3, 0, %v347_v18  ;;  %v352_v21 = vld [vmem:[#allocation2 + $0x14] sm:$0x1]  ;;  %v355_v22 = vld [vmem:[#allocation2 + $0x20] sm:$0x1] }
  0xb7   : > { %346 = vst [vmem:[#allocation2 + $0x54] sm:$0x1] %v345_v19  ;;  %349 = vst [vmem:[#allocation2 + $0x60] sm:$0x1] %v348_v20  ;;  %v353_v24 = vsel %vm3789_vm5, 0, %v352_v21  ;;  %v356_v25 = vsel %vm3789_vm5, 0, %v355_v22 }
  0xb8   : > { %v358_v26 = vld [vmem:[#allocation2 + $0x2c] sm:$0x1]  ;;  %v361_v27 = vld [vmem:[#allocation2 + $0x38] sm:$0x1]  ;;  %354 = vst [vmem:[#allocation2 + $0x14] sm:$0x1] %v353_v24 }
  0xb9   : > { %357 = vst [vmem:[#allocation2 + $0x20] sm:$0x1] %v356_v25  ;;  %v359_v29 = vsel %vm3789_vm5, 0, %v358_v26  ;;  %v362_v30 = vsel %vm3789_vm5, 0, %v361_v27  ;;  %v364_v31 = vld [vmem:[#allocation2 + $0x44] sm:$0x1] }
  0xba   : > { %v367_v32 = vld [vmem:[#allocation2 + $0x50] sm:$0x1]  ;;  %360 = vst [vmem:[#allocation2 + $0x2c] sm:$0x1] %v359_v29  ;;  %363 = vst [vmem:[#allocation2 + $0x38] sm:$0x1] %v362_v30 }
  0xbb   : > { %v365_v33 = vsel %vm3789_vm5, 0, %v364_v31  ;;  %v368_v34 = vsel %vm3789_vm5, 0, %v367_v32  ;;  %v370_v35 = vld [vmem:[#allocation2 + $0x5c] sm:$0x1]  ;;  %v373_v36 = vld [vmem:[#allocation2 + $0x68] sm:$0x1] }
  0xbc   : > { %366 = vst [vmem:[#allocation2 + $0x44] sm:$0x1] %v365_v33  ;;  %369 = vst [vmem:[#allocation2 + $0x50] sm:$0x1] %v368_v34  ;;  %v371_v37 = vsel %vm3789_vm5, 0, %v370_v35  ;;  %v374_v38 = vsel %vm3789_vm5, 0, %v373_v36 }
  0xbd   : > { %v445_v39 = vshrl.u32 %v2929_v23, 16  ;;  %v448_v40 = vshll.u32 %v2929_v23, 16  ;;  %v380_v41 = vld [vmem:[%s3779_s12 + $0x10] sm:$0xff]  ;;  %v381_v42 = vld [vmem:[%s3779_s12 + $0x18] sm:$0xff]  ;;  %372 = vst [vmem:[#allocation2 + $0x5c] sm:$0x1] %v371_v37 }
  0xbe   : > { %375 = vst [vmem:[#allocation2 + $0x68] sm:$0x1] %v374_v38  ;;  %v453_v43 = vshrl.u32 %v2930_v28, 16  ;;  %v456_v44 = vshll.u32 %v2930_v28, 16  ;;  %v2931_v45 = vpack.c.bf16 %v380_v41, %v380_v41  ;;  %v2932_v46 = vpack.c.bf16 %v381_v42, %v381_v42  ;;  %v606_v48 = vld [vmem:[#allocation2 + $0xc] sm:$0xf] }
  0xbf   : > { %v447_v47 = vrot.slane %v445_v39, 7  ;;  %v382_v49 = vld [vmem:[%s3779_s12 + $0x20] sm:$0xff]  ;;  %v383_v55 = vld [vmem:[%s3779_s12 + $0x28] sm:$0xff]  ;;  %v610_v63 = vld [vmem:[#allocation2 + $0x14] sm:$0x1]  ;;  %s3909_s17 = scalar_lea.vmem [#allocation13], %s2779_s18 }
  0xc0   : > { %v455_v51 = vrot.slane %v453_v43, 7  ;;  %v462_v52 = vshrl.u32 %v2931_v45, 16  ;;  %v465_v53 = vshll.u32 %v2931_v45, 16  ;;  %v470_v54 = vshrl.u32 %v2932_v46, 16  ;;  %v613_v4 = vld [vmem:[#allocation2 + $0x18] sm:$0xf] }
  0xc1   : > { %v450_v56 = vor.u32 %v448_v40, %v447_v47  ;;  %v451_v58 = vrot.slane %v447_v47, 4  ;;  %v473_v59 = vshll.u32 %v2932_v46, 16  ;;  %v2933_v60 = vpack.c.bf16 %v382_v49, %v382_v49  ;;  %v384_v8 = vld [vmem:[%s3779_s12 + $0x30] sm:$0xff]  ;;  %v385_v9 = vld [vmem:[%s3779_s12 + $0x38] sm:$0xff]  ;;  %v617_v14 = vld [vmem:[#allocation2 + $0x20] sm:$0x1] }
  0xc2   : > { %v458_v61 = vor.u32 %v456_v44, %v455_v51  ;;  %v460_v62 = vrot.slane %v455_v51, 4  ;;  %v464_v0 = vrot.slane %v462_v52, 7  ;;  %v472_v2 = vrot.slane %v470_v54, 7  ;;  %v620_v20 = vld [vmem:[#allocation2 + $0x24] sm:$0xf]  ;;  %v387_v25 = vld [vmem:[%s3779_s12 + $0x48] sm:$0xff] }
  0xc3   : > { %v607_v3 = vsel %vm3826_vm7, %v450_v56, %v606_v48  ;;  %v479_v5 = vshrl.u32 %v2933_v60, 16  ;;  %v482_v6 = vshll.u32 %v2933_v60, 16  ;;  %v2934_v7 = vpack.c.bf16 %v383_v55, %v383_v55  ;;  %v386_v24 = vld [vmem:[%s3779_s12 + $0x40] sm:$0xff]  ;;  %v624_v35 = vld [vmem:[#allocation2 + $0x2c] sm:$0x1]  ;;  %v388_v44 = vld [vmem:[%s3779_s12 + $0x50] sm:$0xff] }
  0xc4   : > { %608 = vst [vmem:[#allocation2 + $0xc] sm:$0xf] %v607_v3  ;;  %v459_v10 = vsel %vm3833_vm8, %v451_v58, %v458_v61  ;;  %v611_v11 = vsel %vm3773_vm3, %v460_v62, %v610_v63  ;;  %v467_v12 = vor.u32 %v465_v53, %v464_v0  ;;  %v468_v13 = vrot.slane %v464_v0, 4  ;;  %v627_v42 = vld [vmem:[#allocation2 + $0x30] sm:$0xf]  ;;  %v389_v49 = vld [vmem:[%s3779_s12 + $0x58] sm:$0xff] }
  0xc5   : > { %609 = vst.msk [vmem:[#allocation2 + $0x10] sm:$0xf] %vm313_vm1, %v459_v10  ;;  %612 = vst [vmem:[#allocation2 + $0x14] sm:$0x1] %v611_v11  ;;  %v475_v15 = vor.u32 %v473_v59, %v472_v2  ;;  %v477_v16 = vrot.slane %v472_v2, 4  ;;  %v481_v17 = vrot.slane %v479_v5, 7  ;;  %v2935_v22 = vpack.c.bf16 %v384_v8, %v384_v8 }
  0xc6   : > { %v487_v18 = vshrl.u32 %v2934_v7, 16  ;;  %v614_v19 = vsel %vm3826_vm7, %v467_v12, %v613_v4  ;;  %v490_v21 = vshll.u32 %v2934_v7, 16  ;;  %v2936_v23 = vpack.c.bf16 %v385_v9, %v385_v9  ;;  %v390_v51 = vld [vmem:[%s3779_s12 + $0x60] sm:$0xff]  ;;  %v631_v56 = vld [vmem:[#allocation2 + $0x38] sm:$0x1]  ;;  %p2798_p11 = scmp.le.s32.totalorder %s3431_s24, 0 }
  0xc7   : > { %615 = vst [vmem:[#allocation2 + $0x18] sm:$0xf] %v614_v19  ;;  %v476_v26 = vsel %vm3833_vm8, %v468_v13, %v475_v15  ;;  %v618_v27 = vsel %vm3773_vm3, %v477_v16, %v617_v14  ;;  %v484_v28 = vor.u32 %v482_v6, %v481_v17  ;;  %v485_v29 = vrot.slane %v481_v17, 4  ;;  %v634_v63 = vld [vmem:[#allocation2 + $0x3c] sm:$0xf]  ;;  %v391_v13 = vld [vmem:[%s3779_s12 + $0x68] sm:$0xff] }
  0xc8   : > { %616 = vst.msk [vmem:[#allocation2 + $0x1c] sm:$0xf] %vm313_vm1, %v476_v26  ;;  %619 = vst [vmem:[#allocation2 + $0x20] sm:$0x1] %v618_v27  ;;  %v489_v30 = vrot.slane %v487_v18, 7  ;;  %v496_v31 = vshrl.u32 %v2935_v22, 16  ;;  %v2937_v37 = vpack.c.bf16 %v386_v24, %v386_v24  ;;  %v2938_v38 = vpack.c.bf16 %v387_v25, %v387_v25 }
  0xc9   : > { %v499_v32 = vshll.u32 %v2935_v22, 16  ;;  %v504_v33 = vshrl.u32 %v2936_v23, 16  ;;  %v621_v34 = vsel %vm3826_vm7, %v484_v28, %v620_v20  ;;  %v507_v36 = vshll.u32 %v2936_v23, 16  ;;  %v638_v8 = vld [vmem:[#allocation2 + $0x44] sm:$0x1]  ;;  %v392_v14 = vld [vmem:[%s3779_s12 + $0x70] sm:$0xff] }
  0xca   : > { %622 = vst [vmem:[#allocation2 + $0x24] sm:$0xf] %v621_v34  ;;  %v492_v39 = vor.u32 %v490_v21, %v489_v30  ;;  %v494_v40 = vrot.slane %v489_v30, 4  ;;  %v498_v41 = vrot.slane %v496_v31, 7  ;;  %v513_v45 = vshrl.u32 %v2937_v37, 16  ;;  %v393_v19 = vld [vmem:[%s3779_s12 + $0x78] sm:$0xff] }
  0xcb   : > { %v506_v43 = vrot.slane %v504_v33, 7  ;;  %v516_v46 = vshll.u32 %v2937_v37, 16  ;;  %v521_v47 = vshrl.u32 %v2938_v38, 16  ;;  %v524_v48 = vshll.u32 %v2938_v38, 16  ;;  %v641_v24 = vld [vmem:[#allocation2 + $0x48] sm:$0xf] }
  0xcc   : > { %v493_v52 = vsel %vm3833_vm8, %v485_v29, %v492_v39  ;;  %v625_v53 = vsel %vm3773_vm3, %v494_v40, %v624_v35  ;;  %v501_v54 = vor.u32 %v499_v32, %v498_v41  ;;  %v502_v55 = vrot.slane %v498_v41, 4  ;;  %v645_v31 = vld [vmem:[#allocation2 + $0x50] sm:$0x1]  ;;  %v648_v32 = vld [vmem:[#allocation2 + $0x54] sm:$0xf]  ;;  %s2799_s15 = sadd.s32 (!%p2798_p11), 4294967295, %s2780_s8 }
  0xcd   : > { %623 = vst.msk [vmem:[#allocation2 + $0x28] sm:$0xf] %vm313_vm1, %v493_v52  ;;  %626 = vst [vmem:[#allocation2 + $0x2c] sm:$0x1] %v625_v53  ;;  %v509_v58 = vor.u32 %v507_v36, %v506_v43  ;;  %v511_v59 = vrot.slane %v506_v43, 4  ;;  %v515_v60 = vrot.slane %v513_v45, 7  ;;  %v2939_v0 = vpack.c.bf16 %v388_v44, %v388_v44 }
  0xce   : > { %v523_v61 = vrot.slane %v521_v47, 7  ;;  %v628_v62 = vsel %vm3826_vm7, %v501_v54, %v627_v42  ;;  %v2940_v2 = vpack.c.bf16 %v389_v49, %v389_v49  ;;  %v2941_v3 = vpack.c.bf16 %v390_v51, %v390_v51  ;;  %v652_v49 = vld [vmem:[#allocation2 + $0x5c] sm:$0x1]  ;;  %v655_v51 = vld [vmem:[#allocation2 + $0x60] sm:$0xf]  ;;  %s2800_s14 = sshll.u32 (!%p2798_p11), %s2799_s15, 4 }
  0xcf   : > { %629 = vst [vmem:[#allocation2 + $0x30] sm:$0xf] %v628_v62  ;;  %v510_v4 = vsel %vm3833_vm8, %v502_v55, %v509_v58  ;;  %v632_v5 = vsel %vm3773_vm3, %v511_v59, %v631_v56  ;;  %v518_v6 = vor.u32 %v516_v46, %v515_v60  ;;  %v519_v7 = vrot.slane %v515_v60, 4  ;;  %v659_v62 = vld [vmem:[#allocation2 + $0x68] sm:$0x1]  ;;  %s668_s10 = scalar_lea.vmem (!%p2798_p11), %s266_s13, %s2800_s14 [#allocation4] }
  0xd0   : > { %630 = vst.msk [vmem:[#allocation2 + $0x34] sm:$0xf] %vm313_vm1, %v510_v4  ;;  %633 = vst [vmem:[#allocation2 + $0x38] sm:$0x1] %v632_v5  ;;  %v526_v9 = vor.u32 %v524_v48, %v523_v61  ;;  %v528_v10 = vrot.slane %v523_v61, 4  ;;  %v530_v11 = vshrl.u32 %v2939_v0, 16  ;;  %v2942_v27 = vpack.c.bf16 %v391_v13, %v391_v13 }
  0xd1   : > { %v533_v12 = vshll.u32 %v2939_v0, 16  ;;  %v635_v15 = vsel %vm3826_vm7, %v518_v6, %v634_v63  ;;  %v538_v16 = vshrl.u32 %v2940_v2, 16  ;;  %v541_v17 = vshll.u32 %v2940_v2, 16  ;;  %v669_v4 = vld [vmem:[%s668_s10] sm:$0xff] (!%p2798_p11)  ;;  %v670_v5 = vld [vmem:[%s668_s10 + $0x8] sm:$0xff] (!%p2798_p11) }
  0xd2   : > { %v547_v18 = vshrl.u32 %v2941_v3, 16  ;;  %636 = vst [vmem:[#allocation2 + $0x3c] sm:$0xf] %v635_v15  ;;  %v527_v20 = vsel %vm3833_vm8, %v519_v7, %v526_v9  ;;  %v639_v21 = vsel %vm3773_vm3, %v528_v10, %v638_v8  ;;  %v532_v22 = vrot.slane %v530_v11, 7  ;;  %v701_v15 = vld [vmem:[#allocation2 + $0x8] sm:$0x1] (!%p2798_p11) }
  0xd3   : > { %v550_v23 = vshll.u32 %v2941_v3, 16  ;;  %637 = vst.msk [vmem:[#allocation2 + $0x40] sm:$0xf] %vm313_vm1, %v527_v20  ;;  %640 = vst [vmem:[#allocation2 + $0x44] sm:$0x1] %v639_v21  ;;  %v540_v25 = vrot.slane %v538_v16, 7  ;;  %v2943_v28 = vpack.c.bf16 %v392_v14, %v392_v14  ;;  %v2944_v33 = vpack.c.bf16 %v393_v19, %v393_v19 }
  0xd4   : > { %v549_v26 = vrot.slane %v547_v18, 7  ;;  %v535_v29 = vor.u32 %v533_v12, %v532_v22  ;;  %v536_v30 = vrot.slane %v532_v22, 4  ;;  %v555_v38 = vshrl.u32 %v2942_v27, 16  ;;  %v697_v14 = vld [vmem:[#allocation2] sm:$0xf] (!%p2798_p11) }
  0xd5   : > { %v543_v34 = vor.u32 %v541_v17, %v540_v25  ;;  %v545_v35 = vrot.slane %v540_v25, 4  ;;  %v558_v39 = vshll.u32 %v2942_v27, 16  ;;  %v564_v40 = vshrl.u32 %v2943_v28, 16 }
  0xd6   : > { %v552_v36 = vor.u32 %v550_v23, %v549_v26  ;;  %v642_v37 = vsel %vm3826_vm7, %v535_v29, %v641_v24  ;;  %v567_v44 = vshll.u32 %v2943_v28, 16  ;;  %v553_v45 = vrot.slane %v549_v26, 4 }
  0xd7   : > { %643 = vst [vmem:[#allocation2 + $0x48] sm:$0xf] %v642_v37  ;;  %v544_v41 = vsel %vm3833_vm8, %v536_v30, %v543_v34  ;;  %v646_v42 = vsel %vm3773_vm3, %v545_v35, %v645_v31  ;;  %v557_v46 = vrot.slane %v555_v38, 7  ;;  %v566_v47 = vrot.slane %v564_v40, 7 }
  0xd8   : > { %v649_v43 = vsel %vm3826_vm7, %v552_v36, %v648_v32  ;;  %644 = vst.msk [vmem:[#allocation2 + $0x4c] sm:$0xf] %vm313_vm1, %v544_v41  ;;  %647 = vst [vmem:[#allocation2 + $0x50] sm:$0x1] %v646_v42  ;;  %v572_v48 = vshrl.u32 %v2944_v33, 16  ;;  %v575_v52 = vshll.u32 %v2944_v33, 16  ;;  %v2945_v6 = vpack.c.bf16 (!%p2798_p11), %v669_v4, %v669_v4 }
  0xd9   : > { %650 = vst [vmem:[#allocation2 + $0x54] sm:$0xf] %v649_v43  ;;  %v560_v53 = vor.u32 %v558_v39, %v557_v46  ;;  %v562_v54 = vrot.slane %v557_v46, 4  ;;  %v569_v55 = vor.u32 %v567_v44, %v566_v47  ;;  %v570_v56 = vrot.slane %v566_v47, 4  ;;  %665 = sbr.rel (%p2798_p11) target bundleno = 228 (0xe4), region = 56 }
  0xda   : > { %v574_v58 = vrot.slane %v572_v48, 7  ;;  %v2946_v7 = vpack.c.bf16 (!%p2798_p11), %v670_v5, %v670_v5  ;;  %v678_v8 = vshrl.u32 (!%p2798_p11), %v2945_v6, 16  ;;  %v681_v9 = vshll.u32 (!%p2798_p11), %v2945_v6, 16 }
  0xdb   : > { %v561_v59 = vsel %vm3833_vm8, %v553_v45, %v560_v53  ;;  %v653_v60 = vsel %vm3773_vm3, %v562_v54, %v652_v49  ;;  %v656_v61 = vsel %vm3826_vm7, %v569_v55, %v655_v51 }
  0xdc   : > { %651 = vst.msk [vmem:[#allocation2 + $0x58] sm:$0xf] %vm313_vm1, %v561_v59  ;;  %654 = vst [vmem:[#allocation2 + $0x5c] sm:$0x1] %v653_v60  ;;  %v577_v63 = vor.u32 %v575_v52, %v574_v58  ;;  %v579_v0 = vrot.slane %v574_v58, 4  ;;  %v686_v10 = vshrl.u32 (!%p2798_p11), %v2946_v7, 16 }
  0xdd   : > { %657 = vst [vmem:[#allocation2 + $0x60] sm:$0xf] %v656_v61  ;;  %v689_v11 = vshll.u32 (!%p2798_p11), %v2946_v7, 16  ;;  %v680_v12 = vrot.slane (!%p2798_p11), %v678_v8, 7 }
  0xde   : > { %v578_v2 = vsel %vm3833_vm8, %v570_v56, %v577_v63  ;;  %v660_v3 = vsel %vm3773_vm3, %v579_v0, %v659_v62  ;;  %v688_v13 = vrot.slane (!%p2798_p11), %v686_v10, 7 }
  0xdf   : > { %658 = vst.msk [vmem:[#allocation2 + $0x64] sm:$0xf] %vm313_vm1, %v578_v2  ;;  %661 = vst [vmem:[#allocation2 + $0x68] sm:$0x1] %v660_v3  ;;  %v683_v16 = vor.u32 (!%p2798_p11), %v681_v9, %v680_v12  ;;  %v684_v17 = vrot.slane (!%p2798_p11), %v680_v12, 4 }
  0xe0   : > { %v691_v18 = vor.u32 %v689_v11, %v688_v13  ;;  %v693_v19 = vrot.slane %v688_v13, 4 }
  0xe1   : > { %v698_v20 = vsel %vm3826_vm7, %v683_v16, %v697_v14 }
  0xe2   : > { %v692_v21 = vsel %vm3833_vm8, %v684_v17, %v691_v18  ;;  %v702_v22 = vsel %vm3773_vm3, %v693_v19, %v701_v15  ;;  %699 = vst [vmem:[#allocation2] sm:$0xf] %v698_v20 }
  0xe3   : > { %700 = vst.msk [vmem:[#allocation2 + $0x4] sm:$0xf] %vm313_vm1, %v692_v21  ;;  %703 = vst [vmem:[#allocation2 + $0x8] sm:$0x1] %v702_v22 }
  0xe4 PF: > { %p2803_p4 = scmp.ge.s32.totalorder %s3431_s24, 1 }
  0xe5   : > { %v2806_v23 = vld [vmem:[%s3779_s12 + $0x80] sm:$0xff] (!%p2803_p4)  ;;  %v2807_v24 = vld [vmem:[%s3779_s12 + $0x88] sm:$0xff] (!%p2803_p4)  ;;  %v743_v34 = vld [vmem:[#allocation2 + $0x74] sm:$0x1] (!%p2803_p4) }
  0xe6   : > { %707 = sbr.rel (%p2803_p4) target bundleno = 241 (0xf1), region = 60  ;;  %v2948_v25 = vpack.c.bf16 (!%p2803_p4), %v2806_v23, %v2806_v23  ;;  %v2949_v26 = vpack.c.bf16 (!%p2803_p4), %v2807_v24, %v2807_v24  ;;  %v739_v33 = vld [vmem:[#allocation2 + $0x6c] sm:$0xf] (!%p2803_p4) }
  0xe8   : > { %v720_v27 = vshrl.u32 (!%p2803_p4), %v2948_v25, 16  ;;  %v723_v28 = vshll.u32 (!%p2803_p4), %v2948_v25, 16  ;;  %v728_v29 = vshrl.u32 (!%p2803_p4), %v2949_v26, 16  ;;  %v731_v30 = vshll.u32 (!%p2803_p4), %v2949_v26, 16 }
  0xea   : > { %v722_v31 = vrot.slane (!%p2803_p4), %v720_v27, 7  ;;  %v730_v32 = vrot.slane (!%p2803_p4), %v728_v29, 7 }
  0xec   : > { %v725_v35 = vor.u32 (!%p2803_p4), %v723_v28, %v722_v31  ;;  %v726_v36 = vrot.slane (!%p2803_p4), %v722_v31, 4  ;;  %v733_v37 = vor.u32 (!%p2803_p4), %v731_v30, %v730_v32  ;;  %v735_v38 = vrot.slane (!%p2803_p4), %v730_v32, 4 }
  0xee   : > { %v740_v39 = vsel %vm3826_vm7, %v725_v35, %v739_v33  ;;  %v734_v40 = vsel %vm3833_vm8, %v726_v36, %v733_v37  ;;  %v744_v41 = vsel %vm3773_vm3, %v735_v38, %v743_v34 }
  0xef   : > { %741 = vst [vmem:[#allocation2 + $0x6c] sm:$0xf] %v740_v39  ;;  %742 = vst.msk [vmem:[#allocation2 + $0x70] sm:$0xf] %vm313_vm1, %v734_v40 }
  0xf0   : > { %745 = vst [vmem:[#allocation2 + $0x74] sm:$0x1] %v744_v41 }
  0xf1 PF: > { %v3144_v42 = vld [vmem:[#allocation2 + $0xc] sm:$0xff]   ;;  %v3145_v43 = vld [vmem:[#allocation2 + $0x18] sm:$0xff]   ;;  %s3458_s1 = smov 12   ;;  %v819_v44 = vld [vmem:[#allocation2] sm:$0xf]  ;;  %vm1143_vm11 = vcmask 1042432  }
  0xf2   : > { %1315 = vrot.lane.b32.xlu0 %v3144_v42, %s3458_s1  ;;  %v820_v45 = vld [vmem:[#allocation2 + $0x4] sm:$0xf]  ;;  %v821_v50 = vld [vmem:[#allocation2 + $0x8] sm:$0x1]  ;;  %1317 = vrot.lane.b32.xlu1 %v3145_v43, %s3458_s1  ;;  %vm843_vm9 = vsmask.f32 3328 }
  0xf3   : > { %vm844_vm10 = vsmask.f32 7440  ;;  %v847_v57 = vshrl.u32 %v819_v44, 16  ;;  %v850_v1 = vshll.u32 %v819_v44, 16  ;;  %v856_v46 = vshll.u32 %v820_v45, 16  ;;  %s3459_s3 = smov 8  }
  0xf4   : > { %v860_v47 = vshrl.u32 %v820_v45, 16  ;;  %v866_v48 = vshll.u32 %v821_v50, 16  ;;  %v1095_v49 = vld [vmem:[#allocation2] sm:$0xe]  ;;  %v1096_v53 = vld [vmem:[#allocation2 + $0x4] sm:$0xf]  ;;  %vm3941_vm14 = vmor %vm843_vm9, %vm844_vm10 }
  0xf5   : > { %v849_v51 = vrot.slane %v847_v57, 4  ;;  %v852_v52 = vrot.slane %v850_v1, 5  ;;  %v1097_v54 = vld [vmem:[#allocation2 + $0x8] sm:$0x1]  ;;  %v858_v55 = vrot.slane %v856_v46, 5  ;;  %vm1144_vm12 = vcmask 1046532  }
  0xf6   : > { %v862_v56 = vrot.slane %v860_v47, 4  ;;  %v868_v58 = vrot.slane %v866_v48, 5  ;;  %vm3935_vm13 = vmor %vm1143_vm11, %vm1144_vm12  ;;  %v2826_v61 = vrot.slane %v1095_v49, 9  ;;  %v1148_v62 = vrot.slane %v1096_v53, 5  ;;  %v822_v0 = vld [vmem:[#allocation2 + $0xc] sm:$0xf] }
  0xf7   : > { %v853_v59 = vor.u32 %v852_v52, %v849_v51  ;;  %v1151_v63 = vrot.slane %v1097_v54, 5  ;;  %v823_v4 = vld [vmem:[#allocation2 + $0x10] sm:$0xf]  ;;  %v824_v5 = vld [vmem:[#allocation2 + $0x14] sm:$0x1]  ;;  %v871_v6 = vshrl.u32 %v822_v0, 16 }
  0xf8   : > { %v863_v3 = vor.u32 %v862_v56, %v858_v55  ;;  %v874_v7 = vshll.u32 %v822_v0, 16  ;;  %v1149_v9 = vsel %vm3935_vm13, %v2826_v61, %v1148_v62  ;;  %v1150_v10 = vrot.slane %v1148_v62, 4  ;;  %v1098_v12 = vld [vmem:[#allocation2 + $0xc] sm:$0xe]  ;;  %v1099_v17 = vld [vmem:[#allocation2 + $0x10] sm:$0xf] }
  0xf9   : > { %v854_v8 = vrot.slane %v853_v59, 4  ;;  %v880_v11 = vshll.u32 %v823_v4, 16  ;;  %v873_v14 = vrot.slane %v871_v6, 4  ;;  %v884_v16 = vshrl.u32 %v823_v4, 16  ;;  %v1100_v22 = vld [vmem:[#allocation2 + $0x14] sm:$0x1] }
  0xfa   : > { %v864_v13 = vrot.slane %v863_v3, 4  ;;  %v876_v15 = vrot.slane %v874_v7, 5  ;;  %v1152_v19 = vsel %vm3935_vm13, %v1150_v10, %v1151_v63  ;;  %v890_v21 = vshll.u32 %v824_v5, 16  ;;  %v1348_v23 = vld [vmem:[#allocation2 + $0xc] sm:$0xf]  ;;  %s3460_s29 = smov 4  }
  0xfb   : > { %v859_v18 = vsel %vm3941_vm14, %v854_v8, %v858_v55  ;;  %v882_v20 = vrot.slane %v880_v11, 5  ;;  %v2834_v25 = vcombine.low %v1149_v9, %v1152_v19  ;;  %v886_v27 = vrot.slane %v884_v16, 4  ;;  %v1349_v28 = vld [vmem:[#allocation2 + $0x10] sm:$0xf]  ;;  %v1350_v36 = vld [vmem:[#allocation2 + $0x14] sm:$0x1] }
  0xfc   : > { %v869_v24 = vsel %vm3941_vm14, %v864_v13, %v868_v58  ;;  %v877_v26 = vor.u32 %v876_v15, %v873_v14  ;;  %v892_v30 = vrot.slane %v890_v21, 5  ;;  %v2827_v31 = vrot.slane %v1098_v12, 9  ;;  %v1351_v42 = vld [vmem:[#allocation2 + $0x18] sm:$0xf]  ;;  %v1352_v48 = vld [vmem:[#allocation2 + $0x1c] sm:$0xf] }
  0xfd   : > { %v2818_v29 = vcombine.low %v859_v18, %v869_v24  ;;  %v1155_v32 = vrot.slane %v1099_v17, 5  ;;  %1226 = vrot.lane.b32.xlu1 %v2834_v25, %s3459_s3  ;;  %v887_v34 = vor.u32 %v886_v27, %v882_v20  ;;  %v1158_v35 = vrot.slane %v1100_v22, 5  ;;  %v1353_v53 = vld [vmem:[#allocation2 + $0x20] sm:$0x1]  ;;  %v1621_v55 = vld [vmem:[#allocation2 + $0xc] sm:$0xe] }
  0xfe   : > { %v878_v33 = vrot.slane %v877_v26, 4  ;;  %v1373_v37 = vshrl.u32 %v1348_v23, 16  ;;  %v1376_v40 = vshll.u32 %v1348_v23, 16  ;;  %v1382_v41 = vshll.u32 %v1349_v28, 16  ;;  %v1622_v62 = vld [vmem:[#allocation2 + $0x10] sm:$0xf] }
  0xff   : > { %1062 = vrot.lane.b32.xlu0 %v2818_v29, %s3460_s29  ;;  %v1156_v38 = vsel %vm3935_vm13, %v2827_v31, %v1155_v32  ;;  %v1157_v39 = vrot.slane %v1155_v32, 4  ;;  %v888_v44 = vrot.slane %v887_v34, 4  ;;  %v1386_v50 = vshrl.u32 %v1349_v28, 16  ;;  %v1623_v63 = vld [vmem:[#allocation2 + $0x14] sm:$0x1]  ;;  %s3461_s21 = smov 16  }
 0x100   : > { %v883_v43 = vsel %vm3941_vm14, %v878_v33, %v882_v20  ;;  %v1375_v45 = vrot.slane %v1373_v37, 4  ;;  %v1378_v1 = vrot.slane %v1376_v40, 5  ;;  %v1384_v46 = vrot.slane %v1382_v41, 5  ;;  %v1624_v6 = vld [vmem:[#allocation2 + $0x18] sm:$0xe]  ;;  %s3462_s7 = smov 20  }
 0x101   : > { %v1159_v57 = vsel %vm3935_vm13, %v1157_v39, %v1158_v35  ;;  %v1392_v47 = vshll.u32 %v1350_v36, 16  ;;  %v893_v49 = vsel %vm3941_vm14, %v888_v44, %v892_v30  ;;  %v1388_v52 = vrot.slane %v1386_v50, 4  ;;  %v1625_v7 = vld [vmem:[#allocation2 + $0x1c] sm:$0xf]  ;;  %v1626_v12 = vld [vmem:[#allocation2 + $0x20] sm:$0x1] }
 0x102   : > { %v2835_v51 = vcombine.low %v1156_v38, %v1159_v57  ;;  %v1397_v54 = vshrl.u32 %v1351_v42, 16  ;;  %v2819_v56 = vcombine.low %v883_v43, %v893_v49  ;;  %v1379_v58 = vor.u32 %v1378_v1, %v1375_v45  ;;  %v1872_v21 = vld [vmem:[#allocation2 + $0x18] sm:$0xf]  ;;  %v1873_v30 = vld [vmem:[#allocation2 + $0x1c] sm:$0xf]  ;;  %s3463_s13 = smov 24  }
 0x103   : > { %v1394_v59 = vrot.slane %v1392_v47, 5  ;;  %v1400_v61 = vshll.u32 %v1351_v42, 16  ;;  %v1389_v0 = vor.u32 %v1388_v52, %v1384_v46  ;;  %v1406_v4 = vshll.u32 %v1352_v48, 16  ;;  %v1874_v34 = vld [vmem:[#allocation2 + $0x20] sm:$0x1]  ;;  %s3464_s8 = smov 28  }
 0x104   : > { %1228 = vrot.lane.b32.xlu1 %v2835_v51, %s3459_s3  ;;  %v1399_v3 = vrot.slane %v1397_v54, 4  ;;  %v1410_v5 = vshrl.u32 %v1352_v48, 16  ;;  %1064 = vrot.lane.b32.xlu0 %v2819_v56, %s3460_s29  ;;  %v1380_v8 = vrot.slane %v1379_v58, 4  ;;  %v1416_v10 = vshll.u32 %v1353_v53, 16  ;;  %v1875_v40 = vld [vmem:[#allocation2 + $0x24] sm:$0xf] }
 0x105   : > { %v1402_v9 = vrot.slane %v1400_v61, 5  ;;  %v2858_v11 = vrot.slane %v1621_v55, 9  ;;  %v1390_v13 = vrot.slane %v1389_v0, 4  ;;  %v1408_v14 = vrot.slane %v1406_v4, 5  ;;  %v1876_v45 = vld [vmem:[#allocation2 + $0x28] sm:$0xf] }
 0x106   : > { %v1412_v15 = vrot.slane %v1410_v5, 4  ;;  %v1671_v16 = vrot.slane %v1622_v62, 5  ;;  %v1385_v17 = vsel %vm3941_vm14, %v1380_v8, %v1384_v46  ;;  %v1418_v19 = vrot.slane %v1416_v10, 5  ;;  %v1877_v47 = vld [vmem:[#allocation2 + $0x2c] sm:$0x1]  ;;  %v3146_v51 = vld [vmem:[#allocation2 + $0x18] sm:$0xff]  }
 0x107   : > { %v1403_v18 = vor.u32 %v1402_v9, %v1399_v3  ;;  %v1674_v20 = vrot.slane %v1623_v63, 5  ;;  %v1395_v22 = vsel %vm3941_vm14, %v1390_v13, %v1394_v59  ;;  %v2859_v28 = vrot.slane %v1624_v6, 9  ;;  %v2145_v48 = vld [vmem:[#allocation2 + $0x18] sm:$0xe]  ;;  %v2146_v55 = vld [vmem:[#allocation2 + $0x1c] sm:$0xf] }
 0x108   : > { %v1413_v23 = vor.u32 %v1412_v15, %v1408_v14  ;;  %v1672_v24 = vsel %vm3935_vm13, %v2858_v11, %v1671_v16  ;;  %v1673_v25 = vrot.slane %v1671_v16, 4  ;;  %v2850_v26 = vcombine.low %v1385_v17, %v1395_v22  ;;  %v2147_v62 = vld [vmem:[#allocation2 + $0x20] sm:$0x1]  ;;  %v825_v5 = vld [vmem:[#allocation2 + $0x18] sm:$0xf]  ;;  %s3465_s11 = smov 32  }
 0x109   : > { %v1404_v27 = vrot.slane %v1403_v18, 4  ;;  %v1678_v29 = vrot.slane %v1625_v7, 5  ;;  %v1681_v33 = vrot.slane %v1626_v12, 5  ;;  %v1897_v35 = vshrl.u32 %v1872_v21, 16  ;;  %v826_v18 = vld [vmem:[#allocation2 + $0x1c] sm:$0xf] }
 0x10a   : > { %v1414_v31 = vrot.slane %v1413_v23, 4  ;;  %v1675_v32 = vsel %vm3935_vm13, %v1673_v25, %v1674_v20  ;;  %1588 = vrot.lane.b32.xlu0 %v2850_v26, %s3461_s21  ;;  %v1900_v43 = vshll.u32 %v1872_v21, 16  ;;  %v1906_v44 = vshll.u32 %v1873_v30, 16  ;;  %s2950_s18 = sshll.u32 %s3431_s24, 4  ;;  %s2921_s6 = sshll.u32 %s3435_s25, 5 }
 0x10b   : > { %v1409_v36 = vsel %vm3941_vm14, %v1404_v27, %v1408_v14  ;;  %v2866_v37 = vcombine.low %v1672_v24, %v1675_v32  ;;  %v1679_v38 = vsel %vm3935_vm13, %v2859_v28, %v1678_v29  ;;  %v1680_v39 = vrot.slane %v1678_v29, 4  ;;  %v3147_v14 = vld [vmem:[#allocation2 + $0x24] sm:$0xff]   ;;  %v827_v24 = vld [vmem:[#allocation2 + $0x20] sm:$0x1]  ;;  %s2587_s12 = sadd.s32 %s2950_s18, %s2921_s6  ;;  %s2590_s15 = sshll.u32 %s3905_s16, 4  ;;  %s4344_s15 = int_to_ptr.vmem [resolvable:$true] %s2590_s15 }
 0x10c   : > { %v1419_v41 = vsel %vm3941_vm14, %v1414_v31, %v1418_v19  ;;  %v1899_v42 = vrot.slane %v1897_v35, 4  ;;  %v1910_v1 = vshrl.u32 %v1873_v30, 16  ;;  %v1916_v46 = vshll.u32 %v1874_v34, 16  ;;  %v2148_v29 = vld [vmem:[#allocation2 + $0x24] sm:$0xe]  ;;  %s2922_s14 = sshll.u32 %s2587_s12, 7 }
 0x10d   : > { %v2851_v50 = vcombine.low %v1409_v36, %v1419_v41  ;;  %v1682_v57 = vsel %vm3935_vm13, %v1680_v39, %v1681_v33  ;;  %v1902_v52 = vrot.slane %v1900_v43, 5  ;;  %v1908_v53 = vrot.slane %v1906_v44, 5  ;;  %v2149_v34 = vld [vmem:[#allocation2 + $0x28] sm:$0xf]  ;;  %v2150_v35 = vld [vmem:[#allocation2 + $0x2c] sm:$0x1] }
 0x10e   : > { %v2867_v49 = vcombine.low %v1679_v38, %v1682_v57  ;;  %v1921_v54 = vshrl.u32 %v1875_v40, 16  ;;  %1749 = vrot.lane.b32.xlu0 %v2866_v37, %s3462_s7  ;;  %v1912_v56 = vrot.slane %v1910_v1, 4  ;;  %v1918_v58 = vrot.slane %v1916_v46, 5  ;;  %v829_v41 = vld [vmem:[#allocation2 + $0x28] sm:$0xf]  ;;  %v3162_v57 = vld [vmem:[#allocation10] sm:$0xff]  }
 0x10f   : > { %1590 = vrot.lane.b32.xlu1 %v2851_v50, %s3461_s21  ;;  %v1924_v59 = vshll.u32 %v1875_v40, 16  ;;  %v1930_v61 = vshll.u32 %v1876_v45, 16  ;;  %v1903_v63 = vor.u32 %v1902_v52, %v1899_v42  ;;  %v1934_v3 = vshrl.u32 %v1876_v45, 16  ;;  %v828_v40 = vld [vmem:[#allocation2 + $0x24] sm:$0xf]  ;;  %2962 = vmatprep.subr.bf16.mxu0 %v3162_v57  ;;  %p4516_p3 = scmp.ne.s32.totalorder %s4487_s9, 0 }
 0x110   : > { %v1923_v0 = vrot.slane %v1921_v54, 4  ;;  %v1940_v4 = vshll.u32 %v1877_v47, 16  ;;  %v1913_v6 = vor.u32 %v1912_v56, %v1908_v53  ;;  %v2890_v9 = vrot.slane %v2145_v48, 9  ;;  %v830_v50 = vld [vmem:[#allocation2 + $0x2c] sm:$0x1]  ;;  %2984 = vmatprep.subr.bf16.mxu1 %v3162_v57  ;;  %2963 = vmatpush3.bf16.msra.mxu0 %v3162_v57 }
 0x111   : > { %v1926_v7 = vrot.slane %v1924_v59, 5  ;;  %v1932_v8 = vrot.slane %v1930_v61, 5  ;;  %v1904_v10 = vrot.slane %v1903_v63, 4  ;;  %v1936_v11 = vrot.slane %v1934_v3, 4  ;;  %v1101_v59 = vld [vmem:[#allocation2 + $0x18] sm:$0xe]  ;;  %2987 = vmatpush3.bf16.msra.mxu1 %v3162_v57 }
 0x112   : > { %v1942_v12 = vrot.slane %v1940_v4, 5  ;;  %v2195_v13 = vrot.slane %v2146_v55, 5  ;;  %1839 = vrot.lane.b32.xlu0 %v3146_v51, %s3463_s13  ;;  %v1914_v15 = vrot.slane %v1913_v6, 4  ;;  %v2198_v17 = vrot.slane %v2147_v62, 5  ;;  %v1102_v3 = vld [vmem:[#allocation2 + $0x1c] sm:$0xf] }
 0x113   : > { %1751 = vrot.lane.b32.xlu1 %v2867_v49, %s3462_s7  ;;  %v1927_v16 = vor.u32 %v1926_v7, %v1923_v0  ;;  %v895_v19 = vshrl.u32 %v825_v5, 16  ;;  %v1909_v20 = vsel %vm3941_vm14, %v1904_v10, %v1908_v53  ;;  %v1937_v21 = vor.u32 %v1936_v11, %v1932_v8 }
 0x114   : > { %v2196_v22 = vsel %vm3935_vm13, %v2890_v9, %v2195_v13  ;;  %v2197_v23 = vrot.slane %v2195_v13, 4  ;;  %v1919_v25 = vsel %vm3941_vm14, %v1914_v15, %v1918_v58  ;;  %v898_v28 = vshll.u32 %v825_v5, 16  ;;  %v1104_v9 = vld [vmem:[#allocation2 + $0x24] sm:$0xe]  ;;  %v1106_v15 = vld [vmem:[#allocation2 + $0x2c] sm:$0x1] }
 0x115   : > { %v1928_v26 = vrot.slane %v1927_v16, 4  ;;  %v897_v27 = vrot.slane %v895_v19, 4  ;;  %v2882_v30 = vcombine.low %v1909_v20, %v1919_v25  ;;  %v1938_v31 = vrot.slane %v1937_v21, 4  ;;  %v1354_v20 = vld [vmem:[#allocation2 + $0x24] sm:$0xf] }
 0x116   : > { %v2199_v32 = vsel %vm3935_vm13, %v2197_v23, %v2198_v17  ;;  %v904_v33 = vshll.u32 %v826_v18, 16  ;;  %v900_v38 = vrot.slane %v898_v28, 5  ;;  %v908_v39 = vshrl.u32 %v826_v18, 16  ;;  %v1355_v25 = vld [vmem:[#allocation2 + $0x28] sm:$0xf] }
 0x117   : > { %1841 = vrot.lane.b32.xlu1 %v3147_v14, %s3463_s13  ;;  %v1933_v36 = vsel %vm3941_vm14, %v1928_v26, %v1932_v8  ;;  %v2898_v37 = vcombine.low %v2196_v22, %v2199_v32  ;;  %2112 = vrot.lane.b32.xlu0 %v2882_v30, %s3464_s8  ;;  %v1943_v42 = vsel %vm3941_vm14, %v1938_v31, %v1942_v12  ;;  %v914_v44 = vshll.u32 %v827_v24, 16  ;;  %v1103_v8 = vld [vmem:[#allocation2 + $0x20] sm:$0x1]  ;;  %v1105_v14 = vld [vmem:[#allocation2 + $0x28] sm:$0xf] }
 0x118   : > { %v906_v43 = vrot.slane %v904_v33, 5  ;;  %v2891_v45 = vrot.slane %v2148_v29, 9  ;;  %v2883_v1 = vcombine.low %v1933_v36, %v1943_v42  ;;  %v901_v46 = vor.u32 %v900_v38, %v897_v27  ;;  %v1356_v30 = vld [vmem:[#allocation2 + $0x2c] sm:$0x1]  ;;  %v1357_v31 = vld [vmem:[#allocation2 + $0x30] sm:$0xf] }
 0x119   : > { %v910_v47 = vrot.slane %v908_v39, 4  ;;  %v2202_v48 = vrot.slane %v2149_v34, 5  ;;  %v916_v49 = vrot.slane %v914_v44, 5  ;;  %v2205_v51 = vrot.slane %v2150_v35, 5  ;;  %v3164_v32 = vld [vmem:[#allocation10 + $0x8] sm:$0xff]  }
 0x11a   : > { %v919_v52 = vshrl.u32 %v828_v40, 16  ;;  %v922_v53 = vshll.u32 %v828_v40, 16  ;;  %v902_v54 = vrot.slane %v901_v46, 4  ;;  %v928_v63 = vshll.u32 %v829_v41, 16  ;;  %v1359_v42 = vld [vmem:[#allocation2 + $0x38] sm:$0x1]  ;;  %2964 = vmatprep.subr.bf16.mxu0 %v3164_v32  ;;  %2985 = vmatprep.subr.bf16.mxu1 %v3164_v32 }
 0x11b   : > { %2114 = vrot.lane.b32.xlu1 %v2883_v1, %s3464_s8  ;;  %v911_v55 = vor.u32 %v910_v47, %v906_v43  ;;  %v2203_v56 = vsel %vm3935_vm13, %v2891_v45, %v2202_v48  ;;  %v2204_v58 = vrot.slane %v2202_v48, 4  ;;  %2273 = vrot.lane.b32.xlu0 %v2898_v37, %s3465_s11  ;;  %v932_v0 = vshrl.u32 %v829_v41, 16  ;;  %v1358_v37 = vld [vmem:[#allocation2 + $0x34] sm:$0xf]  ;;  %v1627_v48 = vld [vmem:[#allocation2 + $0x24] sm:$0xe] }
 0x11c   : > { %v921_v61 = vrot.slane %v919_v52, 4  ;;  %v924_v62 = vrot.slane %v922_v53, 5  ;;  %v907_v4 = vsel %vm3941_vm14, %v902_v54, %v906_v43  ;;  %v938_v7 = vshll.u32 %v830_v50, 16  ;;  %2965 = vmatpush3.bf16.msra.mxu0 %v3164_v32  ;;  %2988 = vmatpush3.bf16.msra.mxu1 %v3164_v32 }
 0x11d   : > { %v912_v5 = vrot.slane %v911_v55, 4  ;;  %v2206_v6 = vsel %vm3935_vm13, %v2204_v58, %v2205_v51  ;;  %v930_v12 = vrot.slane %v928_v63, 5  ;;  %v934_v13 = vrot.slane %v932_v0, 4  ;;  %v3148_v51 = vld [vmem:[#allocation2 + $0x24] sm:$0xff]  }
 0x11e   : > { %v2899_v10 = vcombine.low %v2203_v56, %v2206_v6  ;;  %v925_v11 = vor.u32 %v924_v62, %v921_v61  ;;  %v940_v17 = vrot.slane %v938_v7, 5  ;;  %v2828_v18 = vrot.slane %v1101_v59, 9  ;;  %v1628_v55 = vld [vmem:[#allocation2 + $0x28] sm:$0xf]  ;;  %v1629_v62 = vld [vmem:[#allocation2 + $0x2c] sm:$0x1] }
 0x11f   : > { %v917_v16 = vsel %vm3941_vm14, %v912_v5, %v916_v49  ;;  %v1162_v19 = vrot.slane %v1102_v3, 5  ;;  %v935_v23 = vor.u32 %v934_v13, %v930_v12  ;;  %v1165_v24 = vrot.slane %v1103_v8, 5  ;;  %v1630_v5 = vld [vmem:[#allocation2 + $0x30] sm:$0xe] }
 0x120   : > { %v2820_v21 = vcombine.low %v907_v4, %v917_v16  ;;  %2275 = vrot.lane.b32.xlu0 %v2899_v10, %s3465_s11  ;;  %v926_v22 = vrot.slane %v925_v11, 4  ;;  %v2829_v28 = vrot.slane %v1104_v9, 9  ;;  %v1169_v29 = vrot.slane %v1105_v14, 5  ;;  %v1631_v10 = vld [vmem:[#allocation2 + $0x34] sm:$0xf] }
 0x121   : > { %v1163_v26 = vsel %vm3935_vm13, %v2828_v18, %v1162_v19  ;;  %v1164_v27 = vrot.slane %v1162_v19, 4  ;;  %v936_v34 = vrot.slane %v935_v23, 4  ;;  %v1172_v35 = vrot.slane %v1106_v15, 5  ;;  %v1632_v15 = vld [vmem:[#allocation2 + $0x38] sm:$0x1]  ;;  %v3149_v16 = vld [vmem:[#allocation2 + $0x30] sm:$0xff]  }
 0x122   : > { %1066 = vrot.lane.b32.xlu1 %v2820_v21, %s3460_s29  ;;  %v931_v33 = vsel %vm3941_vm14, %v926_v22, %v930_v12  ;;  %v1421_v36 = vshrl.u32 %v1354_v20, 16  ;;  %v1170_v39 = vsel %vm3935_vm13, %v2829_v28, %v1169_v29  ;;  %v1171_v40 = vrot.slane %v1169_v29, 4  ;;  %v1878_v21 = vld [vmem:[#allocation2 + $0x30] sm:$0xf] }
 0x123   : > { %v1166_v38 = vsel %vm3935_vm13, %v1164_v27, %v1165_v24  ;;  %v1424_v41 = vshll.u32 %v1354_v20, 16  ;;  %v941_v43 = vsel %vm3941_vm14, %v936_v34, %v940_v17  ;;  %v1430_v50 = vshll.u32 %v1355_v25, 16  ;;  %v1880_v34 = vld [vmem:[#allocation2 + $0x38] sm:$0x1] }
 0x124   : > { %v2836_v44 = vcombine.low %v1163_v26, %v1166_v38  ;;  %v1423_v45 = vrot.slane %v1421_v36, 4  ;;  %v2821_v57 = vcombine.low %v931_v33, %v941_v43  ;;  %v1173_v1 = vsel %vm3935_vm13, %v1171_v40, %v1172_v35  ;;  %v1881_v40 = vld [vmem:[#allocation2 + $0x3c] sm:$0xf] }
 0x125   : > { %v1426_v46 = vrot.slane %v1424_v41, 5  ;;  %v1434_v47 = vshrl.u32 %v1355_v25, 16  ;;  %v2837_v49 = vcombine.low %v1170_v39, %v1173_v1  ;;  %v1432_v52 = vrot.slane %v1430_v50, 5 }
 0x126   : > { %1230 = vrot.lane.b32.xlu0 %v2836_v44, %s3459_s3  ;;  %v1440_v53 = vshll.u32 %v1356_v30, 16  ;;  %v1445_v54 = vshrl.u32 %v1357_v31, 16  ;;  %1068 = vrot.lane.b32.xlu1 %v2821_v57, %s3460_s29  ;;  %v1448_v59 = vshll.u32 %v1357_v31, 16  ;;  %v1454_v61 = vshll.u32 %v1358_v37, 16  ;;  %v1879_v30 = vld [vmem:[#allocation2 + $0x34] sm:$0xf] }
 0x127   : > { %v1427_v56 = vor.u32 %v1426_v46, %v1423_v45  ;;  %v1436_v58 = vrot.slane %v1434_v47, 4  ;;  %v1458_v3 = vshrl.u32 %v1358_v37, 16  ;;  %v1464_v4 = vshll.u32 %v1359_v42, 16  ;;  %v1882_v45 = vld [vmem:[#allocation2 + $0x40] sm:$0xf] }
 0x128   : > { %v1442_v63 = vrot.slane %v1440_v53, 5  ;;  %v1447_v0 = vrot.slane %v1445_v54, 4  ;;  %v1450_v8 = vrot.slane %v1448_v59, 5  ;;  %v1456_v9 = vrot.slane %v1454_v61, 5  ;;  %v1883_v47 = vld [vmem:[#allocation2 + $0x44] sm:$0x1] }
 0x129   : > { %v1428_v6 = vrot.slane %v1427_v56, 4  ;;  %v1437_v7 = vor.u32 %v1436_v58, %v1432_v52  ;;  %v1460_v11 = vrot.slane %v1458_v3, 4  ;;  %v1466_v12 = vrot.slane %v1464_v4, 5  ;;  %v2152_v54 = vld [vmem:[#allocation2 + $0x34] sm:$0xf] }
 0x12a   : > { %1319 = vrot.lane.b32.xlu0 %v3148_v51, %s3458_s1  ;;  %v2860_v13 = vrot.slane %v1627_v48, 9  ;;  %v1685_v14 = vrot.slane %v1628_v55, 5  ;;  %1232 = vrot.lane.b32.xlu1 %v2837_v49, %s3459_s3  ;;  %v1451_v19 = vor.u32 %v1450_v8, %v1447_v0  ;;  %v1688_v20 = vrot.slane %v1629_v62, 5  ;;  %v2151_v48 = vld [vmem:[#allocation2 + $0x30] sm:$0xe] }
 0x12b   : > { %v1433_v17 = vsel %vm3941_vm14, %v1428_v6, %v1432_v52  ;;  %v1438_v18 = vrot.slane %v1437_v7, 4  ;;  %v1461_v22 = vor.u32 %v1460_v11, %v1456_v9  ;;  %v2861_v25 = vrot.slane %v1630_v5, 9  ;;  %v2153_v61 = vld [vmem:[#allocation2 + $0x38] sm:$0x1]  ;;  %v3150_v62 = vld [vmem:[#allocation2 + $0x30] sm:$0xff]  }
 0x12c   : > { %v1686_v23 = vsel %vm3935_vm13, %v2860_v13, %v1685_v14  ;;  %v1687_v24 = vrot.slane %v1685_v14, 4  ;;  %v1452_v27 = vrot.slane %v1451_v19, 4  ;;  %v1692_v28 = vrot.slane %v1631_v10, 5  ;;  %v831_v5 = vld [vmem:[#allocation2 + $0x30] sm:$0xf] }
 0x12d   : > { %v1443_v26 = vsel %vm3941_vm14, %v1438_v18, %v1442_v63  ;;  %v1695_v29 = vrot.slane %v1632_v15, 5  ;;  %v1462_v32 = vrot.slane %v1461_v22, 4  ;;  %v1945_v35 = vshrl.u32 %v1878_v21, 16  ;;  %v832_v14 = vld [vmem:[#allocation2 + $0x34] sm:$0xf]  ;;  %v3151_v15 = vld [vmem:[#allocation2 + $0x3c] sm:$0xff]  }
 0x12e   : > { %v2852_v31 = vcombine.low %v1433_v17, %v1443_v26  ;;  %v1689_v33 = vsel %vm3935_vm13, %v1687_v24, %v1688_v20  ;;  %1321 = vrot.lane.b32.xlu1 %v3149_v16, %s3458_s1  ;;  %v1457_v36 = vsel %vm3941_vm14, %v1452_v27, %v1456_v9  ;;  %v1693_v38 = vsel %vm3935_vm13, %v2861_v25, %v1692_v28  ;;  %v833_v19 = vld [vmem:[#allocation2 + $0x38] sm:$0x1] }
 0x12f   : > { %v2868_v37 = vcombine.low %v1686_v23, %v1689_v33  ;;  %v1694_v39 = vrot.slane %v1692_v28, 4  ;;  %v1467_v41 = vsel %vm3941_vm14, %v1462_v32, %v1466_v12  ;;  %v1947_v42 = vrot.slane %v1945_v35, 4 }
 0x130   : > { %1592 = vrot.lane.b32.xlu0 %v2852_v31, %s3461_s21  ;;  %v1948_v43 = vshll.u32 %v1878_v21, 16  ;;  %v1954_v44 = vshll.u32 %v1879_v30, 16  ;;  %v2853_v50 = vcombine.low %v1457_v36, %v1467_v41  ;;  %v1958_v1 = vshrl.u32 %v1879_v30, 16  ;;  %v2154_v21 = vld [vmem:[#allocation2 + $0x3c] sm:$0xe] }
 0x131   : > { %v1696_v57 = vsel %vm3935_vm13, %v1694_v39, %v1695_v29  ;;  %v1964_v46 = vshll.u32 %v1880_v34, 16  ;;  %v1969_v53 = vshrl.u32 %v1881_v40, 16  ;;  %v1972_v58 = vshll.u32 %v1881_v40, 16  ;;  %v2155_v34 = vld [vmem:[#allocation2 + $0x40] sm:$0xf] }
 0x132   : > { %v2869_v49 = vcombine.low %v1693_v38, %v1696_v57  ;;  %v1950_v51 = vrot.slane %v1948_v43, 5  ;;  %v1956_v52 = vrot.slane %v1954_v44, 5  ;;  %1594 = vrot.lane.b32.xlu1 %v2853_v50, %s3461_s21  ;;  %v1960_v55 = vrot.slane %v1958_v1, 4  ;;  %v2156_v39 = vld [vmem:[#allocation2 + $0x44] sm:$0x1] }
 0x133   : > { %v1966_v56 = vrot.slane %v1964_v46, 5  ;;  %v1978_v59 = vshll.u32 %v1882_v45, 16  ;;  %v1971_v0 = vrot.slane %v1969_v53, 4  ;;  %v1982_v3 = vshrl.u32 %v1882_v45, 16  ;;  %v834_v40 = vld [vmem:[#allocation2 + $0x3c] sm:$0xf] }
 0x134   : > { %1753 = vrot.lane.b32.xlu0 %v2868_v37, %s3462_s7  ;;  %v1951_v63 = vor.u32 %v1950_v51, %v1947_v42  ;;  %v1988_v4 = vshll.u32 %v1883_v47, 16  ;;  %v1961_v6 = vor.u32 %v1960_v55, %v1956_v52  ;;  %v1974_v7 = vrot.slane %v1972_v58, 5  ;;  %v835_v46 = vld [vmem:[#allocation2 + $0x40] sm:$0xf]  ;;  %v836_v47 = vld [vmem:[#allocation2 + $0x44] sm:$0x1] }
 0x135   : > { %v1980_v8 = vrot.slane %v1978_v59, 5  ;;  %v2892_v9 = vrot.slane %v2151_v48, 9  ;;  %v1984_v11 = vrot.slane %v1982_v3, 4  ;;  %v2209_v13 = vrot.slane %v2152_v54, 5  ;;  %v1107_v53 = vld [vmem:[#allocation2 + $0x30] sm:$0xe] }
 0x136   : > { %v1952_v10 = vrot.slane %v1951_v63, 4  ;;  %v1990_v12 = vrot.slane %v1988_v4, 5  ;;  %1755 = vrot.lane.b32.xlu1 %v2869_v49, %s3462_s7  ;;  %v1962_v16 = vrot.slane %v1961_v6, 4  ;;  %v1975_v17 = vor.u32 %v1974_v7, %v1971_v0  ;;  %v1108_v59 = vld [vmem:[#allocation2 + $0x34] sm:$0xf] }
 0x137   : > { %v2212_v18 = vrot.slane %v2153_v61, 5  ;;  %v943_v20 = vshrl.u32 %v831_v5, 16  ;;  %v1985_v23 = vor.u32 %v1984_v11, %v1980_v8  ;;  %v2210_v24 = vsel %vm3935_vm13, %v2892_v9, %v2209_v13  ;;  %v1109_v61 = vld [vmem:[#allocation2 + $0x38] sm:$0x1]  ;;  %v1110_v4 = vld [vmem:[#allocation2 + $0x3c] sm:$0xe] }
 0x138   : > { %1843 = vrot.lane.b32.xlu0 %v3150_v62, %s3463_s13  ;;  %v1957_v22 = vsel %vm3941_vm14, %v1952_v10, %v1956_v52  ;;  %v2211_v25 = vrot.slane %v2209_v13, 4  ;;  %v1967_v26 = vsel %vm3941_vm14, %v1962_v16, %v1966_v56  ;;  %v1976_v27 = vrot.slane %v1975_v17, 4  ;;  %v1112_v10 = vld [vmem:[#allocation2 + $0x44] sm:$0x1]  ;;  %v1360_v11 = vld [vmem:[#allocation2 + $0x3c] sm:$0xf] }
 0x139   : > { %v945_v28 = vrot.slane %v943_v20, 4  ;;  %v946_v29 = vshll.u32 %v831_v5, 16  ;;  %v2884_v30 = vcombine.low %v1957_v22, %v1967_v26  ;;  %v1986_v31 = vrot.slane %v1985_v23, 4  ;;  %v1111_v5 = vld [vmem:[#allocation2 + $0x40] sm:$0xf] }
 0x13a   : > { %v2213_v32 = vsel %vm3935_vm13, %v2211_v25, %v2212_v18  ;;  %v952_v33 = vshll.u32 %v832_v14, 16  ;;  %1845 = vrot.lane.b32.xlu1 %v3151_v15, %s3463_s13  ;;  %v1981_v35 = vsel %vm3941_vm14, %v1976_v27, %v1980_v8  ;;  %v956_v38 = vshrl.u32 %v832_v14, 16 }
 0x13b   : > { %v2900_v36 = vcombine.low %v2210_v24, %v2213_v32  ;;  %v948_v37 = vrot.slane %v946_v29, 5  ;;  %v1991_v41 = vsel %vm3941_vm14, %v1986_v31, %v1990_v12  ;;  %v962_v43 = vshll.u32 %v833_v19, 16 }
 0x13c   : > { %2116 = vrot.lane.b32.xlu0 %v2884_v30, %s3464_s8  ;;  %v954_v42 = vrot.slane %v952_v33, 5  ;;  %v2893_v44 = vrot.slane %v2154_v21, 9  ;;  %v2885_v45 = vcombine.low %v1981_v35, %v1991_v41  ;;  %v958_v57 = vrot.slane %v956_v38, 4  ;;  %v1363_v38 = vld [vmem:[#allocation2 + $0x48] sm:$0xf] }
 0x13d   : > { %v949_v50 = vor.u32 %v948_v37, %v945_v28  ;;  %v2216_v1 = vrot.slane %v2155_v34, 5  ;;  %v964_v48 = vrot.slane %v962_v43, 5  ;;  %v2219_v49 = vrot.slane %v2156_v39, 5  ;;  %v1361_v28 = vld [vmem:[#allocation2 + $0x40] sm:$0xf] }
 0x13e   : > { %v967_v51 = vshrl.u32 %v834_v40, 16  ;;  %v970_v52 = vshll.u32 %v834_v40, 16  ;;  %2118 = vrot.lane.b32.xlu1 %v2885_v45, %s3464_s8  ;;  %v959_v55 = vor.u32 %v958_v57, %v954_v42  ;;  %v976_v0 = vshll.u32 %v835_v46, 16  ;;  %v1364_v43 = vld [vmem:[#allocation2 + $0x4c] sm:$0xf] }
 0x13f   : > { %v950_v54 = vrot.slane %v949_v50, 4  ;;  %v2217_v56 = vsel %vm3935_vm13, %v2893_v44, %v2216_v1  ;;  %v2218_v58 = vrot.slane %v2216_v1, 4  ;;  %v980_v3 = vshrl.u32 %v835_v46, 16  ;;  %v1365_v1 = vld [vmem:[#allocation2 + $0x50] sm:$0x1] }
 0x140   : > { %2277 = vrot.lane.b32.xlu0 %v2900_v36, %s3465_s11  ;;  %v969_v62 = vrot.slane %v967_v51, 4  ;;  %v972_v63 = vrot.slane %v970_v52, 5  ;;  %v960_v7 = vrot.slane %v959_v55, 4  ;;  %v986_v9 = vshll.u32 %v836_v47, 16  ;;  %v1362_v36 = vld [vmem:[#allocation2 + $0x44] sm:$0x1] }
 0x141   : > { %v955_v6 = vsel %vm3941_vm14, %v950_v54, %v954_v42  ;;  %v2220_v8 = vsel %vm3935_vm13, %v2218_v58, %v2219_v49  ;;  %v978_v14 = vrot.slane %v976_v0, 5  ;;  %v982_v15 = vrot.slane %v980_v3, 4  ;;  %v1633_v46 = vld [vmem:[#allocation2 + $0x3c] sm:$0xe]  ;;  %v1636_v3 = vld [vmem:[#allocation2 + $0x48] sm:$0xe] }
 0x142   : > { %v2901_v12 = vcombine.low %v2217_v56, %v2220_v8  ;;  %v973_v13 = vor.u32 %v972_v63, %v969_v62  ;;  %v965_v16 = vsel %vm3941_vm14, %v960_v7, %v964_v48  ;;  %v988_v17 = vrot.slane %v986_v9, 5  ;;  %v3152_v48 = vld [vmem:[#allocation2 + $0x3c] sm:$0xff]   ;;  %v1637_v8 = vld [vmem:[#allocation2 + $0x4c] sm:$0xf] }
 0x143   : > { %v2830_v18 = vrot.slane %v1107_v53, 9  ;;  %v1176_v19 = vrot.slane %v1108_v59, 5  ;;  %v2822_v20 = vcombine.low %v955_v6, %v965_v16  ;;  %v983_v22 = vor.u32 %v982_v15, %v978_v14  ;;  %v1634_v53 = vld [vmem:[#allocation2 + $0x40] sm:$0xf]  ;;  %v1635_v59 = vld [vmem:[#allocation2 + $0x44] sm:$0x1] }
 0x144   : > { %2279 = vrot.lane.b32.xlu0 %v2901_v12, %s3465_s11  ;;  %v974_v21 = vrot.slane %v973_v13, 4  ;;  %v1179_v23 = vrot.slane %v1109_v61, 5  ;;  %v2831_v26 = vrot.slane %v1110_v4, 9  ;;  %v1183_v27 = vrot.slane %v1111_v5, 5  ;;  %v1638_v13 = vld [vmem:[#allocation2 + $0x50] sm:$0x1] }
 0x145   : > { %v1177_v24 = vsel %vm3935_vm13, %v2830_v18, %v1176_v19  ;;  %v1178_v25 = vrot.slane %v1176_v19, 4  ;;  %1070 = vrot.lane.b32.xlu1 %v2822_v20, %s3460_s29  ;;  %v984_v30 = vrot.slane %v983_v22, 4  ;;  %v1186_v31 = vrot.slane %v1112_v10, 5  ;;  %v1884_v19 = vld [vmem:[#allocation2 + $0x48] sm:$0xf] }
 0x146   : > { %v979_v29 = vsel %vm3941_vm14, %v974_v21, %v978_v14  ;;  %v1469_v32 = vshrl.u32 %v1360_v11, 16  ;;  %v1184_v34 = vsel %vm3935_vm13, %v2831_v26, %v1183_v27  ;;  %v1185_v35 = vrot.slane %v1183_v27, 4  ;;  %v3153_v14 = vld [vmem:[#allocation2 + $0x48] sm:$0xff]  }
 0x147   : > { %v1180_v33 = vsel %vm3935_vm13, %v1178_v25, %v1179_v23  ;;  %v1472_v37 = vshll.u32 %v1360_v11, 16  ;;  %v989_v39 = vsel %vm3941_vm14, %v984_v30, %v988_v17  ;;  %v1478_v42 = vshll.u32 %v1361_v28, 16 }
 0x148   : > { %v2838_v40 = vcombine.low %v1177_v24, %v1180_v33  ;;  %v1471_v41 = vrot.slane %v1469_v32, 4  ;;  %v2823_v44 = vcombine.low %v979_v29, %v989_v39  ;;  %v1187_v45 = vsel %vm3935_vm13, %v1185_v35, %v1186_v31  ;;  %v1886_v32 = vld [vmem:[#allocation2 + $0x50] sm:$0x1]  ;;  %v1888_v39 = vld [vmem:[#allocation2 + $0x58] sm:$0xf] }
 0x149   : > { %v1474_v50 = vrot.slane %v1472_v37, 5  ;;  %v1482_v57 = vshrl.u32 %v1361_v28, 16  ;;  %v2839_v47 = vcombine.low %v1184_v34, %v1187_v45  ;;  %v1480_v49 = vrot.slane %v1478_v42, 5  ;;  %v1885_v28 = vld [vmem:[#allocation2 + $0x4c] sm:$0xf] }
 0x14a   : > { %1234 = vrot.lane.b32.xlu0 %v2838_v40, %s3459_s3  ;;  %v1488_v51 = vshll.u32 %v1362_v36, 16  ;;  %v1493_v52 = vshrl.u32 %v1363_v38, 16  ;;  %1072 = vrot.lane.b32.xlu1 %v2823_v44, %s3460_s29  ;;  %v1496_v56 = vshll.u32 %v1363_v38, 16  ;;  %v1502_v58 = vshll.u32 %v1364_v43, 16  ;;  %v1887_v34 = vld [vmem:[#allocation2 + $0x54] sm:$0xf] }
 0x14b   : > { %v1475_v54 = vor.u32 %v1474_v50, %v1471_v41  ;;  %v1484_v55 = vrot.slane %v1482_v57, 4  ;;  %v1506_v63 = vshrl.u32 %v1364_v43, 16  ;;  %v1512_v0 = vshll.u32 %v1365_v1, 16  ;;  %v1889_v40 = vld [vmem:[#allocation2 + $0x5c] sm:$0x1] }
 0x14c   : > { %v1490_v61 = vrot.slane %v1488_v51, 5  ;;  %v1495_v62 = vrot.slane %v1493_v52, 4  ;;  %v1498_v6 = vrot.slane %v1496_v56, 5  ;;  %v1504_v7 = vrot.slane %v1502_v58, 5  ;;  %v2157_v45 = vld [vmem:[#allocation2 + $0x48] sm:$0xe] }
 0x14d   : > { %v1476_v4 = vrot.slane %v1475_v54, 4  ;;  %v1485_v5 = vor.u32 %v1484_v55, %v1480_v49  ;;  %v1508_v9 = vrot.slane %v1506_v63, 4  ;;  %v1514_v10 = vrot.slane %v1512_v0, 5 }
 0x14e   : > { %1323 = vrot.lane.b32.xlu0 %v3152_v48, %s3458_s1  ;;  %v2862_v11 = vrot.slane %v1633_v46, 9  ;;  %v1699_v12 = vrot.slane %v1634_v53, 5  ;;  %1236 = vrot.lane.b32.xlu1 %v2839_v47, %s3459_s3  ;;  %v1499_v17 = vor.u32 %v1498_v6, %v1495_v62  ;;  %v1702_v18 = vrot.slane %v1635_v59, 5  ;;  %v2158_v47 = vld [vmem:[#allocation2 + $0x4c] sm:$0xf] }
 0x14f   : > { %v1481_v15 = vsel %vm3941_vm14, %v1476_v4, %v1480_v49  ;;  %v1486_v16 = vrot.slane %v1485_v5, 4  ;;  %v1509_v20 = vor.u32 %v1508_v9, %v1504_v7  ;;  %v2863_v23 = vrot.slane %v1636_v3, 9  ;;  %v2159_v53 = vld [vmem:[#allocation2 + $0x50] sm:$0x1]  ;;  %v3154_v59 = vld [vmem:[#allocation2 + $0x48] sm:$0xff]  }
 0x150   : > { %v1700_v21 = vsel %vm3935_vm13, %v2862_v11, %v1699_v12  ;;  %v1701_v22 = vrot.slane %v1699_v12, 4  ;;  %v1500_v25 = vrot.slane %v1499_v17, 4  ;;  %v1706_v26 = vrot.slane %v1637_v8, 5  ;;  %v837_v3 = vld [vmem:[#allocation2 + $0x48] sm:$0xf]  ;;  %v3155_v12 = vld [vmem:[#allocation2 + $0x54] sm:$0xff]  }
 0x151   : > { %v1491_v24 = vsel %vm3941_vm14, %v1486_v16, %v1490_v61  ;;  %v1709_v27 = vrot.slane %v1638_v13, 5  ;;  %v1510_v30 = vrot.slane %v1509_v20, 4  ;;  %v1993_v33 = vshrl.u32 %v1884_v19, 16  ;;  %v838_v16 = vld [vmem:[#allocation2 + $0x4c] sm:$0xf] }
 0x152   : > { %v2854_v29 = vcombine.low %v1481_v15, %v1491_v24  ;;  %v1703_v31 = vsel %vm3935_vm13, %v1701_v22, %v1702_v18  ;;  %1325 = vrot.lane.b32.xlu1 %v3153_v14, %s3458_s1  ;;  %v1505_v35 = vsel %vm3941_vm14, %v1500_v25, %v1504_v7  ;;  %v1707_v37 = vsel %vm3935_vm13, %v2863_v23, %v1706_v26  ;;  %v839_v22 = vld [vmem:[#allocation2 + $0x50] sm:$0x1] }
 0x153   : > { %v2870_v36 = vcombine.low %v1700_v21, %v1703_v31  ;;  %v1708_v38 = vrot.slane %v1706_v26, 4  ;;  %v1515_v41 = vsel %vm3941_vm14, %v1510_v30, %v1514_v10  ;;  %v1995_v42 = vrot.slane %v1993_v33, 4  ;;  %v2162_v33 = vld [vmem:[#allocation2 + $0x5c] sm:$0x1] }
 0x154   : > { %1596 = vrot.lane.b32.xlu0 %v2854_v29, %s3461_s21  ;;  %v1996_v43 = vshll.u32 %v1884_v19, 16  ;;  %v2002_v44 = vshll.u32 %v1885_v28, 16  ;;  %v2855_v50 = vcombine.low %v1505_v35, %v1515_v41  ;;  %v2006_v1 = vshrl.u32 %v1885_v28, 16 }
 0x155   : > { %v1710_v57 = vsel %vm3935_vm13, %v1708_v38, %v1709_v27  ;;  %v2012_v46 = vshll.u32 %v1886_v32, 16  ;;  %v2017_v52 = vshrl.u32 %v1887_v34, 16  ;;  %v2020_v56 = vshll.u32 %v1887_v34, 16  ;;  %v2160_v27 = vld [vmem:[#allocation2 + $0x54] sm:$0xe] }
 0x156   : > { %v2871_v48 = vcombine.low %v1707_v37, %v1710_v57  ;;  %v1998_v49 = vrot.slane %v1996_v43, 5  ;;  %v2004_v51 = vrot.slane %v2002_v44, 5  ;;  %1598 = vrot.lane.b32.xlu1 %v2855_v50, %s3461_s21  ;;  %v2008_v54 = vrot.slane %v2006_v1, 4  ;;  %v2161_v32 = vld [vmem:[#allocation2 + $0x58] sm:$0xf] }
 0x157   : > { %v2014_v55 = vrot.slane %v2012_v46, 5  ;;  %v2026_v58 = vshll.u32 %v1888_v39, 16  ;;  %v2019_v62 = vrot.slane %v2017_v52, 4  ;;  %v2030_v63 = vshrl.u32 %v1888_v39, 16  ;;  %v840_v38 = vld [vmem:[#allocation2 + $0x54] sm:$0xf] }
 0x158   : > { %1757 = vrot.lane.b32.xlu0 %v2870_v36, %s3462_s7  ;;  %v1999_v61 = vor.u32 %v1998_v49, %v1995_v42  ;;  %v2036_v0 = vshll.u32 %v1889_v40, 16  ;;  %v2009_v4 = vor.u32 %v2008_v54, %v2004_v51  ;;  %v2022_v5 = vrot.slane %v2020_v56, 5  ;;  %v841_v39 = vld [vmem:[#allocation2 + $0x58] sm:$0xf]  ;;  %v842_v44 = vld [vmem:[#allocation2 + $0x5c] sm:$0x1] }
 0x159   : > { %v2028_v6 = vrot.slane %v2026_v58, 5  ;;  %v2894_v7 = vrot.slane %v2157_v45, 9  ;;  %v2032_v9 = vrot.slane %v2030_v63, 4  ;;  %v2223_v11 = vrot.slane %v2158_v47, 5  ;;  %v1114_v52 = vld [vmem:[#allocation2 + $0x4c] sm:$0xf] }
 0x15a   : > { %v2000_v8 = vrot.slane %v1999_v61, 4  ;;  %v2038_v10 = vrot.slane %v2036_v0, 5  ;;  %1759 = vrot.lane.b32.xlu1 %v2871_v48, %s3462_s7  ;;  %v2010_v13 = vrot.slane %v2009_v4, 4  ;;  %v2023_v14 = vor.u32 %v2022_v5, %v2019_v62  ;;  %v1115_v5 = vld [vmem:[#allocation2 + $0x50] sm:$0x1] }
 0x15b   : > { %v2226_v15 = vrot.slane %v2159_v53, 5  ;;  %v991_v17 = vshrl.u32 %v837_v3, 16  ;;  %v2033_v19 = vor.u32 %v2032_v9, %v2028_v6  ;;  %v2224_v20 = vsel %vm3935_vm13, %v2894_v7, %v2223_v11 }
 0x15c   : > { %1847 = vrot.lane.b32.xlu0 %v3154_v59, %s3463_s13  ;;  %v2005_v18 = vsel %vm3941_vm14, %v2000_v8, %v2004_v51  ;;  %v2225_v21 = vrot.slane %v2223_v11, 4  ;;  %v2015_v23 = vsel %vm3941_vm14, %v2010_v13, %v2014_v55  ;;  %v2024_v24 = vrot.slane %v2023_v14, 4  ;;  %v1113_v51 = vld [vmem:[#allocation2 + $0x48] sm:$0xe]  ;;  %v1117_v11 = vld [vmem:[#allocation2 + $0x58] sm:$0xf] }
 0x15d   : > { %v993_v25 = vrot.slane %v991_v17, 4  ;;  %v994_v26 = vshll.u32 %v837_v3, 16  ;;  %v2886_v28 = vcombine.low %v2005_v18, %v2015_v23  ;;  %v2034_v29 = vrot.slane %v2033_v19, 4  ;;  %v1366_v17 = vld [vmem:[#allocation2 + $0x54] sm:$0xf] }
 0x15e   : > { %v2227_v30 = vsel %vm3935_vm13, %v2225_v21, %v2226_v15  ;;  %v1000_v31 = vshll.u32 %v838_v16, 16  ;;  %1849 = vrot.lane.b32.xlu1 %v3155_v12, %s3463_s13  ;;  %v2029_v34 = vsel %vm3941_vm14, %v2024_v24, %v2028_v6  ;;  %v1004_v37 = vshrl.u32 %v838_v16, 16  ;;  %v1116_v6 = vld [vmem:[#allocation2 + $0x54] sm:$0xe]  ;;  %v1118_v12 = vld [vmem:[#allocation2 + $0x5c] sm:$0x1] }
 0x15f   : > { %v2902_v35 = vcombine.low %v2224_v20, %v2227_v30  ;;  %v996_v36 = vrot.slane %v994_v26, 5  ;;  %v2039_v40 = vsel %vm3941_vm14, %v2034_v29, %v2038_v10  ;;  %v1010_v42 = vshll.u32 %v839_v22, 16  ;;  %v1367_v22 = vld [vmem:[#allocation2 + $0x58] sm:$0xf] }
 0x160   : > { %2120 = vrot.lane.b32.xlu0 %v2886_v28, %s3464_s8  ;;  %v1002_v41 = vrot.slane %v1000_v31, 5  ;;  %v2895_v43 = vrot.slane %v2160_v27, 9  ;;  %v2887_v45 = vcombine.low %v2029_v34, %v2039_v40  ;;  %v1006_v57 = vrot.slane %v1004_v37, 4  ;;  %v1368_v34 = vld [vmem:[#allocation2 + $0x5c] sm:$0x1] }
 0x161   : > { %v997_v50 = vor.u32 %v996_v36, %v993_v25  ;;  %v2230_v1 = vrot.slane %v2161_v32, 5  ;;  %v1012_v46 = vrot.slane %v1010_v42, 5  ;;  %v2233_v47 = vrot.slane %v2162_v33, 5  ;;  %v1369_v36 = vld [vmem:[#allocation2 + $0x60] sm:$0xf] }
 0x162   : > { %v1015_v48 = vshrl.u32 %v840_v38, 16  ;;  %v1018_v49 = vshll.u32 %v840_v38, 16  ;;  %2122 = vrot.lane.b32.xlu1 %v2887_v45, %s3464_s8  ;;  %v1007_v54 = vor.u32 %v1006_v57, %v1002_v41  ;;  %v1024_v61 = vshll.u32 %v841_v39, 16  ;;  %v1370_v42 = vld [vmem:[#allocation2 + $0x64] sm:$0xf] }
 0x163   : > { %v998_v53 = vrot.slane %v997_v50, 4  ;;  %v2231_v55 = vsel %vm3935_vm13, %v2895_v43, %v2230_v1  ;;  %v2232_v56 = vrot.slane %v2230_v1, 4  ;;  %v1028_v62 = vshrl.u32 %v841_v39, 16  ;;  %v1371_v43 = vld [vmem:[#allocation2 + $0x68] sm:$0x1] }
 0x164   : > { %2281 = vrot.lane.b32.xlu0 %v2902_v35, %s3465_s11  ;;  %v1017_v58 = vrot.slane %v1015_v48, 4  ;;  %v1020_v59 = vrot.slane %v1018_v49, 5  ;;  %v1008_v0 = vrot.slane %v1007_v54, 4  ;;  %v1034_v4 = vshll.u32 %v842_v44, 16  ;;  %v4148_v37 = vpop.permute.xlu0 %1315  ;;  %v4152_v44 = vpop.permute.xlu1 %1317  ;;  %v3156_v49 = vld [vmem:[#allocation2 + $0x54] sm:$0xff]  }
 0x165   : > { %v1003_v63 = vsel %vm3941_vm14, %v998_v53, %v1002_v41  ;;  %v2234_v3 = vsel %vm3935_vm13, %v2232_v56, %v2233_v47  ;;  %v1026_v9 = vrot.slane %v1024_v61, 5  ;;  %v1030_v10 = vrot.slane %v1028_v62, 4  ;;  %v1640_v47 = vld [vmem:[#allocation2 + $0x58] sm:$0xf]  ;;  %v1641_v54 = vld [vmem:[#allocation2 + $0x5c] sm:$0x1] }
 0x166   : > { %v2903_v7 = vcombine.low %v2231_v55, %v2234_v3  ;;  %v1021_v8 = vor.u32 %v1020_v59, %v1017_v58  ;;  %v1013_v13 = vsel %vm3941_vm14, %v1008_v0, %v1012_v46  ;;  %v1036_v14 = vrot.slane %v1034_v4, 5  ;;  %v1639_v46 = vld [vmem:[#allocation2 + $0x54] sm:$0xe]  ;;  %v1642_v61 = vld [vmem:[#allocation2 + $0x60] sm:$0xe] }
 0x167   : > { %v2832_v15 = vrot.slane %v1113_v51, 9  ;;  %v1190_v16 = vrot.slane %v1114_v52, 5  ;;  %v2824_v18 = vcombine.low %v1003_v63, %v1013_v13  ;;  %v1031_v20 = vor.u32 %v1030_v10, %v1026_v9  ;;  %v1643_v4 = vld [vmem:[#allocation2 + $0x64] sm:$0xf] }
 0x168   : > { %2283 = vrot.lane.b32.xlu0 %v2903_v7, %s3465_s11  ;;  %v1022_v19 = vrot.slane %v1021_v8, 4  ;;  %v1193_v21 = vrot.slane %v1115_v5, 5  ;;  %v2833_v25 = vrot.slane %v1116_v6, 9  ;;  %v1197_v26 = vrot.slane %v1117_v11, 5  ;;  %v1644_v5 = vld [vmem:[#allocation2 + $0x68] sm:$0x1] }
 0x169   : > { %v1191_v23 = vsel %vm3935_vm13, %v2832_v15, %v1190_v16  ;;  %v1192_v24 = vrot.slane %v1190_v16, 4  ;;  %1074 = vrot.lane.b32.xlu1 %v2824_v18, %s3460_s29  ;;  %v1032_v28 = vrot.slane %v1031_v20, 4  ;;  %v1200_v29 = vrot.slane %v1118_v12, 5  ;;  %v3157_v6 = vld [vmem:[#allocation2 + $0x60] sm:$0xff]  }
 0x16a   : > { %v1027_v27 = vsel %vm3941_vm14, %v1022_v19, %v1026_v9  ;;  %v1517_v30 = vshrl.u32 %v1366_v17, 16  ;;  %v1198_v32 = vsel %vm3935_vm13, %v2833_v25, %v1197_v26  ;;  %v1199_v33 = vrot.slane %v1197_v26, 4  ;;  %v3165_v25 = vld [vmem:[#allocation2 + $0x24] sm:$0xff]   ;;  %v3167_v26 = vld [vmem:[#allocation2 + $0x30] sm:$0xff]  }
 0x16b   : > { %v1194_v31 = vsel %vm3935_vm13, %v1192_v24, %v1193_v21  ;;  %v1520_v35 = vshll.u32 %v1366_v17, 16  ;;  %v1037_v38 = vsel %vm3941_vm14, %v1032_v28, %v1036_v14  ;;  %v1526_v41 = vshll.u32 %v1367_v22, 16  ;;  %v3160_v21 = vld [vmem:[#allocation2] sm:$0xff]   ;;  %v3163_v24 = vld [vmem:[#allocation2 + $0x18] sm:$0xff]   ;;  %v3169_v28 = vld [vmem:[#allocation2 + $0x48] sm:$0xff]  }
 0x16c   : > { %v2840_v39 = vcombine.low %v1191_v23, %v1194_v31  ;;  %v1519_v40 = vrot.slane %v1517_v30, 4  ;;  %v2825_v45 = vcombine.low %v1027_v27, %v1037_v38  ;;  %v1201_v50 = vsel %vm3935_vm13, %v1199_v33, %v1200_v29  ;;  %v3161_v23 = vld [vmem:[#allocation2 + $0xc] sm:$0xff]   ;;  %v3168_v27 = vld [vmem:[#allocation2 + $0x3c] sm:$0xff]   ;;  %v1891_v33 = vld [vmem:[#allocation2 + $0x64] sm:$0xf] }
 0x16d   : > { %v1522_v57 = vrot.slane %v1520_v35, 5  ;;  %v1530_v1 = vshrl.u32 %v1367_v22, 16  ;;  %v2841_v48 = vcombine.low %v1198_v32, %v1201_v50  ;;  %v1528_v51 = vrot.slane %v1526_v41, 5  ;;  %v1890_v22 = vld [vmem:[#allocation2 + $0x60] sm:$0xf] }
 0x16e   : > { %1238 = vrot.lane.b32.xlu0 %v2840_v39, %s3459_s3  ;;  %v1536_v52 = vshll.u32 %v1368_v34, 16  ;;  %v1541_v53 = vshrl.u32 %v1369_v36, 16  ;;  %1076 = vrot.lane.b32.xlu1 %v2825_v45, %s3460_s29  ;;  %v1544_v58 = vshll.u32 %v1369_v36, 16  ;;  %v1550_v59 = vshll.u32 %v1370_v42, 16  ;;  %v1892_v39 = vld [vmem:[#allocation2 + $0x68] sm:$0x1] }
 0x16f   : > { %v1523_v55 = vor.u32 %v1522_v57, %v1519_v40  ;;  %v1532_v56 = vrot.slane %v1530_v1, 4  ;;  %v1554_v0 = vshrl.u32 %v1370_v42, 16  ;;  %v1560_v3 = vshll.u32 %v1371_v43, 16  ;;  %v4161_v16 = vpop.permute.xlu1 %1226  ;;  %v3170_v40 = vld [vmem:[#allocation2 + $0x54] sm:$0xff]   ;;  %v1893_v45 = vld [vmem:[#allocation2 + $0x6c] sm:$0xf] }
 0x170   : > { %v1538_v62 = vrot.slane %v1536_v52, 5  ;;  %v1543_v63 = vrot.slane %v1541_v53, 4  ;;  %v1546_v9 = vrot.slane %v1544_v58, 5  ;;  %v1552_v10 = vrot.slane %v1550_v59, 5  ;;  %v1895_v52 = vld [vmem:[#allocation2 + $0x74] sm:$0x1] }
 0x171   : > { %v1524_v7 = vrot.slane %v1523_v55, 4  ;;  %v1533_v8 = vor.u32 %v1532_v56, %v1528_v51  ;;  %v4158_v11 = vpop.permute.xlu0 %1062  ;;  %v1556_v12 = vrot.slane %v1554_v0, 4  ;;  %v1562_v13 = vrot.slane %v1560_v3, 5  ;;  %v2163_v3 = vld [vmem:[#allocation2 + $0x60] sm:$0xe]  ;;  %s4515_s29 = sld [smem:[#allocation26_spill]] }
 0x172   : > { %1327 = vrot.lane.b32.xlu0 %v3156_v49, %s3458_s1  ;;  %v2864_v14 = vrot.slane %v1639_v46, 9  ;;  %v1713_v15 = vrot.slane %v1640_v47, 5  ;;  %1240 = vrot.lane.b32.xlu1 %v2841_v48, %s3459_s3  ;;  %v1547_v19 = vor.u32 %v1546_v9, %v1543_v63  ;;  %v1716_v20 = vrot.slane %v1641_v54, 5  ;;  %v1894_v47 = vld [vmem:[#allocation2 + $0x70] sm:$0xf] }
 0x173   : > { %v1529_v17 = vsel %vm3941_vm14, %v1524_v7, %v1528_v51  ;;  %v1534_v18 = vrot.slane %v1533_v8, 4  ;;  %v1557_v29 = vor.u32 %v1556_v12, %v1552_v10  ;;  %v2865_v32 = vrot.slane %v1642_v61, 9  ;;  %v3158_v61 = vld [vmem:[#allocation2 + $0x60] sm:$0xff]  }
 0x174   : > { %v1714_v30 = vsel %vm3935_vm13, %v2864_v14, %v1713_v15  ;;  %v1715_v31 = vrot.slane %v1713_v15, 4  ;;  %v1548_v35 = vrot.slane %v1547_v19, 4  ;;  %v1720_v36 = vrot.slane %v1643_v4, 5  ;;  %v2164_v8 = vld [vmem:[#allocation2 + $0x64] sm:$0xf] }
 0x175   : > { %v1539_v34 = vsel %vm3941_vm14, %v1534_v18, %v1538_v62  ;;  %v1723_v38 = vrot.slane %v1644_v5, 5  ;;  %v1558_v42 = vrot.slane %v1557_v29, 4  ;;  %vm1086_vm15 = vcmask 64544   ;;  %v2166_v19 = vld [vmem:[#allocation2 + $0x6c] sm:$0xe] }
 0x176   : > { %v2856_v41 = vcombine.low %v1529_v17, %v1539_v34  ;;  %v1717_v43 = vsel %vm3935_vm13, %v1715_v31, %v1716_v20  ;;  %1329 = vrot.lane.b32.xlu1 %v3157_v6, %s3458_s1  ;;  %v1553_v50 = vsel %vm3941_vm14, %v1548_v35, %v1552_v10  ;;  %v1721_v1 = vsel %vm3935_vm13, %v2865_v32, %v1720_v36  ;;  %v1065_v48 = vpop.permute.xlu0 %1064  ;;  %v1229_v53 = vpop.permute.xlu1 %1228 }
 0x177   : > { %v2872_v57 = vcombine.low %v1714_v30, %v1717_v43  ;;  %v1722_v46 = vrot.slane %v1720_v36, 4  ;;  %v1563_v49 = vsel %vm3941_vm14, %v1558_v42, %v1562_v13  ;;  %vm810_vm1 = vcmask 31744   ;;  %v2165_v13 = vld [vmem:[#allocation2 + $0x68] sm:$0x1]  ;;  %v2168_v30 = vld [vmem:[#allocation2 + $0x74] sm:$0x1] }
 0x178   : > { %1600 = vrot.lane.b32.xlu0 %v2856_v41, %s3461_s21  ;;  %vm1250_vm2 = vcmask 97344   ;;  %v2041_v51 = vshrl.u32 %v1890_v22, 16  ;;  %v2857_v54 = vcombine.low %v1553_v50, %v1563_v49  ;;  %811 = vst.msk [vmem:[#allocation3] sm:$0xff] %vm810_vm1, %v3160_v21  ;;  %v2044_v56 = vshll.u32 %v1890_v22, 16  ;;  %812 = vst.msk [vmem:[#allocation3 + $0x8] sm:$0xff] %vm810_vm1, %v3161_v23 }
 0x179   : > { %v1724_v55 = vsel %vm3935_vm13, %v1722_v46, %v1723_v38  ;;  %v2050_v58 = vshll.u32 %v1891_v33, 16  ;;  %813 = vst.msk [vmem:[#allocation3 + $0x10] sm:$0xff] %vm810_vm1, %v3163_v24  ;;  %814 = vst.msk [vmem:[#allocation3 + $0x18] sm:$0xff] %vm810_vm1, %v3165_v25  ;;  %v2054_v63 = vshrl.u32 %v1891_v33, 16  ;;  %v2060_v0 = vshll.u32 %v1892_v39, 16  ;;  %v3159_v25 = vld [vmem:[#allocation2 + $0x6c] sm:$0xff]  }
 0x17a   : > { %815 = vst.msk [vmem:[#allocation3 + $0x20] sm:$0xff] %vm810_vm1, %v3167_v26  ;;  %816 = vst.msk [vmem:[#allocation3 + $0x28] sm:$0xff] %vm810_vm1, %v3168_v27  ;;  %v2873_v59 = vcombine.low %v1721_v1, %v1724_v55  ;;  %v2043_v62 = vrot.slane %v2041_v51, 4  ;;  %1602 = vrot.lane.b32.xlu1 %v2857_v54, %s3461_s21  ;;  %v2046_v4 = vrot.slane %v2044_v56, 5  ;;  %v2065_v6 = vshrl.u32 %v1893_v45, 16  ;;  %s4352_s21 = scalar_lea.hbm %s4515_s29, %s2922_s14 }
 0x17b   : > { %817 = vst.msk [vmem:[#allocation3 + $0x30] sm:$0xff] %vm810_vm1, %v3169_v28  ;;  %818 = vst.msk [vmem:[#allocation3 + $0x38] sm:$0xff] %vm810_vm1, %v3170_v40  ;;  %v2052_v5 = vrot.slane %v2050_v58, 5  ;;  %v2068_v7 = vshll.u32 %v1893_v45, 16  ;;  %v2056_v9 = vrot.slane %v2054_v63, 4  ;;  %v2062_v10 = vrot.slane %v2060_v0, 5 }
 0x17c   : > { %1087 = vst.msk [vmem:[#allocation3] sm:$0xff] %vm1086_vm15, %v4158_v11  ;;  %1088 = vst.msk [vmem:[#allocation3 + $0x8] sm:$0xff] %vm1086_vm15, %v1065_v48  ;;  %1761 = vrot.lane.b32.xlu0 %v2872_v57, %s3462_s7  ;;  %v2074_v11 = vshll.u32 %v1894_v47, 16  ;;  %v2078_v12 = vshrl.u32 %v1894_v47, 16  ;;  %v2047_v14 = vor.u32 %v2046_v4, %v2043_v62  ;;  %v2067_v15 = vrot.slane %v2065_v6, 4 }
 0x17d   : > { %1251 = vst.msk [vmem:[#allocation3] sm:$0xff] %vm1250_vm2, %v4161_v16  ;;  %1252 = vst.msk [vmem:[#allocation3 + $0x8] sm:$0xff] %vm1250_vm2, %v1229_v53  ;;  %v2070_v17 = vrot.slane %v2068_v7, 5  ;;  %v2084_v18 = vshll.u32 %v1895_v52, 16  ;;  %v1589_v16 = vpop.permute.xlu0 %1588  ;;  %v2057_v20 = vor.u32 %v2056_v9, %v2052_v5  ;;  %v2896_v23 = vrot.slane %v2163_v3, 9 }
 0x17e   : > { %v2076_v21 = vrot.slane %v2074_v11, 5  ;;  %v2080_v22 = vrot.slane %v2078_v12, 4  ;;  %v2167_v24 = vld [vmem:[#allocation2 + $0x70] sm:$0xf]  ;;  %1763 = vrot.lane.b32.xlu1 %v2873_v59, %s3462_s7  ;;  %v2048_v26 = vrot.slane %v2047_v14, 4  ;;  %v2237_v29 = vrot.slane %v2164_v8, 5 }
 0x17f   : > { %v2071_v27 = vor.u32 %v2070_v17, %v2067_v15  ;;  %v2086_v28 = vrot.slane %v2084_v18, 5  ;;  %v2058_v31 = vrot.slane %v2057_v20, 4  ;;  %v2240_v33 = vrot.slane %v2165_v13, 5  ;;  %v3166_v47 = vld [vmem:[#allocation10 + $0x10] ss:$0 sps:$4 sm:$0x33]  }
 0x180   : > { %1851 = vrot.lane.b32.xlu0 %v3158_v61, %s3463_s13  ;;  %v2081_v32 = vor.u32 %v2080_v22, %v2076_v21  ;;  %v2897_v34 = vrot.slane %v2166_v19, 9  ;;  %v2053_v35 = vsel %vm3941_vm14, %v2048_v26, %v2052_v5  ;;  %v2238_v38 = vsel %vm3935_vm13, %v2896_v23, %v2237_v29  ;;  %s2569_s7 = scalar_lea.sflag [#allocation6], %s3759_s2 }
 0x181   : > { %v2072_v36 = vrot.slane %v2071_v27, 4  ;;  %v2239_v39 = vrot.slane %v2237_v29, 4  ;;  %v1591_v40 = vpop.permute.xlu1 %1590  ;;  %v1750_v41 = vpop.permute.xlu0 %1749  ;;  %v2063_v42 = vsel %vm3941_vm14, %v2058_v31, %v2062_v10  ;;  %v2244_v45 = vrot.slane %v2167_v24, 5 }
 0x182   : > { %v2082_v43 = vrot.slane %v2081_v32, 4  ;;  %v2247_v50 = vrot.slane %v2168_v30, 5  ;;  %1853 = vrot.lane.b32.xlu1 %v3159_v25, %s3463_s13  ;;  %v2888_v57 = vcombine.low %v2053_v35, %v2063_v42  ;;  %vm1339_vm3 = vcmask 130144   ;;  %s3285_s13 = scalar_lea.vmem %s4344_s15, 2048 }
 0x183   : > { %v2077_v1 = vsel %vm3941_vm14, %v2072_v36, %v2076_v21  ;;  %v2241_v46 = vsel %vm3935_vm13, %v2239_v39, %v2240_v33  ;;  %v2245_v51 = vsel %vm3935_vm13, %v2897_v34, %v2244_v45  ;;  %v2246_v52 = vrot.slane %v2244_v45, 4  ;;  %1340 = vst.msk [vmem:[#allocation3] sm:$0xff] %vm1339_vm3, %v4148_v37  ;;  %1341 = vst.msk [vmem:[#allocation3 + $0x8] sm:$0xff] %vm1339_vm3, %v4152_v44  ;;  %p3286_p1 = scmp.ne.s32.totalorder %s4344_s15, %s3285_s13 }
 0x184   : > { %v2087_v48 = vsel %vm3941_vm14, %v2082_v43, %v2086_v28  ;;  %v2904_v49 = vcombine.low %v2238_v38, %v2241_v46  ;;  %2124 = vrot.lane.b32.xlu0 %v2888_v57, %s3464_s8  ;;  %vm1612_vm4 = vcmask 162944   ;;  %vm1773_vm5 = vcmask 195744  }
 0x185   : > { %v2889_v53 = vcombine.low %v2077_v1, %v2087_v48  ;;  %v1752_v54 = vpop.permute.xlu1 %1751  ;;  %vm1863_vm6 = vcmask 228544   ;;  %v1840_v2 = vpop.permute.xlu0 %1839  ;;  %v2248_v55 = vsel %vm3935_vm13, %v2246_v52, %v2247_v50  ;;  %1613 = vst.msk [vmem:[#allocation3] sm:$0xff] %vm1612_vm4, %v1589_v16  ;;  %1614 = vst.msk [vmem:[#allocation3 + $0x8] sm:$0xff] %vm1612_vm4, %v1591_v40  ;;  %vm2359_vm7 = vcmask 1041408   ;;  %p3287_p13 = pnand %p3286_p1, %p4516_p3 }
 0x186   : > { %v2905_v37 = vcombine.low %v2245_v51, %v2248_v55  ;;  %1774 = vst.msk [vmem:[#allocation3] sm:$0xff] %vm1773_vm5, %v1750_v41  ;;  %1775 = vst.msk [vmem:[#allocation3 + $0x8] sm:$0xff] %vm1773_vm5, %v1752_v54  ;;  %2990 = vmatprep.subr.msk.bf16.mxu0 %vm2359_vm7, %v3166_v47  ;;  %v2361_v44 = vsel %vm2359_vm7, %v3166_v47, 0  ;;  %vm2136_vm8 = vcmask 261344   ;;  %2991 = vmatprep.subr.msk.bf16.mxu1 %vm2359_vm7, %v3166_v47  ;;  %vm2297_vm9 = vcmask 294144  }
 0x187   : > { %2126 = vrot.lane.b32.xlu1 %v2889_v53, %s3464_s8  ;;  %1864 = vst.msk [vmem:[#allocation3] sm:$0xff] %vm1863_vm6, %v1840_v2  ;;  %2967 = vmatpush3.bf16.msra.mxu0 %v2361_v44  ;;  %vm2334_vm10 = vcmask 293888   ;;  %p3288_p7 = pneg %p3287_p13  ;;  %s3466_s8 = smov [#allocation12]  }
 0x188   : > { %2285 = vrot.lane.b32.xlu0 %v2904_v49, %s3465_s11  ;;  %2989 = vmatpush3.bf16.msra.mxu1 %v2361_v44 }
 0x189   : > { %v1842_v60 = vpop.permute.xlu1 %1841  ;;  %v2113_v56 = vpop.permute.xlu0 %2112 }
 0x18a   : > { %1865 = vst.msk [vmem:[#allocation3 + $0x8] sm:$0xff] %vm1863_vm6, %v1842_v60 }
 0x18b   : > { %2287 = vrot.lane.b32.xlu1 %v2905_v37, %s3465_s11  ;;  %2137 = vst.msk [vmem:[#allocation3] sm:$0xff] %vm2136_vm8, %v2113_v56  ;;  %s3289_s11 = sshll.u32 %s3466_s8, 4  ;;  %s3290_s11 = int_to_ptr.vmem [resolvable:$false] %s3289_s11 }
 0x18c   : > { %s3291_s18 = scalar_lea.vmem %s3290_s11, 4096  ;;  %p3292_p9 = scmp.lt.s32.totalorder %s4344_s15, %s3290_s11 }
 0x18d   : > { %v2115_v58 = vpop.permute.xlu1 %2114  ;;  %v2274_v59 = vpop.permute.xlu0 %2273  ;;  %p3293_p5 = scmp.lt.s32.totalorder %s3291_s18, %s3285_s13 }
 0x18e   : > { %2138 = vst.msk [vmem:[#allocation3 + $0x8] sm:$0xff] %vm2136_vm8, %v2115_v58 }
 0x18f   : > { %2298 = vst.msk [vmem:[#allocation3] sm:$0xff] %vm2297_vm9, %v2274_v59  ;;  %p3294_p8 = por %p3293_p5, %p3292_p9 }
 0x191   : > { %p3295_p12 = pnand %p3294_p8, %p3288_p7 }
 0x192   : > { %v2276_v61 = vpop.permute.xlu0 %2275 }
 0x193   : > { %2299 = vst.msk [vmem:[#allocation3 + $0x8] sm:$0xff] %vm2297_vm9, %v2276_v61 }
 0x194   : > { %v1067_v62 = vpop.permute.xlu1 %1066 }
 0x195   : > { %1089 = vst.msk [vmem:[#allocation3 + $0x10] sm:$0xff] %vm1086_vm15, %v1067_v62 }
 0x196   : > { %v2306_v63 = vld [vmem:[#allocation3] sm:$0xff] }
 0x197   : > { %2968 = vmatprep.mubr.msk.bf16.mxu0 %vm2334_vm10, %v2306_v63 }
 0x198   : > { %v1231_v0 = vpop.permute.xlu0 %1230  ;;  %v1069_v3 = vpop.permute.xlu1 %1068 }
 0x199   : > { %1253 = vst.msk [vmem:[#allocation3 + $0x10] sm:$0xff] %vm1250_vm2, %v1231_v0 }
 0x19a   : > { %1090 = vst.msk [vmem:[#allocation3 + $0x18] sm:$0xff] %vm1086_vm15, %v1069_v3  ;;  %v2307_v4 = vld [vmem:[#allocation3 + $0x8] sm:$0xff] }
 0x19b   : > { %2969 = vmatmul.mubr.msk.bf16.vlgmr.msra.gmra.mrb[0].mxu0 %vm2334_vm10, %v2307_v4 }
 0x19c   : > { %v1320_v5 = vpop.permute.xlu0 %1319  ;;  %v1233_v6 = vpop.permute.xlu1 %1232 }
 0x19d   : > { %1342 = vst.msk [vmem:[#allocation3 + $0x10] sm:$0xff] %vm1339_vm3, %v1320_v5 }
 0x19e   : > { %1254 = vst.msk [vmem:[#allocation3 + $0x18] sm:$0xff] %vm1250_vm2, %v1233_v6 }
 0x1a0   : > { %v1322_v7 = vpop.permute.xlu1 %1321 }
 0x1a1   : > { %1343 = vst.msk [vmem:[#allocation3 + $0x18] sm:$0xff] %vm1339_vm3, %v1322_v7 }
 0x1a2   : > { %v1593_v8 = vpop.permute.xlu0 %1592 }
 0x1a3   : > { %1615 = vst.msk [vmem:[#allocation3 + $0x10] sm:$0xff] %vm1612_vm4, %v1593_v8 }
 0x1a4   : > { %v1595_v9 = vpop.permute.xlu1 %1594 }
 0x1a5   : > { %1616 = vst.msk [vmem:[#allocation3 + $0x18] sm:$0xff] %vm1612_vm4, %v1595_v9 }
 0x1a6   : > { %v1754_v10 = vpop.permute.xlu0 %1753 }
 0x1a7   : > { %1776 = vst.msk [vmem:[#allocation3 + $0x10] sm:$0xff] %vm1773_vm5, %v1754_v10 }
 0x1a8   : > { %v1756_v11 = vpop.permute.xlu1 %1755 }
 0x1a9   : > { %1777 = vst.msk [vmem:[#allocation3 + $0x18] sm:$0xff] %vm1773_vm5, %v1756_v11 }
 0x1aa   : > { %v1844_v12 = vpop.permute.xlu0 %1843 }
 0x1ab   : > { %1866 = vst.msk [vmem:[#allocation3 + $0x10] sm:$0xff] %vm1863_vm6, %v1844_v12 }
 0x1ac   : > { %v1846_v13 = vpop.permute.xlu1 %1845 }
 0x1ad   : > { %1867 = vst.msk [vmem:[#allocation3 + $0x18] sm:$0xff] %vm1863_vm6, %v1846_v13 }
 0x1ae   : > { %v2117_v14 = vpop.permute.xlu0 %2116 }
 0x1af   : > { %2139 = vst.msk [vmem:[#allocation3 + $0x10] sm:$0xff] %vm2136_vm8, %v2117_v14 }
 0x1b0   : > { %v2119_v15 = vpop.permute.xlu1 %2118 }
 0x1b1   : > { %2140 = vst.msk [vmem:[#allocation3 + $0x18] sm:$0xff] %vm2136_vm8, %v2119_v15 }
 0x1b2   : > { %v2278_v17 = vpop.permute.xlu0 %2277 }
 0x1b3   : > { %2300 = vst.msk [vmem:[#allocation3 + $0x10] sm:$0xff] %vm2297_vm9, %v2278_v17 }
 0x1b6   : > { %v2280_v18 = vpop.permute.xlu0 %2279 }
 0x1b7   : > { %2301 = vst.msk [vmem:[#allocation3 + $0x18] sm:$0xff] %vm2297_vm9, %v2280_v18  ;;  %v1071_v19 = vpop.permute.xlu1 %1070 }
 0x1b8   : > { %1091 = vst.msk [vmem:[#allocation3 + $0x20] sm:$0xff] %vm1086_vm15, %v1071_v19 }
 0x1ba   : > { %v2308_v16 = vld [vmem:[#allocation3 + $0x10] sm:$0xff] }
 0x1bb   : > { %2972 = vmatprep.mubr.msk.bf16.mxu0 %vm2334_vm10, %v2308_v16 }
 0x1bc   : > { %v1235_v20 = vpop.permute.xlu0 %1234  ;;  %v1073_v21 = vpop.permute.xlu1 %1072 }
 0x1bd   : > { %1255 = vst.msk [vmem:[#allocation3 + $0x20] sm:$0xff] %vm1250_vm2, %v1235_v20 }
 0x1be   : > { %1092 = vst.msk [vmem:[#allocation3 + $0x28] sm:$0xff] %vm1086_vm15, %v1073_v21  ;;  %v2309_v22 = vld [vmem:[#allocation3 + $0x18] sm:$0xff] }
 0x1bf   : > { %2973 = vmatmul.mubr.msk.bf16.gmra.mrb[4].mxu0 %vm2334_vm10, %v2309_v22 }
 0x1c0   : > { %v1324_v23 = vpop.permute.xlu0 %1323  ;;  %v1237_v24 = vpop.permute.xlu1 %1236 }
 0x1c1   : > { %1344 = vst.msk [vmem:[#allocation3 + $0x20] sm:$0xff] %vm1339_vm3, %v1324_v23 }
 0x1c2   : > { %1256 = vst.msk [vmem:[#allocation3 + $0x28] sm:$0xff] %vm1250_vm2, %v1237_v24 }
 0x1c4   : > { %v1326_v25 = vpop.permute.xlu1 %1325 }
 0x1c5   : > { %1345 = vst.msk [vmem:[#allocation3 + $0x28] sm:$0xff] %vm1339_vm3, %v1326_v25 }
 0x1c6   : > { %v1597_v26 = vpop.permute.xlu0 %1596 }
 0x1c7   : > { %1617 = vst.msk [vmem:[#allocation3 + $0x20] sm:$0xff] %vm1612_vm4, %v1597_v26 }
 0x1c8   : > { %v1599_v27 = vpop.permute.xlu1 %1598 }
 0x1c9   : > { %1618 = vst.msk [vmem:[#allocation3 + $0x28] sm:$0xff] %vm1612_vm4, %v1599_v27 }
 0x1ca   : > { %v1758_v28 = vpop.permute.xlu0 %1757 }
 0x1cb   : > { %1778 = vst.msk [vmem:[#allocation3 + $0x20] sm:$0xff] %vm1773_vm5, %v1758_v28 }
 0x1cc   : > { %v1760_v29 = vpop.permute.xlu1 %1759 }
 0x1cd   : > { %1779 = vst.msk [vmem:[#allocation3 + $0x28] sm:$0xff] %vm1773_vm5, %v1760_v29 }
 0x1ce   : > { %v1848_v30 = vpop.permute.xlu0 %1847 }
 0x1cf   : > { %1868 = vst.msk [vmem:[#allocation3 + $0x20] sm:$0xff] %vm1863_vm6, %v1848_v30 }
 0x1d0   : > { %v1850_v31 = vpop.permute.xlu1 %1849 }
 0x1d1   : > { %1869 = vst.msk [vmem:[#allocation3 + $0x28] sm:$0xff] %vm1863_vm6, %v1850_v31 }
 0x1d2   : > { %v2121_v32 = vpop.permute.xlu0 %2120 }
 0x1d3   : > { %2141 = vst.msk [vmem:[#allocation3 + $0x20] sm:$0xff] %vm2136_vm8, %v2121_v32 }
 0x1d4   : > { %v2123_v33 = vpop.permute.xlu1 %2122 }
 0x1d5   : > { %2142 = vst.msk [vmem:[#allocation3 + $0x28] sm:$0xff] %vm2136_vm8, %v2123_v33 }
 0x1d6   : > { %v2282_v34 = vpop.permute.xlu0 %2281 }
 0x1d7   : > { %2302 = vst.msk [vmem:[#allocation3 + $0x20] sm:$0xff] %vm2297_vm9, %v2282_v34 }
 0x1da   : > { %v2284_v35 = vpop.permute.xlu0 %2283 }
 0x1db   : > { %2303 = vst.msk [vmem:[#allocation3 + $0x28] sm:$0xff] %vm2297_vm9, %v2284_v35  ;;  %v1075_v36 = vpop.permute.xlu1 %1074 }
 0x1dc   : > { %1093 = vst.msk [vmem:[#allocation3 + $0x30] sm:$0xff] %vm1086_vm15, %v1075_v36 }
 0x1de   : > { %v2310_v38 = vld [vmem:[#allocation3 + $0x20] sm:$0xff] }
 0x1df   : > { %2976 = vmatprep.mubr.msk.bf16.mxu1 %vm2334_vm10, %v2310_v38 }
 0x1e0   : > { %v1239_v39 = vpop.permute.xlu0 %1238  ;;  %v1077_v40 = vpop.permute.xlu1 %1076 }
 0x1e1   : > { %1257 = vst.msk [vmem:[#allocation3 + $0x30] sm:$0xff] %vm1250_vm2, %v1239_v39 }
 0x1e2   : > { %1094 = vst.msk [vmem:[#allocation3 + $0x38] sm:$0xff] %vm1086_vm15, %v1077_v40  ;;  %v2311_v41 = vld [vmem:[#allocation3 + $0x28] sm:$0xff] }
 0x1e3   : > { %2977 = vmatmul.mubr.msk.bf16.vlgmr.msra.gmra.mrb[0].mxu1 %vm2334_vm10, %v2311_v41 }
 0x1e4   : > { %v1328_v42 = vpop.permute.xlu0 %1327  ;;  %v1241_v43 = vpop.permute.xlu1 %1240 }
 0x1e5   : > { %1346 = vst.msk [vmem:[#allocation3 + $0x30] sm:$0xff] %vm1339_vm3, %v1328_v42 }
 0x1e6   : > { %1258 = vst.msk [vmem:[#allocation3 + $0x38] sm:$0xff] %vm1250_vm2, %v1241_v43 }
 0x1e8   : > { %v1330_v45 = vpop.permute.xlu1 %1329 }
 0x1e9   : > { %1347 = vst.msk [vmem:[#allocation3 + $0x38] sm:$0xff] %vm1339_vm3, %v1330_v45 }
 0x1ea   : > { %v1601_v50 = vpop.permute.xlu0 %1600 }
 0x1eb   : > { %1619 = vst.msk [vmem:[#allocation3 + $0x30] sm:$0xff] %vm1612_vm4, %v1601_v50 }
 0x1ec   : > { %v1603_v57 = vpop.permute.xlu1 %1602 }
 0x1ed   : > { %1620 = vst.msk [vmem:[#allocation3 + $0x38] sm:$0xff] %vm1612_vm4, %v1603_v57 }
 0x1ee   : > { %v1762_v1 = vpop.permute.xlu0 %1761 }
 0x1ef   : > { %1780 = vst.msk [vmem:[#allocation3 + $0x30] sm:$0xff] %vm1773_vm5, %v1762_v1 }
 0x1f0   : > { %v1764_v46 = vpop.permute.xlu1 %1763 }
 0x1f1   : > { %1781 = vst.msk [vmem:[#allocation3 + $0x38] sm:$0xff] %vm1773_vm5, %v1764_v46 }
 0x1f2   : > { %v1852_v47 = vpop.permute.xlu0 %1851 }
 0x1f3   : > { %1870 = vst.msk [vmem:[#allocation3 + $0x30] sm:$0xff] %vm1863_vm6, %v1852_v47 }
 0x1f4   : > { %v1854_v48 = vpop.permute.xlu1 %1853 }
 0x1f5   : > { %1871 = vst.msk [vmem:[#allocation3 + $0x38] sm:$0xff] %vm1863_vm6, %v1854_v48 }
 0x1f6   : > { %v2125_v49 = vpop.permute.xlu0 %2124 }
 0x1f7   : > { %2143 = vst.msk [vmem:[#allocation3 + $0x30] sm:$0xff] %vm2136_vm8, %v2125_v49 }
 0x1f9   : > { %v2127_v51 = vpop.permute.xlu1 %2126 }
 0x1fa   : > { %2144 = vst.msk [vmem:[#allocation3 + $0x38] sm:$0xff] %vm2136_vm8, %v2127_v51  ;;  %v2286_v52 = vpop.permute.xlu0 %2285 }
 0x1fb   : > { %2304 = vst.msk [vmem:[#allocation3 + $0x30] sm:$0xff] %vm2297_vm9, %v2286_v52 }
 0x1fd   : > { %v2288_v53 = vpop.permute.xlu1 %2287 }
 0x1fe   : > { %2305 = vst.msk [vmem:[#allocation3 + $0x38] sm:$0xff] %vm2297_vm9, %v2288_v53 }
 0x202   : > { %v2312_v54 = vld [vmem:[#allocation3 + $0x30] sm:$0xff] }
 0x203   : > { %2980 = vmatprep.mubr.msk.bf16.mxu1 %vm2334_vm10, %v2312_v54 }
 0x205   : > { %v2313_v2 = vld [vmem:[#allocation3 + $0x38] sm:$0xff] }
 0x206   : > { %2981 = vmatmul.mubr.msk.bf16.gmra.mrb[4].mxu1 %vm2334_vm10, %v2313_v2 }
 0x26e   : > { %v2970_v55 = vpop.f32.mrb[0].mxu0 }
 0x26f   : > { %2462 = vst.msk [vmem:[%s3905_s16 + $0x10] sm:$0xff] %vm810_vm1, %v2970_v55  ;;  %v2397_v37 = vpop.f32.mrb[1].mxu0  ;;  %v2515_v58 = vmul.f32 %v2970_v55, %v2970_v55  ;;  %v2479_v0 = vsel %vm810_vm1, %v2970_v55, 0.0 }
 0x270   : > { %2460 = vst.msk [vmem:[%s3905_s16] sm:$0xff] %vm810_vm1, %v2397_v37  ;;  %v2513_v44 = vmul.f32 %v2397_v37, %v2397_v37  ;;  %v2971_v60 = vpop.f32.mrb[2].mxu0  ;;  %v2476_v59 = vsel %vm810_vm1, %v2397_v37, 0.0 }
 0x271   : > { %2463 = vst.msk [vmem:[%s3905_s16 + $0x18] sm:$0xff] %vm810_vm1, %v2971_v60  ;;  %v2400_v56 = vpop.f32.mrb[3].mxu0  ;;  %v2516_v4 = vmul.f32 %v2971_v60, %v2971_v60  ;;  %v2532_v8 = vsel %vm810_vm1, %v2515_v58, 0.0  ;;  %v2481_v9 = vsel %vm810_vm1, %v2971_v60, 0.0 }
 0x272   : > { %2461 = vst.msk [vmem:[%s3905_s16 + $0x8] sm:$0xff] %vm810_vm1, %v2400_v56  ;;  %v2477_v61 = vsel %vm810_vm1, %v2400_v56, 0.0  ;;  %v2514_v62 = vmul.f32 %v2400_v56, %v2400_v56  ;;  %v2529_v3 = vsel %vm810_vm1, %v2513_v44, 0.0 }
 0x273   : > { %v2478_v63 = vadd.f32 %v2477_v61, %v2476_v59  ;;  %v2534_v12 = vsel %vm810_vm1, %v2516_v4, 0.0 }
 0x274   : > { %v2530_v5 = vsel %vm810_vm1, %v2514_v62, 0.0 }
 0x275   : > { %v2480_v6 = vadd.f32 %v2479_v0, %v2478_v63  ;;  %v2531_v7 = vadd.f32 %v2530_v5, %v2529_v3 }
 0x277   : > { %v2533_v10 = vadd.f32 %v2532_v8, %v2531_v7  ;;  %v2482_v11 = vadd.f32 %v2481_v9, %v2480_v6 }
 0x279   : > { %v2535_v13 = vadd.f32 %v2534_v12, %v2533_v10 }
 0x292   : > { %v2974_v14 = vpop.f32.mrb[4].mxu0 }
 0x293   : > { %2466 = vst.msk [vmem:[%s3905_s16 + $0x30] sm:$0xff] %vm810_vm1, %v2974_v14  ;;  %v2413_v15 = vpop.f32.mrb[5].mxu0  ;;  %v2519_v21 = vmul.f32 %v2974_v14, %v2974_v14  ;;  %v2487_v27 = vsel %vm810_vm1, %v2974_v14, 0.0 }
 0x294   : > { %2464 = vst.msk [vmem:[%s3905_s16 + $0x20] sm:$0xff] %vm810_vm1, %v2413_v15  ;;  %v2483_v17 = vsel %vm810_vm1, %v2413_v15, 0.0  ;;  %v2517_v18 = vmul.f32 %v2413_v15, %v2413_v15  ;;  %v2975_v19 = vpop.f32.mrb[6].mxu0 }
 0x295   : > { %v2484_v16 = vadd.f32 %v2483_v17, %v2482_v11  ;;  %2467 = vst.msk [vmem:[%s3905_s16 + $0x38] sm:$0xff] %vm810_vm1, %v2975_v19  ;;  %v2416_v20 = vpop.f32.mrb[7].mxu0  ;;  %v2520_v28 = vmul.f32 %v2975_v19, %v2975_v19  ;;  %v2540_v32 = vsel %vm810_vm1, %v2519_v21, 0.0  ;;  %v2489_v33 = vsel %vm810_vm1, %v2975_v19, 0.0 }
 0x296   : > { %v2536_v22 = vsel %vm810_vm1, %v2517_v18, 0.0  ;;  %2465 = vst.msk [vmem:[%s3905_s16 + $0x28] sm:$0xff] %vm810_vm1, %v2416_v20  ;;  %v2485_v23 = vsel %vm810_vm1, %v2416_v20, 0.0  ;;  %v2518_v24 = vmul.f32 %v2416_v20, %v2416_v20 }
 0x297   : > { %v2537_v25 = vadd.f32 %v2536_v22, %v2535_v13  ;;  %v2486_v26 = vadd.f32 %v2485_v23, %v2484_v16  ;;  %v2542_v36 = vsel %vm810_vm1, %v2520_v28, 0.0 }
 0x298   : > { %v2538_v29 = vsel %vm810_vm1, %v2518_v24, 0.0 }
 0x299   : > { %v2488_v30 = vadd.f32 %v2487_v27, %v2486_v26  ;;  %v2539_v31 = vadd.f32 %v2538_v29, %v2537_v25 }
 0x29b   : > { %v2541_v34 = vadd.f32 %v2540_v32, %v2539_v31  ;;  %v2490_v35 = vadd.f32 %v2489_v33, %v2488_v30 }
 0x29d   : > { %v2543_v38 = vadd.f32 %v2542_v36, %v2541_v34 }
 0x2b6   : > { %v2978_v39 = vpop.f32.mrb[0].mxu1 }
 0x2b7   : > { %2470 = vst.msk [vmem:[%s3905_s16 + $0x50] sm:$0xff] %vm810_vm1, %v2978_v39  ;;  %v2429_v40 = vpop.f32.mrb[1].mxu1  ;;  %v2523_v57 = vmul.f32 %v2978_v39, %v2978_v39  ;;  %v2495_v51 = vsel %vm810_vm1, %v2978_v39, 0.0 }
 0x2b8   : > { %2468 = vst.msk [vmem:[%s3905_s16 + $0x40] sm:$0xff] %vm810_vm1, %v2429_v40  ;;  %v2491_v41 = vsel %vm810_vm1, %v2429_v40, 0.0  ;;  %v2521_v42 = vmul.f32 %v2429_v40, %v2429_v40  ;;  %v2979_v43 = vpop.f32.mrb[2].mxu1 }
 0x2b9   : > { %v2492_v45 = vadd.f32 %v2491_v41, %v2490_v35  ;;  %2471 = vst.msk [vmem:[%s3905_s16 + $0x58] sm:$0xff] %vm810_vm1, %v2979_v43  ;;  %v2432_v50 = vpop.f32.mrb[3].mxu1  ;;  %v2524_v52 = vmul.f32 %v2979_v43, %v2979_v43  ;;  %v2548_v55 = vsel %vm810_vm1, %v2523_v57, 0.0  ;;  %v2497_v37 = vsel %vm810_vm1, %v2979_v43, 0.0 }
 0x2ba   : > { %v2544_v1 = vsel %vm810_vm1, %v2521_v42, 0.0  ;;  %2469 = vst.msk [vmem:[%s3905_s16 + $0x48] sm:$0xff] %vm810_vm1, %v2432_v50  ;;  %v2493_v46 = vsel %vm810_vm1, %v2432_v50, 0.0  ;;  %v2522_v47 = vmul.f32 %v2432_v50, %v2432_v50 }
 0x2bb   : > { %v2545_v48 = vadd.f32 %v2544_v1, %v2543_v38  ;;  %v2494_v49 = vadd.f32 %v2493_v46, %v2492_v45  ;;  %v2550_v56 = vsel %vm810_vm1, %v2524_v52, 0.0 }
 0x2bc   : > { %v2546_v53 = vsel %vm810_vm1, %v2522_v47, 0.0 }
 0x2bd   : > { %v2496_v54 = vadd.f32 %v2495_v51, %v2494_v49  ;;  %v2547_v2 = vadd.f32 %v2546_v53, %v2545_v48 }
 0x2bf   : > { %v2549_v44 = vadd.f32 %v2548_v55, %v2547_v2  ;;  %v2498_v60 = vadd.f32 %v2497_v37, %v2496_v54 }
 0x2c1   : > { %v2551_v58 = vadd.f32 %v2550_v56, %v2549_v44 }
 0x2d9   : > { %v2982_v59 = vpop.f32.mrb[4].mxu1 }
 0x2da   : > { %2474 = vst.msk [vmem:[%s3905_s16 + $0x70] sm:$0xff] %vm810_vm1, %v2982_v59  ;;  %v2445_v61 = vpop.f32.mrb[5].mxu1  ;;  %v2527_v5 = vmul.f32 %v2982_v59, %v2982_v59 }
 0x2db   : > { %2472 = vst.msk [vmem:[%s3905_s16 + $0x60] sm:$0xff] %vm810_vm1, %v2445_v61  ;;  %v2499_v62 = vsel %vm810_vm1, %v2445_v61, 0.0  ;;  %v2525_v63 = vmul.f32 %v2445_v61, %v2445_v61  ;;  %v2983_v0 = vpop.f32.mrb[6].mxu1 }
 0x2dc   : > { %v2500_v3 = vadd.f32 %v2499_v62, %v2498_v60  ;;  %2475 = vst.msk [vmem:[%s3905_s16 + $0x78] sm:$0xff] %vm810_vm1, %v2983_v0  ;;  %v2448_v4 = vpop.f32.mrb[7].mxu1 }
 0x2dd   : > { %v2552_v6 = vsel %vm810_vm1, %v2525_v63, 0.0  ;;  %2473 = vst.msk [vmem:[%s3905_s16 + $0x68] sm:$0xff] %vm810_vm1, %v2448_v4  ;;  %v2501_v7 = vsel %vm810_vm1, %v2448_v4, 0.0  ;;  %v2526_v8 = vmul.f32 %v2448_v4, %v2448_v4 }
 0x2de   : > { %v2553_v9 = vadd.f32 %v2552_v6, %v2551_v58  ;;  %v2502_v10 = vadd.f32 %v2501_v7, %v2500_v3 }
 0x2df   : > { %3298 = shalt.err (!%p3295_p12)
}
 0x2e0   : > { %s3299_s16 = scalar_lea.hbm %s4352_s21, 2048  ;;  %s3303_s14 = scalar_lea.hbm %s4515_s29, 8192 }
 0x2e1   : > { %p3300_p2 = scmp.ne.s32.totalorder %s4352_s21, %s3299_s16  ;;  %p3304_p0 = scmp.lt.u32.totalorder %s4352_s21, %s4515_s29 }
 0x2e2   : > { %p3305_p11 = scmp.lt.u32.totalorder %s3303_s14, %s3299_s16  ;;  %p3307_p1 = scmp.lt.u32.totalorder %s3299_s16, %s4352_s21 }
 0x2e3   : > { %p3301_p6 = pnand %p3300_p2, %p4516_p3 }
 0x2e4   : > { %p3306_p4 = por %p3305_p11, %p3304_p0 }
 0x2e5   : > { %p3302_p10 = pneg %p3301_p6 }
 0x2e6   : > { %p3308_p13 = por %p3307_p1, %p3306_p4 }
 0x2e8   : > { %p3309_p7 = pnand %p3308_p13, %p3302_p10 }
 0x2ea   : > { %3312 = shalt.err (!%p3309_p7)
}
 0x2eb   : > { %s3467_s13 = smov 128   ;;  %v2503_v11 = vsel %vm810_vm1, %v2982_v59, 0.0  ;;  %v2528_v12 = vmul.f32 %v2983_v0, %v2983_v0  ;;  %v2554_v13 = vsel %vm810_vm1, %v2526_v8, 0.0  ;;  %v2556_v17 = vsel %vm810_vm1, %v2527_v5, 0.0  ;;  %s3468_s12 = smov [#allocation13]  }
 0x2ec   : > { %3006 = dma.vmem_to_hbm [thread:$0]  (%p4516_p3), %s4344_s15, 2048, %s4352_s21, %s2569_s7, %s3467_s13, %s3467_s13, %s3459_s3   ;;  %v2504_v14 = vadd.f32 %v2503_v11, %v2502_v10  ;;  %v2555_v15 = vadd.f32 %v2554_v13, %v2553_v9  ;;  %v2505_v18 = vsel %vm810_vm1, %v2983_v0, 0.0 }
 0x2ed   : > { %v2558_v20 = vsel %vm810_vm1, %v2528_v12, 0.0  ;;  %s2923_s3 = sshll.u32 %s3435_s25, 1  ;;  %s2608_s7 = sshll.u32 %s3909_s17, 4  ;;  %s4400_s7 = int_to_ptr.vmem [resolvable:$true] %s2608_s7 }
 0x2ee   : > { %v2506_v19 = vadd.f32 %v2505_v18, %v2504_v14  ;;  %v2557_v16 = vadd.f32 %v2556_v17, %v2555_v15  ;;  %s2604_s15 = sadd.s32 %s3431_s24, %s2923_s3  ;;  %s4517_s25 = sld [smem:[#allocation27_spill]] }
 0x2ef   : > { %s2924_s21 = sshll.u32 %s2604_s15, 5  ;;  %s2574_s24 = scalar_lea.sflag [#allocation14], %s3759_s2 }
 0x2f0   : > { %v2507_v21 = vrot.slane %v2506_v19, 4  ;;  %v2559_v22 = vadd.f32 %v2558_v20, %v2557_v16  ;;  %s3313_s6 = scalar_lea.vmem %s4400_s7, 32  ;;  %s3317_s14 = sshll.u32 %s3468_s12, 4  ;;  %s3318_s14 = int_to_ptr.vmem [resolvable:$false] %s3317_s14 }
 0x2f1   : > { %p3314_p9 = scmp.ne.s32.totalorder %s4400_s7, %s3313_s6  ;;  %s3319_s10 = scalar_lea.vmem %s3318_s14, 64 }
 0x2f2   : > { %v2508_v23 = vadd.f32 %v2507_v21, %v2506_v19  ;;  %v2560_v24 = vrot.slane %v2559_v22, 4  ;;  %p3320_p12 = scmp.lt.s32.totalorder %s4400_s7, %s3318_s14  ;;  %p3321_p2 = scmp.lt.s32.totalorder %s3319_s10, %s3313_s6 }
 0x2f3   : > { %p3315_p5 = pnand %p3314_p9, %p4516_p3 }
 0x2f4   : > { %v2509_v25 = vrot.slane %v2508_v23, 2  ;;  %v2561_v26 = vadd.f32 %v2560_v24, %v2559_v22  ;;  %s4518_s16 = smov %s4517_s25  ;;  %s4398_s18 = scalar_lea.hbm %s4517_s25, %s2924_s21 }
 0x2f5   : > { %p3316_p8 = pneg %p3315_p5  ;;  %p3322_p6 = por %p3321_p2, %p3320_p12 }
 0x2f6   : > { %v2510_v27 = vadd.f32 %v2509_v25, %v2508_v23  ;;  %v2562_v28 = vrot.slane %v2561_v26, 2 }
 0x2f7   : > { %p3323_p10 = pnand %p3322_p6, %p3316_p8 }
 0x2f8   : > { %v2511_v29 = vrot.slane %v2510_v27, 1  ;;  %v2563_v30 = vadd.f32 %v2562_v28, %v2561_v26 }
 0x2fa   : > { %v2512_v31 = vadd.f32 %v2511_v29, %v2510_v27  ;;  %v2564_v32 = vrot.slane %v2563_v30, 1 }
 0x2fc   : > { %v2565_v33 = vadd.f32 %v2564_v32, %v2563_v30  ;;  %2566 = vst.msk [vmem:[%s3909_s17] sm:$0x1] %vm316_vm0, %v2512_v31 }
 0x2fe   : > { %2567 = vst.msk [vmem:[%s3909_s17 + $0x1] sm:$0x1] %vm316_vm0, %v2565_v33 }
 0x2ff   : > { %3326 = shalt.err (!%p3323_p10)
}
 0x300   : > { %s3327_s2 = scalar_lea.hbm %s4398_s18, 32  ;;  %s3331_s13 = scalar_lea.hbm %s4518_s16, 128 }
 0x301   : > { %p3328_p0 = scmp.ne.s32.totalorder %s4398_s18, %s3327_s2  ;;  %p3332_p1 = scmp.lt.u32.totalorder %s4398_s18, %s4518_s16 }
 0x302   : > { %p3333_p13 = scmp.lt.u32.totalorder %s3331_s13, %s3327_s2  ;;  %p3335_p9 = scmp.lt.u32.totalorder %s3327_s2, %s4398_s18 }
 0x303   : > { %p3329_p11 = pnand %p3328_p0, %p4516_p3 }
 0x304   : > { %p3334_p7 = por %p3333_p13, %p3332_p1 }
 0x305   : > { %p3330_p4 = pneg %p3329_p11 }
 0x306   : > { %p3336_p5 = por %p3335_p9, %p3334_p7 }
 0x308   : > { %p3337_p8 = pnand %p3336_p5, %p3330_p4 }
 0x30a   : > { %3340 = shalt.err (!%p3337_p8)
}
 0x30b   : > { %3007 = dma.vmem_to_hbm [thread:$0]  (%p4516_p3), %s4400_s7, 32, %s4398_s18, %s2574_s24  }
 0x30c PF: > { %s4519_s21 = sld [smem:[#allocation20_spill]]  ;;  %s4520_s8 = sld [smem:[#allocation21_spill]] }
 0x30d   : > { %p3038_p12 = scmp.ge.s32.totalorder %s3447_s28, 2 }
 0x312   : > { %s2620_s11 = sand.u32 1, %s4519_s21   ;;  %p4521_p2 = scmp.ne.s32.totalorder %s4520_s8, 0 }
 0x313   : > { %s2621_s25 = scalar_lea.sflag [#allocation6], %s2620_s11 }
 0x314   : > { %p3025_p6 = pnand %p3038_p12, %p4521_p2 }
 0x316   : > { %3398 = dma.done.wait (!%p3025_p6), %s2621_s25, 2048  }
 0x317   : > { %3400 = vsyncadd (!%p3025_p6), %s2621_s25, 4294965248  ;;  %s2630_s6 = scalar_lea.sflag [#allocation14], %s2620_s11 }
 0x318   : > { %3402 = dma.done.wait (!%p3025_p6), %s2630_s6, 32  }
 0x319   : > { %3404 = vsyncadd (!%p3025_p6), %s2630_s6, 4294967264  ;;  %s27_s28 = sadd.s32 1, %s3447_s28   ;;  %s4522_s9 = sld [smem:[#allocation22_spill]] }
 0x31a   : > { %p24_p10 = scmp.ge.s32.totalorder %s27_s28, 6   ;;  %s4523_s18 = smov %s3411_s19 }
 0x31b   : > { %s4524_s19 = smov %s3415_s20  ;;  %s4525_s20 = smov %s3695_s5 }
 0x31c   : > { %s4526_s21 = smov %s3423_s22  ;;  %s4527_s22 = smov %s3427_s23 }
 0x31d   : > { %s4528_s23 = smov %s3690_s4  ;;  %s4529_s24 = smov %s3439_s26 }
 0x31e   : > { %s4530_s25 = smov %s3443_s27  ;;  %s4531_s26 = smov %s4534_s30 }
 0x31f   : > { %s4532_s27 = smov %s4522_s9  ;;  %26 = sbr.rel (!%p24_p10) target bundleno = 19 (0x13), region = 124 }
 0x326   :  { %2635 = vsyncpa [#allocation5], 1 }
 0x327   :  { %2637 = vsyncpa [#allocation5 + $0x1], 1 }
 0x328   :  { %2638 = vsyncpa [#allocation8], 1 }
 0x329   :  { %2639 = vsyncpa [#allocation11], 1 }
 0x32a   :  { %2640 = vsyncpa [#allocation6], 1 }
 0x32b   :  { %2642 = vsyncpa [#allocation6 + $0x1], 1 }
 0x32c   :  { %2643 = vsyncpa [#allocation14], 1 }
 0x32d   :  { %2645 = vsyncpa [#allocation14 + $0x1], 1 }

</bundles_post_ra>
